<compile_context>
chip_gen: v7x
topology: tpu7x:2x2x1
jax: 0.10.0
libtpu: 0.0.40
codegen_flags: <defaults>
</compile_context>

<pallas_src>
import functools

import jax
import jax.numpy as jnp
from jax.experimental import pallas as pl
from jax.experimental.pallas import tpu as pltpu


LANE = 128


def _default_vmem_limit():
    # v5e/v6e: 128 MiB physical VMEM -> ~96 MiB scoped; v7x: 64 MiB -> ~48 MiB.
    try:
        cap = pltpu.get_tpu_info().vmem_capacity_bytes
        return int(min(cap * 3 // 4, 96 * 1024 * 1024))
    except Exception:
        return 48 * 1024 * 1024


_VMEM_LIMIT = _default_vmem_limit()


def _round_up(x, m):
    return (x + m - 1) // m * m


def _pick_tile(n, cands=(512, 384, 256, 128)):
    # Prefer >=256-deep tiles (v6e/v7x MXU is 2x256x256); fall back to the full dim.
    for c in cands:
        if n % c == 0:
            return c
    return n


def _row_tile(m):
    tm = min(256, _round_up(m, 8))
    return tm, _round_up(m, tm)


def _q_tile(nq):
    for t in (128, 64, 32):
        if nq % t == 0 and nq > t:
            return t
    return nq


def _pad1(a, n):
    return jnp.pad(a, (0, n - a.shape[0]))


def _pad2(a, r, c):
    return jnp.pad(a, ((0, r - a.shape[0]), (0, c - a.shape[1])))


def _gelu(y):
    # exact (erf-based) GELU, matching torch.nn.GELU() default
    return 0.5 * y * (1.0 + jax.lax.erf(y * 0.7071067811865476))


def _layernorm_f32(x, g, b, d_true):
    """LayerNorm over the last axis in f32.  Lanes >= d_true are zero padding and are
    masked out of the (two-pass, numerically stable) variance."""
    inv_d = 1.0 / d_true
    mu = jnp.sum(x, axis=-1, keepdims=True) * inv_d
    lane = jax.lax.broadcasted_iota(jnp.int32, x.shape, x.ndim - 1)
    xc = jnp.where(lane < d_true, x - mu, 0.0)
    var = jnp.sum(xc * xc, axis=-1, keepdims=True) * inv_d
    return xc * jax.lax.rsqrt(var + 1e-5) * g + b


# ----------------------- fused LN -> matmul (-> GELU) -----------------------

def _ln_matmul_kernel(x_ref, g_ref, bln_ref, w_ref, b_ref, o_ref, xn_ref, *,
                      d_true, activation):
    # LayerNorm computed once per row tile (j == 0) into a bf16 VMEM scratch and
    # reused across the (sequential) N-tile axis.
    @pl.when(pl.program_id(1) == 0)
    def _():
        xn = _layernorm_f32(x_ref[...].astype(jnp.float32),
                            g_ref[...].astype(jnp.float32),
                            bln_ref[...].astype(jnp.float32), d_true)
        xn_ref[...] = xn.astype(jnp.bfloat16)

    y = jnp.dot(xn_ref[...], w_ref[...], preferred_element_type=jnp.float32)
    y = y + b_ref[...].astype(jnp.float32)
    if activation == "gelu":
        y = _gelu(y)
    o_ref[...] = y.astype(o_ref.dtype)


def ln_linear(x, g, bln, w, b=None, activation=None, d_true=None, out_dtype=None):
    """Fused LayerNorm(x) @ w + b (+ GELU).  x:(M,K) f32, w:(K,N) bf16; full K per block."""
    M, K = x.shape
    N = w.shape[1]
    d_true = K if d_true is None else d_true
    out_dtype = x.dtype if out_dtype is None else out_dtype
    tm, Mp = _row_tile(M)
    tn = _pick_tile(N)
    xp = jnp.pad(x, ((0, Mp - M), (0, 0))) if Mp != M else x
    bias = jnp.zeros((1, N), jnp.float32) if b is None else b.reshape(1, N)
    kern = functools.partial(_ln_matmul_kernel, d_true=d_true, activation=activation)
    out = pl.pallas_call(
        kern,
        out_shape=jax.ShapeDtypeStruct((Mp, N), out_dtype),
        grid=(Mp // tm, N // tn),
        in_specs=[
            pl.BlockSpec((tm, K), lambda i, j: (i, 0)),
            pl.BlockSpec((1, K), lambda i, j: (0, 0)),
            pl.BlockSpec((1, K), lambda i, j: (0, 0)),
            pl.BlockSpec((K, tn), lambda i, j: (0, j)),
            pl.BlockSpec((1, tn), lambda i, j: (0, j)),
        ],
        out_specs=pl.BlockSpec((tm, tn), lambda i, j: (i, j)),
        scratch_shapes=[pltpu.VMEM((tm, K), jnp.bfloat16)],
        compiler_params=pltpu.CompilerParams(
            # N-tile axis must stay sequential so the LN scratch written at j==0 is
            # reused by subsequent j on the same core.
            dimension_semantics=("parallel", "arbitrary"),
            vmem_limit_bytes=_VMEM_LIMIT),
    )(xp, g.reshape(1, K), bln.reshape(1, K), w, bias)
    return out[:M] if Mp != M else out


# --------------- K-tiled matmul (+ optional LayerScale+residual) ------------

def _matmul_kernel(*refs, fuse_scale_res, activation):
    if fuse_scale_res:
        x_ref, w_ref, b_ref, s_ref, r_ref, o_ref, acc_ref = refs
    else:
        x_ref, w_ref, b_ref, o_ref, acc_ref = refs
    k = pl.program_id(2)

    @pl.when(k == 0)
    def _():
        acc_ref[...] = jnp.zeros_like(acc_ref)

    acc_ref[...] += jnp.dot(x_ref[...].astype(jnp.bfloat16), w_ref[...],
                            preferred_element_type=jnp.float32)

    @pl.when(k == pl.num_programs(2) - 1)
    def _():
        y = acc_ref[...] + b_ref[...].astype(jnp.float32)
        if activation == "gelu":
            y = _gelu(y)
        if fuse_scale_res:
            # LayerScale + residual epilogue: out = residual + y * scale
            y = r_ref[...].astype(jnp.float32) + y * s_ref[...].astype(jnp.float32)
        o_ref[...] = y.astype(o_ref.dtype)


def linear(x, w, b=None, scale=None, residual=None, activation=None, out_dtype=None):
    """x:(M,K) @ w:(K,N) bf16 + b, optionally fused with `residual + out*scale`."""
    M, K = x.shape
    N = w.shape[1]
    fuse = scale is not None
    if out_dtype is None:
        out_dtype = residual.dtype if fuse else x.dtype
    tm, Mp = _row_tile(M)
    tn = _pick_tile(N)
    tk = _pick_tile(K)
    xp = jnp.pad(x, ((0, Mp - M), (0, 0))) if Mp != M else x
    bias = jnp.zeros((1, N), jnp.float32) if b is None else b.reshape(1, N)
    args = [xp, w, bias]
    in_specs = [
        pl.BlockSpec((tm, tk), lambda i, j, k: (i, k)),
        pl.BlockSpec((tk, tn), lambda i, j, k: (k, j)),
        pl.BlockSpec((1, tn), lambda i, j, k: (0, j)),
    ]
    if fuse:
        rp = jnp.pad(residual, ((0, Mp - M), (0, 0))) if Mp != M else residual
        args += [scale.reshape(1, N), rp]
        in_specs += [
            pl.BlockSpec((1, tn), lambda i, j, k: (0, j)),
            pl.BlockSpec((tm, tn), lambda i, j, k: (i, j)),
        ]
    kern = functools.partial(_matmul_kernel, fuse_scale_res=fuse, activation=activation)
    out = pl.pallas_call(
        kern,
        out_shape=jax.ShapeDtypeStruct((Mp, N), out_dtype),
        grid=(Mp // tm, N // tn, K // tk),
        in_specs=in_specs,
        out_specs=pl.BlockSpec((tm, tn), lambda i, j, k: (i, j)),
        scratch_shapes=[pltpu.VMEM((tm, tn), jnp.float32)],
        compiler_params=pltpu.CompilerParams(
            dimension_semantics=("parallel", "parallel", "arbitrary"),
            vmem_limit_bytes=_VMEM_LIMIT),
    )(*args)
    return out[:M] if Mp != M else out


# ---------------------- standalone LayerNorm (cls path) ---------------------

def _layernorm_kernel(x_ref, g_ref, b_ref, o_ref, *, d_true):
    y = _layernorm_f32(x_ref[...].astype(jnp.float32),
                       g_ref[...].astype(jnp.float32),
                       b_ref[...].astype(jnp.float32), d_true)
    o_ref[...] = y.astype(o_ref.dtype)


def layernorm(x, g, b, d_true):
    M, K = x.shape
    tm, Mp = _row_tile(M)
    xp = jnp.pad(x, ((0, Mp - M), (0, 0))) if Mp != M else x
    out = pl.pallas_call(
        functools.partial(_layernorm_kernel, d_true=d_true),
        out_shape=jax.ShapeDtypeStruct((Mp, K), x.dtype),
        grid=(Mp // tm,),
        in_specs=[pl.BlockSpec((tm, K), lambda i: (i, 0)),
                  pl.BlockSpec((1, K), lambda i: (0, 0)),
                  pl.BlockSpec((1, K), lambda i: (0, 0))],
        out_specs=pl.BlockSpec((tm, K), lambda i: (i, 0)),
        compiler_params=pltpu.CompilerParams(
            dimension_semantics=("parallel",), vmem_limit_bytes=_VMEM_LIMIT),
    )(xp, g.reshape(1, K), b.reshape(1, K))
    return out[:M] if Mp != M else out


# -------------------------- talking-heads attention --------------------------

def _attention_kernel(mix_pre_ref, mix_post_ref, q_ref, k_ref, v_ref, o_ref, *,
                      scale, heads):
    # q_ref: (1, H, tq, Dh); k_ref/v_ref: (1, H, Nk, Dh); mix refs in SMEM: (H, H).
    q = q_ref[0].astype(jnp.bfloat16)
    k = k_ref[0].astype(jnp.bfloat16)
    v = v_ref[0].astype(jnp.bfloat16)
    # all heads at once on the MXU: (H, tq, Nk), f32 scores
    s = jax.lax.dot_general(q, k, (((2,), (2,)), ((0,), (0,))),
                            preferred_element_type=jnp.float32) * scale
    # talking-heads PRE-softmax mix: pre[g] = sum_h mix_pre[h, g] * s[h]
    # TODO(synk): for large H this H^2 VPU stream could move to the MXU as a
    # (H,H)x(H,tq*Nk) matmul; kept on the VPU here to avoid in-kernel reshapes.
    pre = jnp.stack(
        [sum(mix_pre_ref[h, g] * s[h] for h in range(heads)) for g in range(heads)])
    # batched (all-heads) softmax in f32; denominator reciprocal on the EUP
    m = jnp.max(pre, axis=-1, keepdims=True)
    e = jnp.exp(pre - m)
    attn = e * pl.reciprocal(jnp.sum(e, axis=-1, keepdims=True), approx=True)
    # talking-heads POST-softmax mix (matches upstream CaiT)
    post = jnp.stack(
        [sum(mix_post_ref[h, g] * attn[h] for h in range(heads)) for g in range(heads)])
    out = jax.lax.dot_general(post.astype(jnp.bfloat16), v,
                              (((2,), (1,)), ((0,), (0,))),
                              preferred_element_type=jnp.float32)
    o_ref[0] = out.astype(o_ref.dtype)


def attention_core(q, k, v, mix_pre, mix_post, scale):
    """q: (B, H, Nq, Dh), k/v: (B, H, Nk, Dh), mixes: (H, H) -> (B, H, Nq, Dh) bf16."""
    B, H, Nq, Dh = q.shape
    Nk = k.shape[2]
    tq = _q_tile(Nq)
    kern = functools.partial(_attention_kernel, scale=scale, heads=H)
    return pl.pallas_call(
        kern,
        out_shape=jax.ShapeDtypeStruct((B, H, Nq, Dh), jnp.bfloat16),
        grid=(B, Nq // tq),
        in_specs=[
            pl.BlockSpec((H, H), lambda b, i: (0, 0),
                         memory_space=pltpu.MemorySpace.SMEM),
            pl.BlockSpec((H, H), lambda b, i: (0, 0),
                         memory_space=pltpu.MemorySpace.SMEM),
            pl.BlockSpec((1, H, tq, Dh), lambda b, i: (b, 0, i, 0)),
            pl.BlockSpec((1, H, Nk, Dh), lambda b, i: (b, 0, 0, 0)),
            pl.BlockSpec((1, H, Nk, Dh), lambda b, i: (b, 0, 0, 0)),
        ],
        out_specs=pl.BlockSpec((1, H, tq, Dh), lambda b, i: (b, 0, i, 0)),
        compiler_params=pltpu.CompilerParams(
            dimension_semantics=("parallel", "parallel"),
            vmem_limit_bytes=_VMEM_LIMIT),
    )(mix_pre, mix_post, q, k, v)


# ------------------------------- model glue ---------------------------------

def transformer_layer(x, context, p, cfg):
    B, N, Dp_ = x.shape
    heads, dh, dim = cfg["heads"], cfg["dim_head"], cfg["dim"]
    hd = heads * dh
    x2d = x.reshape(B * N, Dp_)

    if context is None:
        # fused LN + combined QKV projection (single kernel), bf16 out for attention
        qkv = ln_linear(x2d, p["attn_ln_g"], p["attn_ln_b"], p["wqkv"],
                        d_true=dim, out_dtype=jnp.bfloat16)
        q2d, k2d, v2d = qkv[:, :hd], qkv[:, hd:2 * hd], qkv[:, 2 * hd:]
        Nk = N
    else:
        # PreNorm normalizes only x; context tokens are raw.
        xn = layernorm(x2d, p["attn_ln_g"], p["attn_ln_b"], d_true=dim)
        q2d = linear(xn, p["wqkv"][:, :hd], out_dtype=jnp.bfloat16)
        ctx = jnp.concatenate([xn.reshape(B, N, Dp_), context], axis=1)
        Nk = ctx.shape[1]
        kv = linear(ctx.reshape(B * Nk, Dp_), p["wqkv"][:, hd:], out_dtype=jnp.bfloat16)
        k2d, v2d = kv[:, :hd], kv[:, hd:]

    # TODO(synk): these head-split transposes could move in-kernel (review item); they are
    # small bf16 layout copies with dim_head unpadded.
    q = q2d.reshape(B, N, heads, dh).transpose(0, 2, 1, 3)
    k = k2d.reshape(B, Nk, heads, dh).transpose(0, 2, 1, 3)
    v = v2d.reshape(B, Nk, heads, dh).transpose(0, 2, 1, 3)

    out = attention_core(q, k, v, p["mix_pre"], p["mix_post"], dh ** -0.5)  # (B,H,N,dh)
    out = out.transpose(0, 2, 1, 3).reshape(B * N, hd)
    # fused: out-projection + bias + LayerScale + residual (f32)
    x2d = linear(out, p["wo"], p["bo"], scale=p["attn_scale"], residual=x2d,
                 out_dtype=jnp.float32)

    # fused: LN + FF1 + GELU (bf16 out feeds FF2 only)
    h1 = ln_linear(x2d, p["ff_ln_g"], p["ff_ln_b"], p["ff_w1"], p["ff_b1"],
                   activation="gelu", d_true=dim, out_dtype=jnp.bfloat16)
    # fused: FF2 + bias + LayerScale + residual (f32)
    x2d = linear(h1, p["ff_w2"], p["ff_b2"], scale=p["ff_scale"], residual=x2d,
                 out_dtype=jnp.float32)
    return x2d.reshape(B, N, Dp_)


def cait_forward(img, pp, cfg):
    ps, dim = cfg["patch_size"], cfg["dim"]
    dp = _round_up(dim, LANE)
    B, C, H, W = img.shape
    # Rearrange 'b c (h p1) (w p2) -> b (h w) (p1 p2 c)'
    x = img.reshape(B, C, H // ps, ps, W // ps, ps)
    x = x.transpose(0, 2, 4, 3, 5, 1).reshape(B, (H // ps) * (W // ps), ps * ps * C)
    Np = x.shape[1]
    pdim = ps * ps * C
    pdim_p = pp["patch_w"].shape[0]
    x2d = jnp.pad(x.reshape(B * Np, pdim), ((0, 0), (0, pdim_p - pdim)))
    x = linear(x2d, pp["patch_w"], pp["patch_b"]).reshape(B, Np, dp)
    x = x + pp["pos_embedding"][:, :Np]

    for lp in pp["patch_layers"]:
        x = transformer_layer(x, None, lp, cfg)

    cls = jnp.broadcast_to(pp["cls_token"], (B, 1, dp)).astype(x.dtype)
    for lp in pp["cls_layers"]:
        cls = transformer_layer(cls, x, lp, cfg)

    h = cls[:, 0]                                                 # (B, dp)
    logits = ln_linear(h, pp["head_ln_g"], pp["head_ln_b"],
                       pp["head_w"], pp["head_b"], d_true=dim)
    return logits[:, :cfg["num_classes"]]


# ---------------------------- parameters -----------------------------------

def init_params(key, cfg):
    dim, heads, dim_head = cfg["dim"], cfg["heads"], cfg["dim_head"]
    mlp_dim = cfg["mlp_dim"]
    inner = heads * dim_head
    patch_dim = 3 * cfg["patch_size"] ** 2
    num_patches = (cfg["image_size"] // cfg["patch_size"]) ** 2
    keys = iter(jax.random.split(key, 512))

    def w(shape, s=0.02):
        return (s * jax.random.normal(next(keys), shape)).astype(jnp.float32)

    def layer_params(ind):
        depth_plus1 = ind + 1
        eps = 0.1 if depth_plus1 <= 18 else (1e-5 if depth_plus1 <= 24 else 1e-6)
        return {
            "attn_ln_g": jnp.ones((dim,), jnp.float32),
            "attn_ln_b": jnp.zeros((dim,), jnp.float32),
            "wq": w((dim, inner)),
            "wkv": w((dim, 2 * inner)),
            "mix_pre": w((heads, heads), 1.0),
            "mix_post": w((heads, heads), 1.0),
            "wo": w((inner, dim)),
            "bo": jnp.zeros((dim,), jnp.float32),
            "attn_scale": jnp.full((dim,), eps, jnp.float32),
            "ff_ln_g": jnp.ones((dim,), jnp.float32),
            "ff_ln_b": jnp.zeros((dim,), jnp.float32),
            "ff_w1": w((dim, mlp_dim)),
            "ff_b1": jnp.zeros((mlp_dim,), jnp.float32),
            "ff_w2": w((mlp_dim, dim)),
            "ff_b2": jnp.zeros((dim,), jnp.float32),
            "ff_scale": jnp.full((dim,), eps, jnp.float32),
        }

    return {
        "patch_w": w((patch_dim, dim)),
        "patch_b": jnp.zeros((dim,), jnp.float32),
        "pos_embedding": w((1, num_patches, dim), 1.0),
        "cls_token": w((1, 1, dim), 1.0),
        "patch_layers": [layer_params(i) for i in range(cfg["depth"])],
        "cls_layers": [layer_params(i) for i in range(cfg["cls_depth"])],
        "head_ln_g": jnp.ones((dim,), jnp.float32),
        "head_ln_b": jnp.zeros((dim,), jnp.float32),
        "head_w": w((dim, cfg["num_classes"])),
        "head_b": jnp.zeros((cfg["num_classes"],), jnp.float32),
    }


def pad_params(params, cfg):
    """Zero-pad model feature dims (dim / mlp / patch_dim / classes) to lane (128)
    multiples and cast all matmul weights to bf16 (MXU-native).  dim_head is left
    unpadded.  All pads are exact zeros, so the math is unchanged."""
    dim, heads, dh, mlp = cfg["dim"], cfg["heads"], cfg["dim_head"], cfg["mlp_dim"]
    dp = _round_up(dim, LANE)
    mlpp = _round_up(mlp, LANE)
    pdimp = _round_up(3 * cfg["patch_size"] ** 2, LANE)
    ncp = _round_up(cfg["num_classes"], LANE)
    inner = heads * dh
    bf16 = jnp.bfloat16

    def pad_layer(lp):
        wqkv = jnp.concatenate([_pad2(lp["wq"], dp, inner),
                                _pad2(lp["wkv"], dp, 2 * inner)], axis=1)
        return {
            "attn_ln_g": _pad1(lp["attn_ln_g"], dp),
            "attn_ln_b": _pad1(lp["attn_ln_b"], dp),
            "wqkv": wqkv.astype(bf16),
            "mix_pre": lp["mix_pre"],
            "mix_post": lp["mix_post"],
            "wo": _pad2(lp["wo"], inner, dp).astype(bf16),
            "bo": _pad1(lp["bo"], dp),
            "attn_scale": _pad1(lp["attn_scale"], dp),
            "ff_ln_g": _pad1(lp["ff_ln_g"], dp),
            "ff_ln_b": _pad1(lp["ff_ln_b"], dp),
            "ff_w1": _pad2(lp["ff_w1"], dp, mlpp).astype(bf16),
            "ff_b1": _pad1(lp["ff_b1"], mlpp),
            "ff_w2": _pad2(lp["ff_w2"], mlpp, dp).astype(bf16),
            "ff_b2": _pad1(lp["ff_b2"], dp),
            "ff_scale": _pad1(lp["ff_scale"], dp),
        }

    return {
        "patch_w": _pad2(params["patch_w"], pdimp, dp).astype(bf16),
        "patch_b": _pad1(params["patch_b"], dp),
        "pos_embedding": jnp.pad(params["pos_embedding"],
                                 ((0, 0), (0, 0), (0, dp - dim))),
        "cls_token": jnp.pad(params["cls_token"], ((0, 0), (0, 0), (0, dp - dim))),
        "patch_layers": [pad_layer(lp) for lp in params["patch_layers"]],
        "cls_layers": [pad_layer(lp) for lp in params["cls_layers"]],
        "head_ln_g": _pad1(params["head_ln_g"], dp),
        "head_ln_b": _pad1(params["head_ln_b"], dp),
        "head_w": _pad2(params["head_w"], dp, ncp).astype(bf16),
        "head_b": _pad1(params["head_b"], ncp),
    }


# ---------------------------------- main -------------------------------------

if __name__ == "__main__":
    cfg = dict(image_size=16, patch_size=4, num_classes=10, dim=32, depth=2,
               cls_depth=1, heads=4, mlp_dim=64, dim_head=8)
    key = jax.random.PRNGKey(0)
    k_img, k_par = jax.random.split(key)
    img = jax.random.normal(
        k_img, (2, 3, cfg["image_size"], cfg["image_size"]), jnp.float32)
    params = init_params(k_par, cfg)
    padded = pad_params(params, cfg)

    fwd = jax.jit(lambda im, pa: cait_forward(im, pa, cfg))
    out = jax.block_until_ready(fwd(img, padded))
    assert out.shape == (2, cfg["num_classes"]), out.shape
    assert bool(jnp.all(jnp.isfinite(out)))
    print("KERNEL_OK")
</pallas_src>

<mosaic_0001>
module attributes {stable_mosaic.version = 11 : i64} {
  func.func @_matmul_kernel(%arg0: i32, %arg1: i32, %arg2: i32, %arg3: memref<32x128xf32, #tpu.memory_space<vmem>>, %arg4: memref<128x128xbf16, #tpu.memory_space<vmem>>, %arg5: memref<1x128xf32, #tpu.memory_space<vmem>>, %arg6: memref<32x128xf32, #tpu.memory_space<vmem>>, %arg7: memref<32x128xf32, #tpu.memory_space<vmem>>) attributes {dimension_semantics = [#tpu.dimension_semantics<parallel>, #tpu.dimension_semantics<parallel>, #tpu.dimension_semantics<arbitrary>], iteration_bounds = array<i64: 1, 1, 1>, scalar_prefetch = 0 : i64, scratch_operands = 1 : i64, tpu.core_type = #tpu.core_type<tc>, window_params = [{transform_indices = @transform_0, window_bounds = array<i64: 32, 128>}, {transform_indices = @transform_1, window_bounds = array<i64: 128, 128>}, {transform_indices = @transform_2, window_bounds = array<i64: 1, 128>}, {transform_indices = @transform_3, window_bounds = array<i64: 32, 128>}]} {
    %c0_i32 = arith.constant 0 : i32
    %0 = arith.cmpi eq, %arg2, %c0_i32 : i32
    %1 = arith.extui %0 : i1 to i32
    %c0_i32_0 = arith.constant 0 : i32
    %2 = arith.cmpi ne, %1, %c0_i32_0 : i32
    scf.if %2 {
      %cst_10 = arith.constant 0.000000e+00 : f32
      %13 = vector.broadcast %cst_10 : f32 to vector<32x128xf32>
      %c0_11 = arith.constant 0 : index
      %c0_12 = arith.constant 0 : index
      %14 = vector.load %arg7[%c0_11, %c0_12] : memref<32x128xf32, #tpu.memory_space<vmem>>, vector<32x128xf32>
      tpu.vector_store %arg7[%c0_11, %c0_12], %13 {strides = array<i32>} : memref<32x128xf32, #tpu.memory_space<vmem>>, vector<32x128xf32>,
    } else {
    }
    %c0 = arith.constant 0 : index
    %c0_1 = arith.constant 0 : index
    %3 = vector.load %arg7[%c0, %c0_1] : memref<32x128xf32, #tpu.memory_space<vmem>>, vector<32x128xf32>
    %c0_2 = arith.constant 0 : index
    %c0_3 = arith.constant 0 : index
    %4 = vector.load %arg3[%c0_2, %c0_3] : memref<32x128xf32, #tpu.memory_space<vmem>>, vector<32x128xf32>
    %5 = arith.truncf %4 : vector<32x128xf32> to vector<32x128xbf16>
    %c0_4 = arith.constant 0 : index
    %c0_5 = arith.constant 0 : index
    %6 = vector.load %arg4[%c0_4, %c0_5] : memref<128x128xbf16, #tpu.memory_space<vmem>>, vector<128x128xbf16>
    %cst = arith.constant dense<0.000000e+00> : vector<32x128xf32>
    %7 = tpu.matmul %5, %6, %cst {dimension_numbers = #tpu.dot_dimension_numbers<[1], [0], [0], [1], [0, 0, 1, 1], [], []>} : vector<32x128xbf16>, vector<128x128xbf16>, vector<32x128xf32> -> vector<32x128xf32>
    %8 = arith.addf %3, %7 : vector<32x128xf32>
    %c0_6 = arith.constant 0 : index
    %c0_7 = arith.constant 0 : index
    %9 = vector.load %arg7[%c0_6, %c0_7] : memref<32x128xf32, #tpu.memory_space<vmem>>, vector<32x128xf32>
    tpu.vector_store %arg7[%c0_6, %c0_7], %8 {strides = array<i32>} : memref<32x128xf32, #tpu.memory_space<vmem>>, vector<32x128xf32>,
    %c0_i32_8 = arith.constant 0 : i32
    %10 = arith.cmpi eq, %arg2, %c0_i32_8 : i32
    %11 = arith.extui %10 : i1 to i32
    %c0_i32_9 = arith.constant 0 : i32
    %12 = arith.cmpi ne, %11, %c0_i32_9 : i32
    scf.if %12 {
      %c0_10 = arith.constant 0 : index
      %c0_11 = arith.constant 0 : index
      %13 = vector.load %arg7[%c0_10, %c0_11] : memref<32x128xf32, #tpu.memory_space<vmem>>, vector<32x128xf32>
      %c0_12 = arith.constant 0 : index
      %c0_13 = arith.constant 0 : index
      %14 = vector.load %arg5[%c0_12, %c0_13] : memref<1x128xf32, #tpu.memory_space<vmem>>, vector<1x128xf32>
      %15 = vector.broadcast %14 : vector<1x128xf32> to vector<32x128xf32>
      %16 = arith.addf %13, %15 : vector<32x128xf32>
      %c0_14 = arith.constant 0 : index
      %c0_15 = arith.constant 0 : index
      %17 = vector.load %arg6[%c0_14, %c0_15] : memref<32x128xf32, #tpu.memory_space<vmem>>, vector<32x128xf32>
      tpu.vector_store %arg6[%c0_14, %c0_15], %16 {strides = array<i32>} : memref<32x128xf32, #tpu.memory_space<vmem>>, vector<32x128xf32>,
    } else {
    }
    return
  }
  func.func @transform_0(%arg0: i32, %arg1: i32, %arg2: i32) -> (i32, i32) {
    %c0_i32 = arith.constant 0 : i32
    return %arg0, %arg2 : i32, i32
  }
  func.func @transform_1(%arg0: i32, %arg1: i32, %arg2: i32) -> (i32, i32) {
    %c0_i32 = arith.constant 0 : i32
    return %arg2, %arg1 : i32, i32
  }
  func.func @transform_2(%arg0: i32, %arg1: i32, %arg2: i32) -> (i32, i32) {
    %c0_i32 = arith.constant 0 : i32
    %c0_i32_0 = arith.constant 0 : i32
    return %c0_i32, %arg1 : i32, i32
  }
  func.func @transform_3(%arg0: i32, %arg1: i32, %arg2: i32) -> (i32, i32) {
    %c0_i32 = arith.constant 0 : i32
    return %arg0, %arg1 : i32, i32
  }
}

module attributes {stable_mosaic.version = 11 : i64} {
  func.func @_ln_matmul_kernel(%arg0: i32, %arg1: i32, %arg2: memref<32x128xf32, #tpu.memory_space<vmem>>, %arg3: memref<1x128xf32, #tpu.memory_space<vmem>>, %arg4: memref<1x128xf32, #tpu.memory_space<vmem>>, %arg5: memref<128x96xbf16, #tpu.memory_space<vmem>>, %arg6: memref<1x96xf32, #tpu.memory_space<vmem>>, %arg7: memref<32x96xbf16, #tpu.memory_space<vmem>>, %arg8: memref<32x128xbf16, #tpu.memory_space<vmem>>) attributes {dimension_semantics = [#tpu.dimension_semantics<parallel>, #tpu.dimension_semantics<arbitrary>], iteration_bounds = array<i64: 1, 1>, scalar_prefetch = 0 : i64, scratch_operands = 1 : i64, tpu.core_type = #tpu.core_type<tc>, window_params = [{transform_indices = @transform_0, window_bounds = array<i64: 32, 128>}, {pipeline_mode = #tpu.pipeline_mode<synchronous>, transform_indices = @transform_1, window_bounds = array<i64: 1, 128>}, {pipeline_mode = #tpu.pipeline_mode<synchronous>, transform_indices = @transform_2, window_bounds = array<i64: 1, 128>}, {transform_indices = @transform_3, window_bounds = array<i64: 128, 96>}, {transform_indices = @transform_4, window_bounds = array<i64: 1, 96>}, {transform_indices = @transform_5, window_bounds = array<i64: 32, 96>}]} {
    %c0_i32 = arith.constant 0 : i32
    %0 = arith.cmpi eq, %arg1, %c0_i32 : i32
    %1 = arith.extui %0 : i1 to i32
    %c0_i32_0 = arith.constant 0 : i32
    %2 = arith.cmpi ne, %1, %c0_i32_0 : i32
    scf.if %2 {
      %c0_8 = arith.constant 0 : index
      %c0_9 = arith.constant 0 : index
      %11 = vector.load %arg2[%c0_8, %c0_9] : memref<32x128xf32, #tpu.memory_space<vmem>>, vector<32x128xf32>
      %c0_10 = arith.constant 0 : index
      %c0_11 = arith.constant 0 : index
      %12 = vector.load %arg3[%c0_10, %c0_11] : memref<1x128xf32, #tpu.memory_space<vmem>>, vector<1x128xf32>
      %c0_12 = arith.constant 0 : index
      %c0_13 = arith.constant 0 : index
      %13 = vector.load %arg4[%c0_12, %c0_13] : memref<1x128xf32, #tpu.memory_space<vmem>>, vector<1x128xf32>
      %cst_14 = arith.constant dense<0.000000e+00> : vector<32xf32>
      %14 = vector.multi_reduction <add>, %11, %cst_14 [1] : vector<32x128xf32> to vector<32xf32>
      %15 = vector.shape_cast %14 : vector<32xf32> to vector<32x1xf32>
      %cst_15 = arith.constant 3.125000e-02 : f32
      %16 = vector.broadcast %cst_15 : f32 to vector<32x1xf32>
      %17 = arith.mulf %15, %16 : vector<32x1xf32>
      %18 = tpu.iota {dimensions = array<i32: 1>} : vector<32x128xi32>
      %c32_i32 = arith.constant 32 : i32
      %19 = vector.broadcast %c32_i32 : i32 to vector<32x128xi32>
      %20 = arith.cmpi slt, %18, %19 : vector<32x128xi32>
      %21 = vector.broadcast %17 : vector<32x1xf32> to vector<32x128xf32>
      %22 = arith.subf %11, %21 : vector<32x128xf32>
      %cst_16 = arith.constant 0.000000e+00 : f32
      %23 = vector.broadcast %cst_16 : f32 to vector<32x128xf32>
      %24 = arith.select %20, %22, %23 : vector<32x128xi1>, vector<32x128xf32>
      %25 = arith.mulf %24, %24 : vector<32x128xf32>
      %cst_17 = arith.constant dense<0.000000e+00> : vector<32xf32>
      %26 = vector.multi_reduction <add>, %25, %cst_17 [1] : vector<32x128xf32> to vector<32xf32>
      %27 = vector.shape_cast %26 : vector<32xf32> to vector<32x1xf32>
      %cst_18 = arith.constant 3.125000e-02 : f32
      %28 = vector.broadcast %cst_18 : f32 to vector<32x1xf32>
      %29 = arith.mulf %27, %28 : vector<32x1xf32>
      %cst_19 = arith.constant 9.99999974E-6 : f32
      %30 = vector.broadcast %cst_19 : f32 to vector<32x1xf32>
      %31 = arith.addf %29, %30 : vector<32x1xf32>
      %32 = math.rsqrt %31 : vector<32x1xf32>
      %33 = vector.broadcast %32 : vector<32x1xf32> to vector<32x128xf32>
      %34 = arith.mulf %24, %33 : vector<32x128xf32>
      %35 = vector.broadcast %12 : vector<1x128xf32> to vector<32x128xf32>
      %36 = arith.mulf %34, %35 : vector<32x128xf32>
      %37 = vector.broadcast %13 : vector<1x128xf32> to vector<32x128xf32>
      %38 = arith.addf %36, %37 : vector<32x128xf32>
      %39 = arith.truncf %38 : vector<32x128xf32> to vector<32x128xbf16>
      %c0_20 = arith.constant 0 : index
      %c0_21 = arith.constant 0 : index
      %40 = vector.load %arg8[%c0_20, %c0_21] : memref<32x128xbf16, #tpu.memory_space<vmem>>, vector<32x128xbf16>
      tpu.vector_store %arg8[%c0_20, %c0_21], %39 {strides = array<i32>} : memref<32x128xbf16, #tpu.memory_space<vmem>>, vector<32x128xbf16>,
    } else {
    }
    %c0 = arith.constant 0 : index
    %c0_1 = arith.constant 0 : index
    %3 = vector.load %arg8[%c0, %c0_1] : memref<32x128xbf16, #tpu.memory_space<vmem>>, vector<32x128xbf16>
    %c0_2 = arith.constant 0 : index
    %c0_3 = arith.constant 0 : index
    %4 = vector.load %arg5[%c0_2, %c0_3] : memref<128x96xbf16, #tpu.memory_space<vmem>>, vector<128x96xbf16>
    %cst = arith.constant dense<0.000000e+00> : vector<32x96xf32>
    %5 = tpu.matmul %3, %4, %cst {dimension_numbers = #tpu.dot_dimension_numbers<[1], [0], [0], [1], [0, 0, 1, 1], [], []>} : vector<32x128xbf16>, vector<128x96xbf16>, vector<32x96xf32> -> vector<32x96xf32>
    %c0_4 = arith.constant 0 : index
    %c0_5 = arith.constant 0 : index
    %6 = vector.load %arg6[%c0_4, %c0_5] : memref<1x96xf32, #tpu.memory_space<vmem>>, vector<1x96xf32>
    %7 = vector.broadcast %6 : vector<1x96xf32> to vector<32x96xf32>
    %8 = arith.addf %5, %7 : vector<32x96xf32>
    %9 = arith.truncf %8 : vector<32x96xf32> to vector<32x96xbf16>
    %c0_6 = arith.constant 0 : index
    %c0_7 = arith.constant 0 : index
    %10 = vector.load %arg7[%c0_6, %c0_7] : memref<32x96xbf16, #tpu.memory_space<vmem>>, vector<32x96xbf16>
    tpu.vector_store %arg7[%c0_6, %c0_7], %9 {strides = array<i32>} : memref<32x96xbf16, #tpu.memory_space<vmem>>, vector<32x96xbf16>,
    return
  }
  func.func @transform_0(%arg0: i32, %arg1: i32) -> (i32, i32) {
    %c0_i32 = arith.constant 0 : i32
    %c0_i32_0 = arith.constant 0 : i32
    return %arg0, %c0_i32 : i32, i32
  }
  func.func @transform_1(%arg0: i32, %arg1: i32) -> (i32, i32) {
    %c0_i32 = arith.constant 0 : i32
    %c0_i32_0 = arith.constant 0 : i32
    %c0_i32_1 = arith.constant 0 : i32
    return %c0_i32, %c0_i32_0 : i32, i32
  }
  func.func @transform_2(%arg0: i32, %arg1: i32) -> (i32, i32) {
    %c0_i32 = arith.constant 0 : i32
    %c0_i32_0 = arith.constant 0 : i32
    %c0_i32_1 = arith.constant 0 : i32
    return %c0_i32, %c0_i32_0 : i32, i32
  }
  func.func @transform_3(%arg0: i32, %arg1: i32) -> (i32, i32) {
    %c0_i32 = arith.constant 0 : i32
    %c0_i32_0 = arith.constant 0 : i32
    return %c0_i32, %arg1 : i32, i32
  }
  func.func @transform_4(%arg0: i32, %arg1: i32) -> (i32, i32) {
    %c0_i32 = arith.constant 0 : i32
    %c0_i32_0 = arith.constant 0 : i32
    return %c0_i32, %arg1 : i32, i32
  }
  func.func @transform_5(%arg0: i32, %arg1: i32) -> (i32, i32) {
    %c0_i32 = arith.constant 0 : i32
    return %arg0, %arg1 : i32, i32
  }
}

module attributes {stable_mosaic.version = 11 : i64} {
  func.func @_attention_kernel(%arg0: i32, %arg1: i32, %arg2: memref<4x4xf32, #tpu.memory_space<smem>>, %arg3: memref<4x4xf32, #tpu.memory_space<smem>>, %arg4: memref<1x4x16x8xbf16, #tpu.memory_space<vmem>>, %arg5: memref<1x4x16x8xbf16, #tpu.memory_space<vmem>>, %arg6: memref<1x4x16x8xbf16, #tpu.memory_space<vmem>>, %arg7: memref<1x4x16x8xbf16, #tpu.memory_space<vmem>>) attributes {dimension_semantics = [#tpu.dimension_semantics<parallel>, #tpu.dimension_semantics<parallel>], iteration_bounds = array<i64: 2, 1>, scalar_prefetch = 0 : i64, scratch_operands = 0 : i64, tpu.core_type = #tpu.core_type<tc>, window_params = [{transform_indices = @transform_0, window_bounds = array<i64: 4, 4>}, {transform_indices = @transform_1, window_bounds = array<i64: 4, 4>}, {transform_indices = @transform_2, window_bounds = array<i64: 1, 4, 16, 8>}, {transform_indices = @transform_3, window_bounds = array<i64: 1, 4, 16, 8>}, {transform_indices = @transform_4, window_bounds = array<i64: 1, 4, 16, 8>}, {transform_indices = @transform_5, window_bounds = array<i64: 1, 4, 16, 8>}]} {
    %c0 = arith.constant 0 : index
    %c0_0 = arith.constant 0 : index
    %c0_1 = arith.constant 0 : index
    %c0_2 = arith.constant 0 : index
    %0 = vector.load %arg4[%c0, %c0_0, %c0_1, %c0_2] : memref<1x4x16x8xbf16, #tpu.memory_space<vmem>>, vector<1x4x16x8xbf16>
    %1 = vector.shape_cast %0 : vector<1x4x16x8xbf16> to vector<4x16x8xbf16>
    %c0_3 = arith.constant 0 : index
    %c0_4 = arith.constant 0 : index
    %c0_5 = arith.constant 0 : index
    %c0_6 = arith.constant 0 : index
    %2 = vector.load %arg5[%c0_3, %c0_4, %c0_5, %c0_6] : memref<1x4x16x8xbf16, #tpu.memory_space<vmem>>, vector<1x4x16x8xbf16>
    %3 = vector.shape_cast %2 : vector<1x4x16x8xbf16> to vector<4x16x8xbf16>
    %c0_7 = arith.constant 0 : index
    %c0_8 = arith.constant 0 : index
    %c0_9 = arith.constant 0 : index
    %c0_10 = arith.constant 0 : index
    %4 = vector.load %arg6[%c0_7, %c0_8, %c0_9, %c0_10] : memref<1x4x16x8xbf16, #tpu.memory_space<vmem>>, vector<1x4x16x8xbf16>
    %5 = vector.shape_cast %4 : vector<1x4x16x8xbf16> to vector<4x16x8xbf16>
    %cst = arith.constant dense<0.000000e+00> : vector<4x16x16xf32>
    %6 = tpu.matmul %1, %3, %cst {dimension_numbers = #tpu.dot_dimension_numbers<[2], [2], [1], [1], [0, 0, 0, 1, 1, 1], [0], [0]>} : vector<4x16x8xbf16>, vector<4x16x8xbf16>, vector<4x16x16xf32> -> vector<4x16x16xf32>
    %cst_11 = arith.constant 0.353553385 : f32
    %7 = vector.broadcast %cst_11 : f32 to vector<4x16x16xf32>
    %8 = arith.mulf %6, %7 : vector<4x16x16xf32>
    %c0_12 = arith.constant 0 : index
    %c0_13 = arith.constant 0 : index
    %9 = memref.load %arg2[%c0_12, %c0_13] : memref<4x4xf32, #tpu.memory_space<smem>>
    %10 = vector.extract_strided_slice %8 {offsets = [0, 0, 0], sizes = [1, 16, 16], strides = [1, 1, 1]} : vector<4x16x16xf32> to vector<1x16x16xf32>
    %11 = vector.shape_cast %10 : vector<1x16x16xf32> to vector<16x16xf32>
    %12 = vector.broadcast %9 : f32 to vector<16x16xf32>
    %13 = arith.mulf %12, %11 : vector<16x16xf32>
    %cst_14 = arith.constant 0.000000e+00 : f32
    %14 = vector.broadcast %cst_14 : f32 to vector<16x16xf32>
    %15 = arith.addf %14, %13 : vector<16x16xf32>
    %c1 = arith.constant 1 : index
    %c0_15 = arith.constant 0 : index
    %16 = memref.load %arg2[%c1, %c0_15] : memref<4x4xf32, #tpu.memory_space<smem>>
    %17 = vector.extract_strided_slice %8 {offsets = [1, 0, 0], sizes = [1, 16, 16], strides = [1, 1, 1]} : vector<4x16x16xf32> to vector<1x16x16xf32>
    %18 = vector.shape_cast %17 : vector<1x16x16xf32> to vector<16x16xf32>
    %19 = vector.broadcast %16 : f32 to vector<16x16xf32>
    %20 = arith.mulf %19, %18 : vector<16x16xf32>
    %21 = arith.addf %15, %20 : vector<16x16xf32>
    %c2 = arith.constant 2 : index
    %c0_16 = arith.constant 0 : index
    %22 = memref.load %arg2[%c2, %c0_16] : memref<4x4xf32, #tpu.memory_space<smem>>
    %23 = vector.extract_strided_slice %8 {offsets = [2, 0, 0], sizes = [1, 16, 16], strides = [1, 1, 1]} : vector<4x16x16xf32> to vector<1x16x16xf32>
    %24 = vector.shape_cast %23 : vector<1x16x16xf32> to vector<16x16xf32>
    %25 = vector.broadcast %22 : f32 to vector<16x16xf32>
    %26 = arith.mulf %25, %24 : vector<16x16xf32>
    %27 = arith.addf %21, %26 : vector<16x16xf32>
    %c3 = arith.constant 3 : index
    %c0_17 = arith.constant 0 : index
    %28 = memref.load %arg2[%c3, %c0_17] : memref<4x4xf32, #tpu.memory_space<smem>>
    %29 = vector.extract_strided_slice %8 {offsets = [3, 0, 0], sizes = [1, 16, 16], strides = [1, 1, 1]} : vector<4x16x16xf32> to vector<1x16x16xf32>
    %30 = vector.shape_cast %29 : vector<1x16x16xf32> to vector<16x16xf32>
    %31 = vector.broadcast %28 : f32 to vector<16x16xf32>
    %32 = arith.mulf %31, %30 : vector<16x16xf32>
    %33 = arith.addf %27, %32 : vector<16x16xf32>
    %c0_18 = arith.constant 0 : index
    %c1_19 = arith.constant 1 : index
    %34 = memref.load %arg2[%c0_18, %c1_19] : memref<4x4xf32, #tpu.memory_space<smem>>
    %35 = vector.extract_strided_slice %8 {offsets = [0, 0, 0], sizes = [1, 16, 16], strides = [1, 1, 1]} : vector<4x16x16xf32> to vector<1x16x16xf32>
    %36 = vector.shape_cast %35 : vector<1x16x16xf32> to vector<16x16xf32>
    %37 = vector.broadcast %34 : f32 to vector<16x16xf32>
    %38 = arith.mulf %37, %36 : vector<16x16xf32>
    %cst_20 = arith.constant 0.000000e+00 : f32
    %39 = vector.broadcast %cst_20 : f32 to vector<16x16xf32>
    %40 = arith.addf %39, %38 : vector<16x16xf32>
    %c1_21 = arith.constant 1 : index
    %c1_22 = arith.constant 1 : index
    %41 = memref.load %arg2[%c1_21, %c1_22] : memref<4x4xf32, #tpu.memory_space<smem>>
    %42 = vector.extract_strided_slice %8 {offsets = [1, 0, 0], sizes = [1, 16, 16], strides = [1, 1, 1]} : vector<4x16x16xf32> to vector<1x16x16xf32>
    %43 = vector.shape_cast %42 : vector<1x16x16xf32> to vector<16x16xf32>
    %44 = vector.broadcast %41 : f32 to vector<16x16xf32>
    %45 = arith.mulf %44, %43 : vector<16x16xf32>
    %46 = arith.addf %40, %45 : vector<16x16xf32>
    %c2_23 = arith.constant 2 : index
    %c1_24 = arith.constant 1 : index
    %47 = memref.load %arg2[%c2_23, %c1_24] : memref<4x4xf32, #tpu.memory_space<smem>>
    %48 = vector.extract_strided_slice %8 {offsets = [2, 0, 0], sizes = [1, 16, 16], strides = [1, 1, 1]} : vector<4x16x16xf32> to vector<1x16x16xf32>
    %49 = vector.shape_cast %48 : vector<1x16x16xf32> to vector<16x16xf32>
    %50 = vector.broadcast %47 : f32 to vector<16x16xf32>
    %51 = arith.mulf %50, %49 : vector<16x16xf32>
    %52 = arith.addf %46, %51 : vector<16x16xf32>
    %c3_25 = arith.constant 3 : index
    %c1_26 = arith.constant 1 : index
    %53 = memref.load %arg2[%c3_25, %c1_26] : memref<4x4xf32, #tpu.memory_space<smem>>
    %54 = vector.extract_strided_slice %8 {offsets = [3, 0, 0], sizes = [1, 16, 16], strides = [1, 1, 1]} : vector<4x16x16xf32> to vector<1x16x16xf32>
    %55 = vector.shape_cast %54 : vector<1x16x16xf32> to vector<16x16xf32>
    %56 = vector.broadcast %53 : f32 to vector<16x16xf32>
    %57 = arith.mulf %56, %55 : vector<16x16xf32>
    %58 = arith.addf %52, %57 : vector<16x16xf32>
    %c0_27 = arith.constant 0 : index
    %c2_28 = arith.constant 2 : index
    %59 = memref.load %arg2[%c0_27, %c2_28] : memref<4x4xf32, #tpu.memory_space<smem>>
    %60 = vector.extract_strided_slice %8 {offsets = [0, 0, 0], sizes = [1, 16, 16], strides = [1, 1, 1]} : vector<4x16x16xf32> to vector<1x16x16xf32>
    %61 = vector.shape_cast %60 : vector<1x16x16xf32> to vector<16x16xf32>
    %62 = vector.broadcast %59 : f32 to vector<16x16xf32>
    %63 = arith.mulf %62, %61 : vector<16x16xf32>
    %cst_29 = arith.constant 0.000000e+00 : f32
    %64 = vector.broadcast %cst_29 : f32 to vector<16x16xf32>
    %65 = arith.addf %64, %63 : vector<16x16xf32>
    %c1_30 = arith.constant 1 : index
    %c2_31 = arith.constant 2 : index
    %66 = memref.load %arg2[%c1_30, %c2_31] : memref<4x4xf32, #tpu.memory_space<smem>>
    %67 = vector.extract_strided_slice %8 {offsets = [1, 0, 0], sizes = [1, 16, 16], strides = [1, 1, 1]} : vector<4x16x16xf32> to vector<1x16x16xf32>
    %68 = vector.shape_cast %67 : vector<1x16x16xf32> to vector<16x16xf32>
    %69 = vector.broadcast %66 : f32 to vector<16x16xf32>
    %70 = arith.mulf %69, %68 : vector<16x16xf32>
    %71 = arith.addf %65, %70 : vector<16x16xf32>
    %c2_32 = arith.constant 2 : index
    %c2_33 = arith.constant 2 : index
    %72 = memref.load %arg2[%c2_32, %c2_33] : memref<4x4xf32, #tpu.memory_space<smem>>
    %73 = vector.extract_strided_slice %8 {offsets = [2, 0, 0], sizes = [1, 16, 16], strides = [1, 1, 1]} : vector<4x16x16xf32> to vector<1x16x16xf32>
    %74 = vector.shape_cast %73 : vector<1x16x16xf32> to vector<16x16xf32>
    %75 = vector.broadcast %72 : f32 to vector<16x16xf32>
    %76 = arith.mulf %75, %74 : vector<16x16xf32>
    %77 = arith.addf %71, %76 : vector<16x16xf32>
    %c3_34 = arith.constant 3 : index
    %c2_35 = arith.constant 2 : index
    %78 = memref.load %arg2[%c3_34, %c2_35] : memref<4x4xf32, #tpu.memory_space<smem>>
    %79 = vector.extract_strided_slice %8 {offsets = [3, 0, 0], sizes = [1, 16, 16], strides = [1, 1, 1]} : vector<4x16x16xf32> to vector<1x16x16xf32>
    %80 = vector.shape_cast %79 : vector<1x16x16xf32> to vector<16x16xf32>
    %81 = vector.broadcast %78 : f32 to vector<16x16xf32>
    %82 = arith.mulf %81, %80 : vector<16x16xf32>
    %83 = arith.addf %77, %82 : vector<16x16xf32>
    %c0_36 = arith.constant 0 : index
    %c3_37 = arith.constant 3 : index
    %84 = memref.load %arg2[%c0_36, %c3_37] : memref<4x4xf32, #tpu.memory_space<smem>>
    %85 = vector.extract_strided_slice %8 {offsets = [0, 0, 0], sizes = [1, 16, 16], strides = [1, 1, 1]} : vector<4x16x16xf32> to vector<1x16x16xf32>
    %86 = vector.shape_cast %85 : vector<1x16x16xf32> to vector<16x16xf32>
    %87 = vector.broadcast %84 : f32 to vector<16x16xf32>
    %88 = arith.mulf %87, %86 : vector<16x16xf32>
    %cst_38 = arith.constant 0.000000e+00 : f32
    %89 = vector.broadcast %cst_38 : f32 to vector<16x16xf32>
    %90 = arith.addf %89, %88 : vector<16x16xf32>
    %c1_39 = arith.constant 1 : index
    %c3_40 = arith.constant 3 : index
    %91 = memref.load %arg2[%c1_39, %c3_40] : memref<4x4xf32, #tpu.memory_space<smem>>
    %92 = vector.extract_strided_slice %8 {offsets = [1, 0, 0], sizes = [1, 16, 16], strides = [1, 1, 1]} : vector<4x16x16xf32> to vector<1x16x16xf32>
    %93 = vector.shape_cast %92 : vector<1x16x16xf32> to vector<16x16xf32>
    %94 = vector.broadcast %91 : f32 to vector<16x16xf32>
    %95 = arith.mulf %94, %93 : vector<16x16xf32>
    %96 = arith.addf %90, %95 : vector<16x16xf32>
    %c2_41 = arith.constant 2 : index
    %c3_42 = arith.constant 3 : index
    %97 = memref.load %arg2[%c2_41, %c3_42] : memref<4x4xf32, #tpu.memory_space<smem>>
    %98 = vector.extract_strided_slice %8 {offsets = [2, 0, 0], sizes = [1, 16, 16], strides = [1, 1, 1]} : vector<4x16x16xf32> to vector<1x16x16xf32>
    %99 = vector.shape_cast %98 : vector<1x16x16xf32> to vector<16x16xf32>
    %100 = vector.broadcast %97 : f32 to vector<16x16xf32>
    %101 = arith.mulf %100, %99 : vector<16x16xf32>
    %102 = arith.addf %96, %101 : vector<16x16xf32>
    %c3_43 = arith.constant 3 : index
    %c3_44 = arith.constant 3 : index
    %103 = memref.load %arg2[%c3_43, %c3_44] : memref<4x4xf32, #tpu.memory_space<smem>>
    %104 = vector.extract_strided_slice %8 {offsets = [3, 0, 0], sizes = [1, 16, 16], strides = [1, 1, 1]} : vector<4x16x16xf32> to vector<1x16x16xf32>
    %105 = vector.shape_cast %104 : vector<1x16x16xf32> to vector<16x16xf32>
    %106 = vector.broadcast %103 : f32 to vector<16x16xf32>
    %107 = arith.mulf %106, %105 : vector<16x16xf32>
    %108 = arith.addf %102, %107 : vector<16x16xf32>
    %109 = vector.shape_cast %33 : vector<16x16xf32> to vector<1x16x16xf32>
    %110 = vector.shape_cast %58 : vector<16x16xf32> to vector<1x16x16xf32>
    %111 = vector.shape_cast %83 : vector<16x16xf32> to vector<1x16x16xf32>
    %112 = vector.shape_cast %108 : vector<16x16xf32> to vector<1x16x16xf32>
    %113 = tpu.concatenate %109, %110, %111, %112 in 0 : vector<1x16x16xf32>, vector<1x16x16xf32>, vector<1x16x16xf32>, vector<1x16x16xf32> -> vector<4x16x16xf32>
    %cst_45 = arith.constant dense<0xFF800000> : vector<4x16xf32>
    %114 = vector.multi_reduction <maximumf>, %113, %cst_45 [2] : vector<4x16x16xf32> to vector<4x16xf32>
    %115 = vector.shape_cast %114 : vector<4x16xf32> to vector<4x16x1xf32>
    %116 = vector.broadcast %115 : vector<4x16x1xf32> to vector<4x16x16xf32>
    %117 = arith.subf %113, %116 : vector<4x16x16xf32>
    %118 = math.exp %117 : vector<4x16x16xf32>
    %cst_46 = arith.constant dense<0.000000e+00> : vector<4x16xf32>
    %119 = vector.multi_reduction <add>, %118, %cst_46 [2] : vector<4x16x16xf32> to vector<4x16xf32>
    %120 = vector.shape_cast %119 : vector<4x16xf32> to vector<4x16x1xf32>
    %121 = tpu.reciprocal %120 {approx = true} : vector<4x16x1xf32> -> vector<4x16x1xf32>
    %122 = vector.broadcast %121 : vector<4x16x1xf32> to vector<4x16x16xf32>
    %123 = arith.mulf %118, %122 : vector<4x16x16xf32>
    %c0_47 = arith.constant 0 : index
    %c0_48 = arith.constant 0 : index
    %124 = memref.load %arg3[%c0_47, %c0_48] : memref<4x4xf32, #tpu.memory_space<smem>>
    %125 = vector.extract_strided_slice %123 {offsets = [0, 0, 0], sizes = [1, 16, 16], strides = [1, 1, 1]} : vector<4x16x16xf32> to vector<1x16x16xf32>
    %126 = vector.shape_cast %125 : vector<1x16x16xf32> to vector<16x16xf32>
    %127 = vector.broadcast %124 : f32 to vector<16x16xf32>
    %128 = arith.mulf %127, %126 : vector<16x16xf32>
    %cst_49 = arith.constant 0.000000e+00 : f32
    %129 = vector.broadcast %cst_49 : f32 to vector<16x16xf32>
    %130 = arith.addf %129, %128 : vector<16x16xf32>
    %c1_50 = arith.constant 1 : index
    %c0_51 = arith.constant 0 : index
    %131 = memref.load %arg3[%c1_50, %c0_51] : memref<4x4xf32, #tpu.memory_space<smem>>
    %132 = vector.extract_strided_slice %123 {offsets = [1, 0, 0], sizes = [1, 16, 16], strides = [1, 1, 1]} : vector<4x16x16xf32> to vector<1x16x16xf32>
    %133 = vector.shape_cast %132 : vector<1x16x16xf32> to vector<16x16xf32>
    %134 = vector.broadcast %131 : f32 to vector<16x16xf32>
    %135 = arith.mulf %134, %133 : vector<16x16xf32>
    %136 = arith.addf %130, %135 : vector<16x16xf32>
    %c2_52 = arith.constant 2 : index
    %c0_53 = arith.constant 0 : index
    %137 = memref.load %arg3[%c2_52, %c0_53] : memref<4x4xf32, #tpu.memory_space<smem>>
    %138 = vector.extract_strided_slice %123 {offsets = [2, 0, 0], sizes = [1, 16, 16], strides = [1, 1, 1]} : vector<4x16x16xf32> to vector<1x16x16xf32>
    %139 = vector.shape_cast %138 : vector<1x16x16xf32> to vector<16x16xf32>
    %140 = vector.broadcast %137 : f32 to vector<16x16xf32>
    %141 = arith.mulf %140, %139 : vector<16x16xf32>
    %142 = arith.addf %136, %141 : vector<16x16xf32>
    %c3_54 = arith.constant 3 : index
    %c0_55 = arith.constant 0 : index
    %143 = memref.load %arg3[%c3_54, %c0_55] : memref<4x4xf32, #tpu.memory_space<smem>>
    %144 = vector.extract_strided_slice %123 {offsets = [3, 0, 0], sizes = [1, 16, 16], strides = [1, 1, 1]} : vector<4x16x16xf32> to vector<1x16x16xf32>
    %145 = vector.shape_cast %144 : vector<1x16x16xf32> to vector<16x16xf32>
    %146 = vector.broadcast %143 : f32 to vector<16x16xf32>
    %147 = arith.mulf %146, %145 : vector<16x16xf32>
    %148 = arith.addf %142, %147 : vector<16x16xf32>
    %c0_56 = arith.constant 0 : index
    %c1_57 = arith.constant 1 : index
    %149 = memref.load %arg3[%c0_56, %c1_57] : memref<4x4xf32, #tpu.memory_space<smem>>
    %150 = vector.extract_strided_slice %123 {offsets = [0, 0, 0], sizes = [1, 16, 16], strides = [1, 1, 1]} : vector<4x16x16xf32> to vector<1x16x16xf32>
    %151 = vector.shape_cast %150 : vector<1x16x16xf32> to vector<16x16xf32>
    %152 = vector.broadcast %149 : f32 to vector<16x16xf32>
    %153 = arith.mulf %152, %151 : vector<16x16xf32>
    %cst_58 = arith.constant 0.000000e+00 : f32
    %154 = vector.broadcast %cst_58 : f32 to vector<16x16xf32>
    %155 = arith.addf %154, %153 : vector<16x16xf32>
    %c1_59 = arith.constant 1 : index
    %c1_60 = arith.constant 1 : index
    %156 = memref.load %arg3[%c1_59, %c1_60] : memref<4x4xf32, #tpu.memory_space<smem>>
    %157 = vector.extract_strided_slice %123 {offsets = [1, 0, 0], sizes = [1, 16, 16], strides = [1, 1, 1]} : vector<4x16x16xf32> to vector<1x16x16xf32>
    %158 = vector.shape_cast %157 : vector<1x16x16xf32> to vector<16x16xf32>
    %159 = vector.broadcast %156 : f32 to vector<16x16xf32>
    %160 = arith.mulf %159, %158 : vector<16x16xf32>
    %161 = arith.addf %155, %160 : vector<16x16xf32>
    %c2_61 = arith.constant 2 : index
    %c1_62 = arith.constant 1 : index
    %162 = memref.load %arg3[%c2_61, %c1_62] : memref<4x4xf32, #tpu.memory_space<smem>>
    %163 = vector.extract_strided_slice %123 {offsets = [2, 0, 0], sizes = [1, 16, 16], strides = [1, 1, 1]} : vector<4x16x16xf32> to vector<1x16x16xf32>
    %164 = vector.shape_cast %163 : vector<1x16x16xf32> to vector<16x16xf32>
    %165 = vector.broadcast %162 : f32 to vector<16x16xf32>
    %166 = arith.mulf %165, %164 : vector<16x16xf32>
    %167 = arith.addf %161, %166 : vector<16x16xf32>
    %c3_63 = arith.constant 3 : index
    %c1_64 = arith.constant 1 : index
    %168 = memref.load %arg3[%c3_63, %c1_64] : memref<4x4xf32, #tpu.memory_space<smem>>
    %169 = vector.extract_strided_slice %123 {offsets = [3, 0, 0], sizes = [1, 16, 16], strides = [1, 1, 1]} : vector<4x16x16xf32> to vector<1x16x16xf32>
    %170 = vector.shape_cast %169 : vector<1x16x16xf32> to vector<16x16xf32>
    %171 = vector.broadcast %168 : f32 to vector<16x16xf32>
    %172 = arith.mulf %171, %170 : vector<16x16xf32>
    %173 = arith.addf %167, %172 : vector<16x16xf32>
    %c0_65 = arith.constant 0 : index
    %c2_66 = arith.constant 2 : index
    %174 = memref.load %arg3[%c0_65, %c2_66] : memref<4x4xf32, #tpu.memory_space<smem>>
    %175 = vector.extract_strided_slice %123 {offsets = [0, 0, 0], sizes = [1, 16, 16], strides = [1, 1, 1]} : vector<4x16x16xf32> to vector<1x16x16xf32>
    %176 = vector.shape_cast %175 : vector<1x16x16xf32> to vector<16x16xf32>
    %177 = vector.broadcast %174 : f32 to vector<16x16xf32>
    %178 = arith.mulf %177, %176 : vector<16x16xf32>
    %cst_67 = arith.constant 0.000000e+00 : f32
    %179 = vector.broadcast %cst_67 : f32 to vector<16x16xf32>
    %180 = arith.addf %179, %178 : vector<16x16xf32>
    %c1_68 = arith.constant 1 : index
    %c2_69 = arith.constant 2 : index
    %181 = memref.load %arg3[%c1_68, %c2_69] : memref<4x4xf32, #tpu.memory_space<smem>>
    %182 = vector.extract_strided_slice %123 {offsets = [1, 0, 0], sizes = [1, 16, 16], strides = [1, 1, 1]} : vector<4x16x16xf32> to vector<1x16x16xf32>
    %183 = vector.shape_cast %182 : vector<1x16x16xf32> to vector<16x16xf32>
    %184 = vector.broadcast %181 : f32 to vector<16x16xf32>
    %185 = arith.mulf %184, %183 : vector<16x16xf32>
    %186 = arith.addf %180, %185 : vector<16x16xf32>
    %c2_70 = arith.constant 2 : index
    %c2_71 = arith.constant 2 : index
    %187 = memref.load %arg3[%c2_70, %c2_71] : memref<4x4xf32, #tpu.memory_space<smem>>
    %188 = vector.extract_strided_slice %123 {offsets = [2, 0, 0], sizes = [1, 16, 16], strides = [1, 1, 1]} : vector<4x16x16xf32> to vector<1x16x16xf32>
    %189 = vector.shape_cast %188 : vector<1x16x16xf32> to vector<16x16xf32>
    %190 = vector.broadcast %187 : f32 to vector<16x16xf32>
    %191 = arith.mulf %190, %189 : vector<16x16xf32>
    %192 = arith.addf %186, %191 : vector<16x16xf32>
    %c3_72 = arith.constant 3 : index
    %c2_73 = arith.constant 2 : index
    %193 = memref.load %arg3[%c3_72, %c2_73] : memref<4x4xf32, #tpu.memory_space<smem>>
    %194 = vector.extract_strided_slice %123 {offsets = [3, 0, 0], sizes = [1, 16, 16], strides = [1, 1, 1]} : vector<4x16x16xf32> to vector<1x16x16xf32>
    %195 = vector.shape_cast %194 : vector<1x16x16xf32> to vector<16x16xf32>
    %196 = vector.broadcast %193 : f32 to vector<16x16xf32>
    %197 = arith.mulf %196, %195 : vector<16x16xf32>
    %198 = arith.addf %192, %197 : vector<16x16xf32>
    %c0_74 = arith.constant 0 : index
    %c3_75 = arith.constant 3 : index
    %199 = memref.load %arg3[%c0_74, %c3_75] : memref<4x4xf32, #tpu.memory_space<smem>>
    %200 = vector.extract_strided_slice %123 {offsets = [0, 0, 0], sizes = [1, 16, 16], strides = [1, 1, 1]} : vector<4x16x16xf32> to vector<1x16x16xf32>
    %201 = vector.shape_cast %200 : vector<1x16x16xf32> to vector<16x16xf32>
    %202 = vector.broadcast %199 : f32 to vector<16x16xf32>
    %203 = arith.mulf %202, %201 : vector<16x16xf32>
    %cst_76 = arith.constant 0.000000e+00 : f32
    %204 = vector.broadcast %cst_76 : f32 to vector<16x16xf32>
    %205 = arith.addf %204, %203 : vector<16x16xf32>
    %c1_77 = arith.constant 1 : index
    %c3_78 = arith.constant 3 : index
    %206 = memref.load %arg3[%c1_77, %c3_78] : memref<4x4xf32, #tpu.memory_space<smem>>
    %207 = vector.extract_strided_slice %123 {offsets = [1, 0, 0], sizes = [1, 16, 16], strides = [1, 1, 1]} : vector<4x16x16xf32> to vector<1x16x16xf32>
    %208 = vector.shape_cast %207 : vector<1x16x16xf32> to vector<16x16xf32>
    %209 = vector.broadcast %206 : f32 to vector<16x16xf32>
    %210 = arith.mulf %209, %208 : vector<16x16xf32>
    %211 = arith.addf %205, %210 : vector<16x16xf32>
    %c2_79 = arith.constant 2 : index
    %c3_80 = arith.constant 3 : index
    %212 = memref.load %arg3[%c2_79, %c3_80] : memref<4x4xf32, #tpu.memory_space<smem>>
    %213 = vector.extract_strided_slice %123 {offsets = [2, 0, 0], sizes = [1, 16, 16], strides = [1, 1, 1]} : vector<4x16x16xf32> to vector<1x16x16xf32>
    %214 = vector.shape_cast %213 : vector<1x16x16xf32> to vector<16x16xf32>
    %215 = vector.broadcast %212 : f32 to vector<16x16xf32>
    %216 = arith.mulf %215, %214 : vector<16x16xf32>
    %217 = arith.addf %211, %216 : vector<16x16xf32>
    %c3_81 = arith.constant 3 : index
    %c3_82 = arith.constant 3 : index
    %218 = memref.load %arg3[%c3_81, %c3_82] : memref<4x4xf32, #tpu.memory_space<smem>>
    %219 = vector.extract_strided_slice %123 {offsets = [3, 0, 0], sizes = [1, 16, 16], strides = [1, 1, 1]} : vector<4x16x16xf32> to vector<1x16x16xf32>
    %220 = vector.shape_cast %219 : vector<1x16x16xf32> to vector<16x16xf32>
    %221 = vector.broadcast %218 : f32 to vector<16x16xf32>
    %222 = arith.mulf %221, %220 : vector<16x16xf32>
    %223 = arith.addf %217, %222 : vector<16x16xf32>
    %224 = vector.shape_cast %148 : vector<16x16xf32> to vector<1x16x16xf32>
    %225 = vector.shape_cast %173 : vector<16x16xf32> to vector<1x16x16xf32>
    %226 = vector.shape_cast %198 : vector<16x16xf32> to vector<1x16x16xf32>
    %227 = vector.shape_cast %223 : vector<16x16xf32> to vector<1x16x16xf32>
    %228 = tpu.concatenate %224, %225, %226, %227 in 0 : vector<1x16x16xf32>, vector<1x16x16xf32>, vector<1x16x16xf32>, vector<1x16x16xf32> -> vector<4x16x16xf32>
    %229 = arith.truncf %228 : vector<4x16x16xf32> to vector<4x16x16xbf16>
    %cst_83 = arith.constant dense<0.000000e+00> : vector<4x16x8xf32>
    %230 = tpu.matmul %229, %5, %cst_83 {dimension_numbers = #tpu.dot_dimension_numbers<[2], [1], [1], [2], [0, 0, 0, 1, 1, 2], [0], [0]>} : vector<4x16x16xbf16>, vector<4x16x8xbf16>, vector<4x16x8xf32> -> vector<4x16x8xf32>
    %231 = arith.truncf %230 : vector<4x16x8xf32> to vector<4x16x8xbf16>
    %c0_84 = arith.constant 0 : index
    %c0_85 = arith.constant 0 : index
    %c0_86 = arith.constant 0 : index
    %c0_87 = arith.constant 0 : index
    %232 = vector.load %arg7[%c0_84, %c0_85, %c0_86, %c0_87] : memref<1x4x16x8xbf16, #tpu.memory_space<vmem>>, vector<1x4x16x8xbf16>
    %233 = vector.shape_cast %232 : vector<1x4x16x8xbf16> to vector<4x16x8xbf16>
    %234 = vector.shape_cast %231 : vector<4x16x8xbf16> to vector<1x4x16x8xbf16>
    tpu.vector_store %arg7[%c0_84, %c0_85, %c0_86, %c0_87], %234 {strides = array<i32>} : memref<1x4x16x8xbf16, #tpu.memory_space<vmem>>, vector<1x4x16x8xbf16>,
    return
  }
  func.func @transform_0(%arg0: i32, %arg1: i32) -> (i32, i32) {
    %c0_i32 = arith.constant 0 : i32
    %c0_i32_0 = arith.constant 0 : i32
    %c0_i32_1 = arith.constant 0 : i32
    return %c0_i32, %c0_i32_0 : i32, i32
  }
  func.func @transform_1(%arg0: i32, %arg1: i32) -> (i32, i32) {
    %c0_i32 = arith.constant 0 : i32
    %c0_i32_0 = arith.constant 0 : i32
    %c0_i32_1 = arith.constant 0 : i32
    return %c0_i32, %c0_i32_0 : i32, i32
  }
  func.func @transform_2(%arg0: i32, %arg1: i32) -> (i32, i32, i32, i32) {
    %c0_i32 = arith.constant 0 : i32
    %c0_i32_0 = arith.constant 0 : i32
    %c0_i32_1 = arith.constant 0 : i32
    return %arg0, %c0_i32, %arg1, %c0_i32_0 : i32, i32, i32, i32
  }
  func.func @transform_3(%arg0: i32, %arg1: i32) -> (i32, i32, i32, i32) {
    %c0_i32 = arith.constant 0 : i32
    %c0_i32_0 = arith.constant 0 : i32
    %c0_i32_1 = arith.constant 0 : i32
    %c0_i32_2 = arith.constant 0 : i32
    return %arg0, %c0_i32, %c0_i32_0, %c0_i32_1 : i32, i32, i32, i32
  }
  func.func @transform_4(%arg0: i32, %arg1: i32) -> (i32, i32, i32, i32) {
    %c0_i32 = arith.constant 0 : i32
    %c0_i32_0 = arith.constant 0 : i32
    %c0_i32_1 = arith.constant 0 : i32
    %c0_i32_2 = arith.constant 0 : i32
    return %arg0, %c0_i32, %c0_i32_0, %c0_i32_1 : i32, i32, i32, i32
  }
  func.func @transform_5(%arg0: i32, %arg1: i32) -> (i32, i32, i32, i32) {
    %c0_i32 = arith.constant 0 : i32
    %c0_i32_0 = arith.constant 0 : i32
    %c0_i32_1 = arith.constant 0 : i32
    return %arg0, %c0_i32, %arg1, %c0_i32_0 : i32, i32, i32, i32
  }
}

module attributes {stable_mosaic.version = 11 : i64} {
  func.func @_ln_matmul_kernel(%arg0: i32, %arg1: i32, %arg2: memref<32x128xf32, #tpu.memory_space<vmem>>, %arg3: memref<1x128xf32, #tpu.memory_space<vmem>>, %arg4: memref<1x128xf32, #tpu.memory_space<vmem>>, %arg5: memref<128x128xbf16, #tpu.memory_space<vmem>>, %arg6: memref<1x128xf32, #tpu.memory_space<vmem>>, %arg7: memref<32x128xbf16, #tpu.memory_space<vmem>>, %arg8: memref<32x128xbf16, #tpu.memory_space<vmem>>) attributes {dimension_semantics = [#tpu.dimension_semantics<parallel>, #tpu.dimension_semantics<arbitrary>], iteration_bounds = array<i64: 1, 1>, scalar_prefetch = 0 : i64, scratch_operands = 1 : i64, tpu.core_type = #tpu.core_type<tc>, window_params = [{transform_indices = @transform_0, window_bounds = array<i64: 32, 128>}, {pipeline_mode = #tpu.pipeline_mode<synchronous>, transform_indices = @transform_1, window_bounds = array<i64: 1, 128>}, {pipeline_mode = #tpu.pipeline_mode<synchronous>, transform_indices = @transform_2, window_bounds = array<i64: 1, 128>}, {transform_indices = @transform_3, window_bounds = array<i64: 128, 128>}, {transform_indices = @transform_4, window_bounds = array<i64: 1, 128>}, {transform_indices = @transform_5, window_bounds = array<i64: 32, 128>}]} {
    %c0_i32 = arith.constant 0 : i32
    %0 = arith.cmpi eq, %arg1, %c0_i32 : i32
    %1 = arith.extui %0 : i1 to i32
    %c0_i32_0 = arith.constant 0 : i32
    %2 = arith.cmpi ne, %1, %c0_i32_0 : i32
    scf.if %2 {
      %c0_11 = arith.constant 0 : index
      %c0_12 = arith.constant 0 : index
      %19 = vector.load %arg2[%c0_11, %c0_12] : memref<32x128xf32, #tpu.memory_space<vmem>>, vector<32x128xf32>
      %c0_13 = arith.constant 0 : index
      %c0_14 = arith.constant 0 : index
      %20 = vector.load %arg3[%c0_13, %c0_14] : memref<1x128xf32, #tpu.memory_space<vmem>>, vector<1x128xf32>
      %c0_15 = arith.constant 0 : index
      %c0_16 = arith.constant 0 : index
      %21 = vector.load %arg4[%c0_15, %c0_16] : memref<1x128xf32, #tpu.memory_space<vmem>>, vector<1x128xf32>
      %cst_17 = arith.constant dense<0.000000e+00> : vector<32xf32>
      %22 = vector.multi_reduction <add>, %19, %cst_17 [1] : vector<32x128xf32> to vector<32xf32>
      %23 = vector.shape_cast %22 : vector<32xf32> to vector<32x1xf32>
      %cst_18 = arith.constant 3.125000e-02 : f32
      %24 = vector.broadcast %cst_18 : f32 to vector<32x1xf32>
      %25 = arith.mulf %23, %24 : vector<32x1xf32>
      %26 = tpu.iota {dimensions = array<i32: 1>} : vector<32x128xi32>
      %c32_i32 = arith.constant 32 : i32
      %27 = vector.broadcast %c32_i32 : i32 to vector<32x128xi32>
      %28 = arith.cmpi slt, %26, %27 : vector<32x128xi32>
      %29 = vector.broadcast %25 : vector<32x1xf32> to vector<32x128xf32>
      %30 = arith.subf %19, %29 : vector<32x128xf32>
      %cst_19 = arith.constant 0.000000e+00 : f32
      %31 = vector.broadcast %cst_19 : f32 to vector<32x128xf32>
      %32 = arith.select %28, %30, %31 : vector<32x128xi1>, vector<32x128xf32>
      %33 = arith.mulf %32, %32 : vector<32x128xf32>
      %cst_20 = arith.constant dense<0.000000e+00> : vector<32xf32>
      %34 = vector.multi_reduction <add>, %33, %cst_20 [1] : vector<32x128xf32> to vector<32xf32>
      %35 = vector.shape_cast %34 : vector<32xf32> to vector<32x1xf32>
      %cst_21 = arith.constant 3.125000e-02 : f32
      %36 = vector.broadcast %cst_21 : f32 to vector<32x1xf32>
      %37 = arith.mulf %35, %36 : vector<32x1xf32>
      %cst_22 = arith.constant 9.99999974E-6 : f32
      %38 = vector.broadcast %cst_22 : f32 to vector<32x1xf32>
      %39 = arith.addf %37, %38 : vector<32x1xf32>
      %40 = math.rsqrt %39 : vector<32x1xf32>
      %41 = vector.broadcast %40 : vector<32x1xf32> to vector<32x128xf32>
      %42 = arith.mulf %32, %41 : vector<32x128xf32>
      %43 = vector.broadcast %20 : vector<1x128xf32> to vector<32x128xf32>
      %44 = arith.mulf %42, %43 : vector<32x128xf32>
      %45 = vector.broadcast %21 : vector<1x128xf32> to vector<32x128xf32>
      %46 = arith.addf %44, %45 : vector<32x128xf32>
      %47 = arith.truncf %46 : vector<32x128xf32> to vector<32x128xbf16>
      %c0_23 = arith.constant 0 : index
      %c0_24 = arith.constant 0 : index
      %48 = vector.load %arg8[%c0_23, %c0_24] : memref<32x128xbf16, #tpu.memory_space<vmem>>, vector<32x128xbf16>
      tpu.vector_store %arg8[%c0_23, %c0_24], %47 {strides = array<i32>} : memref<32x128xbf16, #tpu.memory_space<vmem>>, vector<32x128xbf16>,
    } else {
    }
    %c0 = arith.constant 0 : index
    %c0_1 = arith.constant 0 : index
    %3 = vector.load %arg8[%c0, %c0_1] : memref<32x128xbf16, #tpu.memory_space<vmem>>, vector<32x128xbf16>
    %c0_2 = arith.constant 0 : index
    %c0_3 = arith.constant 0 : index
    %4 = vector.load %arg5[%c0_2, %c0_3] : memref<128x128xbf16, #tpu.memory_space<vmem>>, vector<128x128xbf16>
    %cst = arith.constant dense<0.000000e+00> : vector<32x128xf32>
    %5 = tpu.matmul %3, %4, %cst {dimension_numbers = #tpu.dot_dimension_numbers<[1], [0], [0], [1], [0, 0, 1, 1], [], []>} : vector<32x128xbf16>, vector<128x128xbf16>, vector<32x128xf32> -> vector<32x128xf32>
    %c0_4 = arith.constant 0 : index
    %c0_5 = arith.constant 0 : index
    %6 = vector.load %arg6[%c0_4, %c0_5] : memref<1x128xf32, #tpu.memory_space<vmem>>, vector<1x128xf32>
    %7 = vector.broadcast %6 : vector<1x128xf32> to vector<32x128xf32>
    %8 = arith.addf %5, %7 : vector<32x128xf32>
    %cst_6 = arith.constant 5.000000e-01 : f32
    %9 = vector.broadcast %cst_6 : f32 to vector<32x128xf32>
    %10 = arith.mulf %9, %8 : vector<32x128xf32>
    %cst_7 = arith.constant 0.707106769 : f32
    %11 = vector.broadcast %cst_7 : f32 to vector<32x128xf32>
    %12 = arith.mulf %8, %11 : vector<32x128xf32>
    %13 = math.erf %12 : vector<32x128xf32>
    %cst_8 = arith.constant 1.000000e+00 : f32
    %14 = vector.broadcast %cst_8 : f32 to vector<32x128xf32>
    %15 = arith.addf %14, %13 : vector<32x128xf32>
    %16 = arith.mulf %10, %15 : vector<32x128xf32>
    %17 = arith.truncf %16 : vector<32x128xf32> to vector<32x128xbf16>
    %c0_9 = arith.constant 0 : index
    %c0_10 = arith.constant 0 : index
    %18 = vector.load %arg7[%c0_9, %c0_10] : memref<32x128xbf16, #tpu.memory_space<vmem>>, vector<32x128xbf16>
    tpu.vector_store %arg7[%c0_9, %c0_10], %17 {strides = array<i32>} : memref<32x128xbf16, #tpu.memory_space<vmem>>, vector<32x128xbf16>,
    return
  }
  func.func @transform_0(%arg0: i32, %arg1: i32) -> (i32, i32) {
    %c0_i32 = arith.constant 0 : i32
    %c0_i32_0 = arith.constant 0 : i32
    return %arg0, %c0_i32 : i32, i32
  }
  func.func @transform_1(%arg0: i32, %arg1: i32) -> (i32, i32) {
    %c0_i32 = arith.constant 0 : i32
    %c0_i32_0 = arith.constant 0 : i32
    %c0_i32_1 = arith.constant 0 : i32
    return %c0_i32, %c0_i32_0 : i32, i32
  }
  func.func @transform_2(%arg0: i32, %arg1: i32) -> (i32, i32) {
    %c0_i32 = arith.constant 0 : i32
    %c0_i32_0 = arith.constant 0 : i32
    %c0_i32_1 = arith.constant 0 : i32
    return %c0_i32, %c0_i32_0 : i32, i32
  }
  func.func @transform_3(%arg0: i32, %arg1: i32) -> (i32, i32) {
    %c0_i32 = arith.constant 0 : i32
    %c0_i32_0 = arith.constant 0 : i32
    return %c0_i32, %arg1 : i32, i32
  }
  func.func @transform_4(%arg0: i32, %arg1: i32) -> (i32, i32) {
    %c0_i32 = arith.constant 0 : i32
    %c0_i32_0 = arith.constant 0 : i32
    return %c0_i32, %arg1 : i32, i32
  }
  func.func @transform_5(%arg0: i32, %arg1: i32) -> (i32, i32) {
    %c0_i32 = arith.constant 0 : i32
    return %arg0, %arg1 : i32, i32
  }
}

module attributes {stable_mosaic.version = 11 : i64} {
  func.func @_matmul_kernel(%arg0: i32, %arg1: i32, %arg2: i32, %arg3: memref<32x128xbf16, #tpu.memory_space<vmem>>, %arg4: memref<128x128xbf16, #tpu.memory_space<vmem>>, %arg5: memref<1x128xf32, #tpu.memory_space<vmem>>, %arg6: memref<1x128xf32, #tpu.memory_space<vmem>>, %arg7: memref<32x128xf32, #tpu.memory_space<vmem>>, %arg8: memref<32x128xf32, #tpu.memory_space<vmem>>, %arg9: memref<32x128xf32, #tpu.memory_space<vmem>>) attributes {dimension_semantics = [#tpu.dimension_semantics<parallel>, #tpu.dimension_semantics<parallel>, #tpu.dimension_semantics<arbitrary>], iteration_bounds = array<i64: 1, 1, 1>, scalar_prefetch = 0 : i64, scratch_operands = 1 : i64, tpu.core_type = #tpu.core_type<tc>, window_params = [{transform_indices = @transform_0, window_bounds = array<i64: 32, 128>}, {transform_indices = @transform_1, window_bounds = array<i64: 128, 128>}, {transform_indices = @transform_2, window_bounds = array<i64: 1, 128>}, {transform_indices = @transform_3, window_bounds = array<i64: 1, 128>}, {transform_indices = @transform_4, window_bounds = array<i64: 32, 128>}, {transform_indices = @transform_5, window_bounds = array<i64: 32, 128>}]} {
    %c0_i32 = arith.constant 0 : i32
    %0 = arith.cmpi eq, %arg2, %c0_i32 : i32
    %1 = arith.extui %0 : i1 to i32
    %c0_i32_0 = arith.constant 0 : i32
    %2 = arith.cmpi ne, %1, %c0_i32_0 : i32
    scf.if %2 {
      %cst_10 = arith.constant 0.000000e+00 : f32
      %12 = vector.broadcast %cst_10 : f32 to vector<32x128xf32>
      %c0_11 = arith.constant 0 : index
      %c0_12 = arith.constant 0 : index
      %13 = vector.load %arg9[%c0_11, %c0_12] : memref<32x128xf32, #tpu.memory_space<vmem>>, vector<32x128xf32>
      tpu.vector_store %arg9[%c0_11, %c0_12], %12 {strides = array<i32>} : memref<32x128xf32, #tpu.memory_space<vmem>>, vector<32x128xf32>,
    } else {
    }
    %c0 = arith.constant 0 : index
    %c0_1 = arith.constant 0 : index
    %3 = vector.load %arg9[%c0, %c0_1] : memref<32x128xf32, #tpu.memory_space<vmem>>, vector<32x128xf32>
    %c0_2 = arith.constant 0 : index
    %c0_3 = arith.constant 0 : index
    %4 = vector.load %arg3[%c0_2, %c0_3] : memref<32x128xbf16, #tpu.memory_space<vmem>>, vector<32x128xbf16>
    %c0_4 = arith.constant 0 : index
    %c0_5 = arith.constant 0 : index
    %5 = vector.load %arg4[%c0_4, %c0_5] : memref<128x128xbf16, #tpu.memory_space<vmem>>, vector<128x128xbf16>
    %cst = arith.constant dense<0.000000e+00> : vector<32x128xf32>
    %6 = tpu.matmul %4, %5, %cst {dimension_numbers = #tpu.dot_dimension_numbers<[1], [0], [0], [1], [0, 0, 1, 1], [], []>} : vector<32x128xbf16>, vector<128x128xbf16>, vector<32x128xf32> -> vector<32x128xf32>
    %7 = arith.addf %3, %6 : vector<32x128xf32>
    %c0_6 = arith.constant 0 : index
    %c0_7 = arith.constant 0 : index
    %8 = vector.load %arg9[%c0_6, %c0_7] : memref<32x128xf32, #tpu.memory_space<vmem>>, vector<32x128xf32>
    tpu.vector_store %arg9[%c0_6, %c0_7], %7 {strides = array<i32>} : memref<32x128xf32, #tpu.memory_space<vmem>>, vector<32x128xf32>,
    %c0_i32_8 = arith.constant 0 : i32
    %9 = arith.cmpi eq, %arg2, %c0_i32_8 : i32
    %10 = arith.extui %9 : i1 to i32
    %c0_i32_9 = arith.constant 0 : i32
    %11 = arith.cmpi ne, %10, %c0_i32_9 : i32
    scf.if %11 {
      %c0_10 = arith.constant 0 : index
      %c0_11 = arith.constant 0 : index
      %12 = vector.load %arg9[%c0_10, %c0_11] : memref<32x128xf32, #tpu.memory_space<vmem>>, vector<32x128xf32>
      %c0_12 = arith.constant 0 : index
      %c0_13 = arith.constant 0 : index
      %13 = vector.load %arg5[%c0_12, %c0_13] : memref<1x128xf32, #tpu.memory_space<vmem>>, vector<1x128xf32>
      %14 = vector.broadcast %13 : vector<1x128xf32> to vector<32x128xf32>
      %15 = arith.addf %12, %14 : vector<32x128xf32>
      %c0_14 = arith.constant 0 : index
      %c0_15 = arith.constant 0 : index
      %16 = vector.load %arg7[%c0_14, %c0_15] : memref<32x128xf32, #tpu.memory_space<vmem>>, vector<32x128xf32>
      %c0_16 = arith.constant 0 : index
      %c0_17 = arith.constant 0 : index
      %17 = vector.load %arg6[%c0_16, %c0_17] : memref<1x128xf32, #tpu.memory_space<vmem>>, vector<1x128xf32>
      %18 = vector.broadcast %17 : vector<1x128xf32> to vector<32x128xf32>
      %19 = arith.mulf %15, %18 : vector<32x128xf32>
      %20 = arith.addf %16, %19 : vector<32x128xf32>
      %c0_18 = arith.constant 0 : index
      %c0_19 = arith.constant 0 : index
      %21 = vector.load %arg8[%c0_18, %c0_19] : memref<32x128xf32, #tpu.memory_space<vmem>>, vector<32x128xf32>
      tpu.vector_store %arg8[%c0_18, %c0_19], %20 {strides = array<i32>} : memref<32x128xf32, #tpu.memory_space<vmem>>, vector<32x128xf32>,
    } else {
    }
    return
  }
  func.func @transform_0(%arg0: i32, %arg1: i32, %arg2: i32) -> (i32, i32) {
    %c0_i32 = arith.constant 0 : i32
    return %arg0, %arg2 : i32, i32
  }
  func.func @transform_1(%arg0: i32, %arg1: i32, %arg2: i32) -> (i32, i32) {
    %c0_i32 = arith.constant 0 : i32
    return %arg2, %arg1 : i32, i32
  }
  func.func @transform_2(%arg0: i32, %arg1: i32, %arg2: i32) -> (i32, i32) {
    %c0_i32 = arith.constant 0 : i32
    %c0_i32_0 = arith.constant 0 : i32
    return %c0_i32, %arg1 : i32, i32
  }
  func.func @transform_3(%arg0: i32, %arg1: i32, %arg2: i32) -> (i32, i32) {
    %c0_i32 = arith.constant 0 : i32
    %c0_i32_0 = arith.constant 0 : i32
    return %c0_i32, %arg1 : i32, i32
  }
  func.func @transform_4(%arg0: i32, %arg1: i32, %arg2: i32) -> (i32, i32) {
    %c0_i32 = arith.constant 0 : i32
    return %arg0, %arg1 : i32, i32
  }
  func.func @transform_5(%arg0: i32, %arg1: i32, %arg2: i32) -> (i32, i32) {
    %c0_i32 = arith.constant 0 : i32
    return %arg0, %arg1 : i32, i32
  }
}

module attributes {stable_mosaic.version = 11 : i64} {
  func.func @_matmul_kernel(%arg0: i32, %arg1: i32, %arg2: i32, %arg3: memref<32x32xbf16, #tpu.memory_space<vmem>>, %arg4: memref<32x128xbf16, #tpu.memory_space<vmem>>, %arg5: memref<1x128xf32, #tpu.memory_space<vmem>>, %arg6: memref<1x128xf32, #tpu.memory_space<vmem>>, %arg7: memref<32x128xf32, #tpu.memory_space<vmem>>, %arg8: memref<32x128xf32, #tpu.memory_space<vmem>>, %arg9: memref<32x128xf32, #tpu.memory_space<vmem>>) attributes {dimension_semantics = [#tpu.dimension_semantics<parallel>, #tpu.dimension_semantics<parallel>, #tpu.dimension_semantics<arbitrary>], iteration_bounds = array<i64: 1, 1, 1>, scalar_prefetch = 0 : i64, scratch_operands = 1 : i64, tpu.core_type = #tpu.core_type<tc>, window_params = [{transform_indices = @transform_0, window_bounds = array<i64: 32, 32>}, {transform_indices = @transform_1, window_bounds = array<i64: 32, 128>}, {transform_indices = @transform_2, window_bounds = array<i64: 1, 128>}, {transform_indices = @transform_3, window_bounds = array<i64: 1, 128>}, {transform_indices = @transform_4, window_bounds = array<i64: 32, 128>}, {transform_indices = @transform_5, window_bounds = array<i64: 32, 128>}]} {
    %c0_i32 = arith.constant 0 : i32
    %0 = arith.cmpi eq, %arg2, %c0_i32 : i32
    %1 = arith.extui %0 : i1 to i32
    %c0_i32_0 = arith.constant 0 : i32
    %2 = arith.cmpi ne, %1, %c0_i32_0 : i32
    scf.if %2 {
      %cst_10 = arith.constant 0.000000e+00 : f32
      %12 = vector.broadcast %cst_10 : f32 to vector<32x128xf32>
      %c0_11 = arith.constant 0 : index
      %c0_12 = arith.constant 0 : index
      %13 = vector.load %arg9[%c0_11, %c0_12] : memref<32x128xf32, #tpu.memory_space<vmem>>, vector<32x128xf32>
      tpu.vector_store %arg9[%c0_11, %c0_12], %12 {strides = array<i32>} : memref<32x128xf32, #tpu.memory_space<vmem>>, vector<32x128xf32>,
    } else {
    }
    %c0 = arith.constant 0 : index
    %c0_1 = arith.constant 0 : index
    %3 = vector.load %arg9[%c0, %c0_1] : memref<32x128xf32, #tpu.memory_space<vmem>>, vector<32x128xf32>
    %c0_2 = arith.constant 0 : index
    %c0_3 = arith.constant 0 : index
    %4 = vector.load %arg3[%c0_2, %c0_3] : memref<32x32xbf16, #tpu.memory_space<vmem>>, vector<32x32xbf16>
    %c0_4 = arith.constant 0 : index
    %c0_5 = arith.constant 0 : index
    %5 = vector.load %arg4[%c0_4, %c0_5] : memref<32x128xbf16, #tpu.memory_space<vmem>>, vector<32x128xbf16>
    %cst = arith.constant dense<0.000000e+00> : vector<32x128xf32>
    %6 = tpu.matmul %4, %5, %cst {dimension_numbers = #tpu.dot_dimension_numbers<[1], [0], [0], [1], [0, 0, 1, 1], [], []>} : vector<32x32xbf16>, vector<32x128xbf16>, vector<32x128xf32> -> vector<32x128xf32>
    %7 = arith.addf %3, %6 : vector<32x128xf32>
    %c0_6 = arith.constant 0 : index
    %c0_7 = arith.constant 0 : index
    %8 = vector.load %arg9[%c0_6, %c0_7] : memref<32x128xf32, #tpu.memory_space<vmem>>, vector<32x128xf32>
    tpu.vector_store %arg9[%c0_6, %c0_7], %7 {strides = array<i32>} : memref<32x128xf32, #tpu.memory_space<vmem>>, vector<32x128xf32>,
    %c0_i32_8 = arith.constant 0 : i32
    %9 = arith.cmpi eq, %arg2, %c0_i32_8 : i32
    %10 = arith.extui %9 : i1 to i32
    %c0_i32_9 = arith.constant 0 : i32
    %11 = arith.cmpi ne, %10, %c0_i32_9 : i32
    scf.if %11 {
      %c0_10 = arith.constant 0 : index
      %c0_11 = arith.constant 0 : index
      %12 = vector.load %arg9[%c0_10, %c0_11] : memref<32x128xf32, #tpu.memory_space<vmem>>, vector<32x128xf32>
      %c0_12 = arith.constant 0 : index
      %c0_13 = arith.constant 0 : index
      %13 = vector.load %arg5[%c0_12, %c0_13] : memref<1x128xf32, #tpu.memory_space<vmem>>, vector<1x128xf32>
      %14 = vector.broadcast %13 : vector<1x128xf32> to vector<32x128xf32>
      %15 = arith.addf %12, %14 : vector<32x128xf32>
      %c0_14 = arith.constant 0 : index
      %c0_15 = arith.constant 0 : index
      %16 = vector.load %arg7[%c0_14, %c0_15] : memref<32x128xf32, #tpu.memory_space<vmem>>, vector<32x128xf32>
      %c0_16 = arith.constant 0 : index
      %c0_17 = arith.constant 0 : index
      %17 = vector.load %arg6[%c0_16, %c0_17] : memref<1x128xf32, #tpu.memory_space<vmem>>, vector<1x128xf32>
      %18 = vector.broadcast %17 : vector<1x128xf32> to vector<32x128xf32>
      %19 = arith.mulf %15, %18 : vector<32x128xf32>
      %20 = arith.addf %16, %19 : vector<32x128xf32>
      %c0_18 = arith.constant 0 : index
      %c0_19 = arith.constant 0 : index
      %21 = vector.load %arg8[%c0_18, %c0_19] : memref<32x128xf32, #tpu.memory_space<vmem>>, vector<32x128xf32>
      tpu.vector_store %arg8[%c0_18, %c0_19], %20 {strides = array<i32>} : memref<32x128xf32, #tpu.memory_space<vmem>>, vector<32x128xf32>,
    } else {
    }
    return
  }
  func.func @transform_0(%arg0: i32, %arg1: i32, %arg2: i32) -> (i32, i32) {
    %c0_i32 = arith.constant 0 : i32
    return %arg0, %arg2 : i32, i32
  }
  func.func @transform_1(%arg0: i32, %arg1: i32, %arg2: i32) -> (i32, i32) {
    %c0_i32 = arith.constant 0 : i32
    return %arg2, %arg1 : i32, i32
  }
  func.func @transform_2(%arg0: i32, %arg1: i32, %arg2: i32) -> (i32, i32) {
    %c0_i32 = arith.constant 0 : i32
    %c0_i32_0 = arith.constant 0 : i32
    return %c0_i32, %arg1 : i32, i32
  }
  func.func @transform_3(%arg0: i32, %arg1: i32, %arg2: i32) -> (i32, i32) {
    %c0_i32 = arith.constant 0 : i32
    %c0_i32_0 = arith.constant 0 : i32
    return %c0_i32, %arg1 : i32, i32
  }
  func.func @transform_4(%arg0: i32, %arg1: i32, %arg2: i32) -> (i32, i32) {
    %c0_i32 = arith.constant 0 : i32
    return %arg0, %arg1 : i32, i32
  }
  func.func @transform_5(%arg0: i32, %arg1: i32, %arg2: i32) -> (i32, i32) {
    %c0_i32 = arith.constant 0 : i32
    return %arg0, %arg1 : i32, i32
  }
}

module attributes {stable_mosaic.version = 11 : i64} {
  func.func @_matmul_kernel(%arg0: i32, %arg1: i32, %arg2: i32, %arg3: memref<40x128xf32, #tpu.memory_space<vmem>>, %arg4: memref<128x64xbf16, #tpu.memory_space<vmem>>, %arg5: memref<1x64xf32, #tpu.memory_space<vmem>>, %arg6: memref<40x64xbf16, #tpu.memory_space<vmem>>, %arg7: memref<40x64xf32, #tpu.memory_space<vmem>>) attributes {dimension_semantics = [#tpu.dimension_semantics<parallel>, #tpu.dimension_semantics<parallel>, #tpu.dimension_semantics<arbitrary>], iteration_bounds = array<i64: 1, 1, 1>, scalar_prefetch = 0 : i64, scratch_operands = 1 : i64, tpu.core_type = #tpu.core_type<tc>, window_params = [{transform_indices = @transform_0, window_bounds = array<i64: 40, 128>}, {transform_indices = @transform_1, window_bounds = array<i64: 128, 64>}, {transform_indices = @transform_2, window_bounds = array<i64: 1, 64>}, {transform_indices = @transform_3, window_bounds = array<i64: 40, 64>}]} {
    %c0_i32 = arith.constant 0 : i32
    %0 = arith.cmpi eq, %arg2, %c0_i32 : i32
    %1 = arith.extui %0 : i1 to i32
    %c0_i32_0 = arith.constant 0 : i32
    %2 = arith.cmpi ne, %1, %c0_i32_0 : i32
    scf.if %2 {
      %cst_10 = arith.constant 0.000000e+00 : f32
      %13 = vector.broadcast %cst_10 : f32 to vector<40x64xf32>
      %c0_11 = arith.constant 0 : index
      %c0_12 = arith.constant 0 : index
      %14 = vector.load %arg7[%c0_11, %c0_12] : memref<40x64xf32, #tpu.memory_space<vmem>>, vector<40x64xf32>
      tpu.vector_store %arg7[%c0_11, %c0_12], %13 {strides = array<i32>} : memref<40x64xf32, #tpu.memory_space<vmem>>, vector<40x64xf32>,
    } else {
    }
    %c0 = arith.constant 0 : index
    %c0_1 = arith.constant 0 : index
    %3 = vector.load %arg7[%c0, %c0_1] : memref<40x64xf32, #tpu.memory_space<vmem>>, vector<40x64xf32>
    %c0_2 = arith.constant 0 : index
    %c0_3 = arith.constant 0 : index
    %4 = vector.load %arg3[%c0_2, %c0_3] : memref<40x128xf32, #tpu.memory_space<vmem>>, vector<40x128xf32>
    %5 = arith.truncf %4 : vector<40x128xf32> to vector<40x128xbf16>
    %c0_4 = arith.constant 0 : index
    %c0_5 = arith.constant 0 : index
    %6 = vector.load %arg4[%c0_4, %c0_5] : memref<128x64xbf16, #tpu.memory_space<vmem>>, vector<128x64xbf16>
    %cst = arith.constant dense<0.000000e+00> : vector<40x64xf32>
    %7 = tpu.matmul %5, %6, %cst {dimension_numbers = #tpu.dot_dimension_numbers<[1], [0], [0], [1], [0, 0, 1, 1], [], []>} : vector<40x128xbf16>, vector<128x64xbf16>, vector<40x64xf32> -> vector<40x64xf32>
    %8 = arith.addf %3, %7 : vector<40x64xf32>
    %c0_6 = arith.constant 0 : index
    %c0_7 = arith.constant 0 : index
    %9 = vector.load %arg7[%c0_6, %c0_7] : memref<40x64xf32, #tpu.memory_space<vmem>>, vector<40x64xf32>
    tpu.vector_store %arg7[%c0_6, %c0_7], %8 {strides = array<i32>} : memref<40x64xf32, #tpu.memory_space<vmem>>, vector<40x64xf32>,
    %c0_i32_8 = arith.constant 0 : i32
    %10 = arith.cmpi eq, %arg2, %c0_i32_8 : i32
    %11 = arith.extui %10 : i1 to i32
    %c0_i32_9 = arith.constant 0 : i32
    %12 = arith.cmpi ne, %11, %c0_i32_9 : i32
    scf.if %12 {
      %c0_10 = arith.constant 0 : index
      %c0_11 = arith.constant 0 : index
      %13 = vector.load %arg7[%c0_10, %c0_11] : memref<40x64xf32, #tpu.memory_space<vmem>>, vector<40x64xf32>
      %c0_12 = arith.constant 0 : index
      %c0_13 = arith.constant 0 : index
      %14 = vector.load %arg5[%c0_12, %c0_13] : memref<1x64xf32, #tpu.memory_space<vmem>>, vector<1x64xf32>
      %15 = vector.broadcast %14 : vector<1x64xf32> to vector<40x64xf32>
      %16 = arith.addf %13, %15 : vector<40x64xf32>
      %17 = arith.truncf %16 : vector<40x64xf32> to vector<40x64xbf16>
      %c0_14 = arith.constant 0 : index
      %c0_15 = arith.constant 0 : index
      %18 = vector.load %arg6[%c0_14, %c0_15] : memref<40x64xbf16, #tpu.memory_space<vmem>>, vector<40x64xbf16>
      tpu.vector_store %arg6[%c0_14, %c0_15], %17 {strides = array<i32>} : memref<40x64xbf16, #tpu.memory_space<vmem>>, vector<40x64xbf16>,
    } else {
    }
    return
  }
  func.func @transform_0(%arg0: i32, %arg1: i32, %arg2: i32) -> (i32, i32) {
    %c0_i32 = arith.constant 0 : i32
    return %arg0, %arg2 : i32, i32
  }
  func.func @transform_1(%arg0: i32, %arg1: i32, %arg2: i32) -> (i32, i32) {
    %c0_i32 = arith.constant 0 : i32
    return %arg2, %arg1 : i32, i32
  }
  func.func @transform_2(%arg0: i32, %arg1: i32, %arg2: i32) -> (i32, i32) {
    %c0_i32 = arith.constant 0 : i32
    %c0_i32_0 = arith.constant 0 : i32
    return %c0_i32, %arg1 : i32, i32
  }
  func.func @transform_3(%arg0: i32, %arg1: i32, %arg2: i32) -> (i32, i32) {
    %c0_i32 = arith.constant 0 : i32
    return %arg0, %arg1 : i32, i32
  }
}

module attributes {stable_mosaic.version = 11 : i64} {
  func.func @_layernorm_kernel(%arg0: i32, %arg1: memref<8x128xf32, #tpu.memory_space<vmem>>, %arg2: memref<1x128xf32, #tpu.memory_space<vmem>>, %arg3: memref<1x128xf32, #tpu.memory_space<vmem>>, %arg4: memref<8x128xf32, #tpu.memory_space<vmem>>) attributes {dimension_semantics = [#tpu.dimension_semantics<parallel>], iteration_bounds = array<i64: 1>, scalar_prefetch = 0 : i64, scratch_operands = 0 : i64, tpu.core_type = #tpu.core_type<tc>, window_params = [{transform_indices = @transform_0, window_bounds = array<i64: 8, 128>}, {pipeline_mode = #tpu.pipeline_mode<synchronous>, transform_indices = @transform_1, window_bounds = array<i64: 1, 128>}, {pipeline_mode = #tpu.pipeline_mode<synchronous>, transform_indices = @transform_2, window_bounds = array<i64: 1, 128>}, {transform_indices = @transform_3, window_bounds = array<i64: 8, 128>}]} {
    %c0 = arith.constant 0 : index
    %c0_0 = arith.constant 0 : index
    %0 = vector.load %arg1[%c0, %c0_0] : memref<8x128xf32, #tpu.memory_space<vmem>>, vector<8x128xf32>
    %c0_1 = arith.constant 0 : index
    %c0_2 = arith.constant 0 : index
    %1 = vector.load %arg2[%c0_1, %c0_2] : memref<1x128xf32, #tpu.memory_space<vmem>>, vector<1x128xf32>
    %c0_3 = arith.constant 0 : index
    %c0_4 = arith.constant 0 : index
    %2 = vector.load %arg3[%c0_3, %c0_4] : memref<1x128xf32, #tpu.memory_space<vmem>>, vector<1x128xf32>
    %cst = arith.constant dense<0.000000e+00> : vector<8xf32>
    %3 = vector.multi_reduction <add>, %0, %cst [1] : vector<8x128xf32> to vector<8xf32>
    %4 = vector.shape_cast %3 : vector<8xf32> to vector<8x1xf32>
    %cst_5 = arith.constant 3.125000e-02 : f32
    %5 = vector.broadcast %cst_5 : f32 to vector<8x1xf32>
    %6 = arith.mulf %4, %5 : vector<8x1xf32>
    %7 = tpu.iota {dimensions = array<i32: 1>} : vector<8x128xi32>
    %c32_i32 = arith.constant 32 : i32
    %8 = vector.broadcast %c32_i32 : i32 to vector<8x128xi32>
    %9 = arith.cmpi slt, %7, %8 : vector<8x128xi32>
    %10 = vector.broadcast %6 : vector<8x1xf32> to vector<8x128xf32>
    %11 = arith.subf %0, %10 : vector<8x128xf32>
    %cst_6 = arith.constant 0.000000e+00 : f32
    %12 = vector.broadcast %cst_6 : f32 to vector<8x128xf32>
    %13 = arith.select %9, %11, %12 : vector<8x128xi1>, vector<8x128xf32>
    %14 = arith.mulf %13, %13 : vector<8x128xf32>
    %cst_7 = arith.constant dense<0.000000e+00> : vector<8xf32>
    %15 = vector.multi_reduction <add>, %14, %cst_7 [1] : vector<8x128xf32> to vector<8xf32>
    %16 = vector.shape_cast %15 : vector<8xf32> to vector<8x1xf32>
    %cst_8 = arith.constant 3.125000e-02 : f32
    %17 = vector.broadcast %cst_8 : f32 to vector<8x1xf32>
    %18 = arith.mulf %16, %17 : vector<8x1xf32>
    %cst_9 = arith.constant 9.99999974E-6 : f32
    %19 = vector.broadcast %cst_9 : f32 to vector<8x1xf32>
    %20 = arith.addf %18, %19 : vector<8x1xf32>
    %21 = math.rsqrt %20 : vector<8x1xf32>
    %22 = vector.broadcast %21 : vector<8x1xf32> to vector<8x128xf32>
    %23 = arith.mulf %13, %22 : vector<8x128xf32>
    %24 = vector.broadcast %1 : vector<1x128xf32> to vector<8x128xf32>
    %25 = arith.mulf %23, %24 : vector<8x128xf32>
    %26 = vector.broadcast %2 : vector<1x128xf32> to vector<8x128xf32>
    %27 = arith.addf %25, %26 : vector<8x128xf32>
    %c0_10 = arith.constant 0 : index
    %c0_11 = arith.constant 0 : index
    %28 = vector.load %arg4[%c0_10, %c0_11] : memref<8x128xf32, #tpu.memory_space<vmem>>, vector<8x128xf32>
    tpu.vector_store %arg4[%c0_10, %c0_11], %27 {strides = array<i32>} : memref<8x128xf32, #tpu.memory_space<vmem>>, vector<8x128xf32>,
    return
  }
  func.func @transform_0(%arg0: i32) -> (i32, i32) {
    %c0_i32 = arith.constant 0 : i32
    %c0_i32_0 = arith.constant 0 : i32
    return %arg0, %c0_i32 : i32, i32
  }
  func.func @transform_1(%arg0: i32) -> (i32, i32) {
    %c0_i32 = arith.constant 0 : i32
    %c0_i32_0 = arith.constant 0 : i32
    %c0_i32_1 = arith.constant 0 : i32
    return %c0_i32, %c0_i32_0 : i32, i32
  }
  func.func @transform_2(%arg0: i32) -> (i32, i32) {
    %c0_i32 = arith.constant 0 : i32
    %c0_i32_0 = arith.constant 0 : i32
    %c0_i32_1 = arith.constant 0 : i32
    return %c0_i32, %c0_i32_0 : i32, i32
  }
  func.func @transform_3(%arg0: i32) -> (i32, i32) {
    %c0_i32 = arith.constant 0 : i32
    %c0_i32_0 = arith.constant 0 : i32
    return %arg0, %c0_i32 : i32, i32
  }
}

module attributes {stable_mosaic.version = 11 : i64} {
  func.func @_matmul_kernel(%arg0: i32, %arg1: i32, %arg2: i32, %arg3: memref<8x128xf32, #tpu.memory_space<vmem>>, %arg4: memref<128x32xbf16, #tpu.memory_space<vmem>>, %arg5: memref<1x32xf32, #tpu.memory_space<vmem>>, %arg6: memref<8x32xbf16, #tpu.memory_space<vmem>>, %arg7: memref<8x32xf32, #tpu.memory_space<vmem>>) attributes {dimension_semantics = [#tpu.dimension_semantics<parallel>, #tpu.dimension_semantics<parallel>, #tpu.dimension_semantics<arbitrary>], iteration_bounds = array<i64: 1, 1, 1>, scalar_prefetch = 0 : i64, scratch_operands = 1 : i64, tpu.core_type = #tpu.core_type<tc>, window_params = [{transform_indices = @transform_0, window_bounds = array<i64: 8, 128>}, {transform_indices = @transform_1, window_bounds = array<i64: 128, 32>}, {transform_indices = @transform_2, window_bounds = array<i64: 1, 32>}, {transform_indices = @transform_3, window_bounds = array<i64: 8, 32>}]} {
    %c0_i32 = arith.constant 0 : i32
    %0 = arith.cmpi eq, %arg2, %c0_i32 : i32
    %1 = arith.extui %0 : i1 to i32
    %c0_i32_0 = arith.constant 0 : i32
    %2 = arith.cmpi ne, %1, %c0_i32_0 : i32
    scf.if %2 {
      %cst_10 = arith.constant 0.000000e+00 : f32
      %13 = vector.broadcast %cst_10 : f32 to vector<8x32xf32>
      %c0_11 = arith.constant 0 : index
      %c0_12 = arith.constant 0 : index
      %14 = vector.load %arg7[%c0_11, %c0_12] : memref<8x32xf32, #tpu.memory_space<vmem>>, vector<8x32xf32>
      tpu.vector_store %arg7[%c0_11, %c0_12], %13 {strides = array<i32>} : memref<8x32xf32, #tpu.memory_space<vmem>>, vector<8x32xf32>,
    } else {
    }
    %c0 = arith.constant 0 : index
    %c0_1 = arith.constant 0 : index
    %3 = vector.load %arg7[%c0, %c0_1] : memref<8x32xf32, #tpu.memory_space<vmem>>, vector<8x32xf32>
    %c0_2 = arith.constant 0 : index
    %c0_3 = arith.constant 0 : index
    %4 = vector.load %arg3[%c0_2, %c0_3] : memref<8x128xf32, #tpu.memory_space<vmem>>, vector<8x128xf32>
    %5 = arith.truncf %4 : vector<8x128xf32> to vector<8x128xbf16>
    %c0_4 = arith.constant 0 : index
    %c0_5 = arith.constant 0 : index
    %6 = vector.load %arg4[%c0_4, %c0_5] : memref<128x32xbf16, #tpu.memory_space<vmem>>, vector<128x32xbf16>
    %cst = arith.constant dense<0.000000e+00> : vector<8x32xf32>
    %7 = tpu.matmul %5, %6, %cst {dimension_numbers = #tpu.dot_dimension_numbers<[1], [0], [0], [1], [0, 0, 1, 1], [], []>} : vector<8x128xbf16>, vector<128x32xbf16>, vector<8x32xf32> -> vector<8x32xf32>
    %8 = arith.addf %3, %7 : vector<8x32xf32>
    %c0_6 = arith.constant 0 : index
    %c0_7 = arith.constant 0 : index
    %9 = vector.load %arg7[%c0_6, %c0_7] : memref<8x32xf32, #tpu.memory_space<vmem>>, vector<8x32xf32>
    tpu.vector_store %arg7[%c0_6, %c0_7], %8 {strides = array<i32>} : memref<8x32xf32, #tpu.memory_space<vmem>>, vector<8x32xf32>,
    %c0_i32_8 = arith.constant 0 : i32
    %10 = arith.cmpi eq, %arg2, %c0_i32_8 : i32
    %11 = arith.extui %10 : i1 to i32
    %c0_i32_9 = arith.constant 0 : i32
    %12 = arith.cmpi ne, %11, %c0_i32_9 : i32
    scf.if %12 {
      %c0_10 = arith.constant 0 : index
      %c0_11 = arith.constant 0 : index
      %13 = vector.load %arg7[%c0_10, %c0_11] : memref<8x32xf32, #tpu.memory_space<vmem>>, vector<8x32xf32>
      %c0_12 = arith.constant 0 : index
      %c0_13 = arith.constant 0 : index
      %14 = vector.load %arg5[%c0_12, %c0_13] : memref<1x32xf32, #tpu.memory_space<vmem>>, vector<1x32xf32>
      %15 = vector.broadcast %14 : vector<1x32xf32> to vector<8x32xf32>
      %16 = arith.addf %13, %15 : vector<8x32xf32>
      %17 = arith.truncf %16 : vector<8x32xf32> to vector<8x32xbf16>
      %c0_14 = arith.constant 0 : index
      %c0_15 = arith.constant 0 : index
      %18 = vector.load %arg6[%c0_14, %c0_15] : memref<8x32xbf16, #tpu.memory_space<vmem>>, vector<8x32xbf16>
      tpu.vector_store %arg6[%c0_14, %c0_15], %17 {strides = array<i32>} : memref<8x32xbf16, #tpu.memory_space<vmem>>, vector<8x32xbf16>,
    } else {
    }
    return
  }
  func.func @transform_0(%arg0: i32, %arg1: i32, %arg2: i32) -> (i32, i32) {
    %c0_i32 = arith.constant 0 : i32
    return %arg0, %arg2 : i32, i32
  }
  func.func @transform_1(%arg0: i32, %arg1: i32, %arg2: i32) -> (i32, i32) {
    %c0_i32 = arith.constant 0 : i32
    return %arg2, %arg1 : i32, i32
  }
  func.func @transform_2(%arg0: i32, %arg1: i32, %arg2: i32) -> (i32, i32) {
    %c0_i32 = arith.constant 0 : i32
    %c0_i32_0 = arith.constant 0 : i32
    return %c0_i32, %arg1 : i32, i32
  }
  func.func @transform_3(%arg0: i32, %arg1: i32, %arg2: i32) -> (i32, i32) {
    %c0_i32 = arith.constant 0 : i32
    return %arg0, %arg1 : i32, i32
  }
}

module attributes {stable_mosaic.version = 11 : i64} {
  func.func @_attention_kernel(%arg0: i32, %arg1: i32, %arg2: memref<4x4xf32, #tpu.memory_space<smem>>, %arg3: memref<4x4xf32, #tpu.memory_space<smem>>, %arg4: memref<1x4x1x8xbf16, #tpu.memory_space<vmem>>, %arg5: memref<1x4x17x8xbf16, #tpu.memory_space<vmem>>, %arg6: memref<1x4x17x8xbf16, #tpu.memory_space<vmem>>, %arg7: memref<1x4x1x8xbf16, #tpu.memory_space<vmem>>) attributes {dimension_semantics = [#tpu.dimension_semantics<parallel>, #tpu.dimension_semantics<parallel>], iteration_bounds = array<i64: 2, 1>, scalar_prefetch = 0 : i64, scratch_operands = 0 : i64, tpu.core_type = #tpu.core_type<tc>, window_params = [{transform_indices = @transform_0, window_bounds = array<i64: 4, 4>}, {transform_indices = @transform_1, window_bounds = array<i64: 4, 4>}, {transform_indices = @transform_2, window_bounds = array<i64: 1, 4, 1, 8>}, {transform_indices = @transform_3, window_bounds = array<i64: 1, 4, 17, 8>}, {transform_indices = @transform_4, window_bounds = array<i64: 1, 4, 17, 8>}, {transform_indices = @transform_5, window_bounds = array<i64: 1, 4, 1, 8>}]} {
    %c0 = arith.constant 0 : index
    %c0_0 = arith.constant 0 : index
    %c0_1 = arith.constant 0 : index
    %c0_2 = arith.constant 0 : index
    %0 = vector.load %arg4[%c0, %c0_0, %c0_1, %c0_2] : memref<1x4x1x8xbf16, #tpu.memory_space<vmem>>, vector<1x4x1x8xbf16>
    %1 = vector.shape_cast %0 : vector<1x4x1x8xbf16> to vector<4x1x8xbf16>
    %c0_3 = arith.constant 0 : index
    %c0_4 = arith.constant 0 : index
    %c0_5 = arith.constant 0 : index
    %c0_6 = arith.constant 0 : index
    %2 = vector.load %arg5[%c0_3, %c0_4, %c0_5, %c0_6] : memref<1x4x17x8xbf16, #tpu.memory_space<vmem>>, vector<1x4x17x8xbf16>
    %3 = vector.shape_cast %2 : vector<1x4x17x8xbf16> to vector<4x17x8xbf16>
    %c0_7 = arith.constant 0 : index
    %c0_8 = arith.constant 0 : index
    %c0_9 = arith.constant 0 : index
    %c0_10 = arith.constant 0 : index
    %4 = vector.load %arg6[%c0_7, %c0_8, %c0_9, %c0_10] : memref<1x4x17x8xbf16, #tpu.memory_space<vmem>>, vector<1x4x17x8xbf16>
    %5 = vector.shape_cast %4 : vector<1x4x17x8xbf16> to vector<4x17x8xbf16>
    %cst = arith.constant dense<0.000000e+00> : vector<4x1x17xf32>
    %6 = tpu.matmul %1, %3, %cst {dimension_numbers = #tpu.dot_dimension_numbers<[2], [2], [1], [1], [0, 0, 0, 1, 1, 1], [0], [0]>} : vector<4x1x8xbf16>, vector<4x17x8xbf16>, vector<4x1x17xf32> -> vector<4x1x17xf32>
    %cst_11 = arith.constant 0.353553385 : f32
    %7 = vector.broadcast %cst_11 : f32 to vector<4x1x17xf32>
    %8 = arith.mulf %6, %7 : vector<4x1x17xf32>
    %c0_12 = arith.constant 0 : index
    %c0_13 = arith.constant 0 : index
    %9 = memref.load %arg2[%c0_12, %c0_13] : memref<4x4xf32, #tpu.memory_space<smem>>
    %10 = vector.extract_strided_slice %8 {offsets = [0, 0, 0], sizes = [1, 1, 17], strides = [1, 1, 1]} : vector<4x1x17xf32> to vector<1x1x17xf32>
    %11 = vector.shape_cast %10 : vector<1x1x17xf32> to vector<1x17xf32>
    %12 = vector.broadcast %9 : f32 to vector<1x17xf32>
    %13 = arith.mulf %12, %11 : vector<1x17xf32>
    %cst_14 = arith.constant 0.000000e+00 : f32
    %14 = vector.broadcast %cst_14 : f32 to vector<1x17xf32>
    %15 = arith.addf %14, %13 : vector<1x17xf32>
    %c1 = arith.constant 1 : index
    %c0_15 = arith.constant 0 : index
    %16 = memref.load %arg2[%c1, %c0_15] : memref<4x4xf32, #tpu.memory_space<smem>>
    %17 = vector.extract_strided_slice %8 {offsets = [1, 0, 0], sizes = [1, 1, 17], strides = [1, 1, 1]} : vector<4x1x17xf32> to vector<1x1x17xf32>
    %18 = vector.shape_cast %17 : vector<1x1x17xf32> to vector<1x17xf32>
    %19 = vector.broadcast %16 : f32 to vector<1x17xf32>
    %20 = arith.mulf %19, %18 : vector<1x17xf32>
    %21 = arith.addf %15, %20 : vector<1x17xf32>
    %c2 = arith.constant 2 : index
    %c0_16 = arith.constant 0 : index
    %22 = memref.load %arg2[%c2, %c0_16] : memref<4x4xf32, #tpu.memory_space<smem>>
    %23 = vector.extract_strided_slice %8 {offsets = [2, 0, 0], sizes = [1, 1, 17], strides = [1, 1, 1]} : vector<4x1x17xf32> to vector<1x1x17xf32>
    %24 = vector.shape_cast %23 : vector<1x1x17xf32> to vector<1x17xf32>
    %25 = vector.broadcast %22 : f32 to vector<1x17xf32>
    %26 = arith.mulf %25, %24 : vector<1x17xf32>
    %27 = arith.addf %21, %26 : vector<1x17xf32>
    %c3 = arith.constant 3 : index
    %c0_17 = arith.constant 0 : index
    %28 = memref.load %arg2[%c3, %c0_17] : memref<4x4xf32, #tpu.memory_space<smem>>
    %29 = vector.extract_strided_slice %8 {offsets = [3, 0, 0], sizes = [1, 1, 17], strides = [1, 1, 1]} : vector<4x1x17xf32> to vector<1x1x17xf32>
    %30 = vector.shape_cast %29 : vector<1x1x17xf32> to vector<1x17xf32>
    %31 = vector.broadcast %28 : f32 to vector<1x17xf32>
    %32 = arith.mulf %31, %30 : vector<1x17xf32>
    %33 = arith.addf %27, %32 : vector<1x17xf32>
    %c0_18 = arith.constant 0 : index
    %c1_19 = arith.constant 1 : index
    %34 = memref.load %arg2[%c0_18, %c1_19] : memref<4x4xf32, #tpu.memory_space<smem>>
    %35 = vector.extract_strided_slice %8 {offsets = [0, 0, 0], sizes = [1, 1, 17], strides = [1, 1, 1]} : vector<4x1x17xf32> to vector<1x1x17xf32>
    %36 = vector.shape_cast %35 : vector<1x1x17xf32> to vector<1x17xf32>
    %37 = vector.broadcast %34 : f32 to vector<1x17xf32>
    %38 = arith.mulf %37, %36 : vector<1x17xf32>
    %cst_20 = arith.constant 0.000000e+00 : f32
    %39 = vector.broadcast %cst_20 : f32 to vector<1x17xf32>
    %40 = arith.addf %39, %38 : vector<1x17xf32>
    %c1_21 = arith.constant 1 : index
    %c1_22 = arith.constant 1 : index
    %41 = memref.load %arg2[%c1_21, %c1_22] : memref<4x4xf32, #tpu.memory_space<smem>>
    %42 = vector.extract_strided_slice %8 {offsets = [1, 0, 0], sizes = [1, 1, 17], strides = [1, 1, 1]} : vector<4x1x17xf32> to vector<1x1x17xf32>
    %43 = vector.shape_cast %42 : vector<1x1x17xf32> to vector<1x17xf32>
    %44 = vector.broadcast %41 : f32 to vector<1x17xf32>
    %45 = arith.mulf %44, %43 : vector<1x17xf32>
    %46 = arith.addf %40, %45 : vector<1x17xf32>
    %c2_23 = arith.constant 2 : index
    %c1_24 = arith.constant 1 : index
    %47 = memref.load %arg2[%c2_23, %c1_24] : memref<4x4xf32, #tpu.memory_space<smem>>
    %48 = vector.extract_strided_slice %8 {offsets = [2, 0, 0], sizes = [1, 1, 17], strides = [1, 1, 1]} : vector<4x1x17xf32> to vector<1x1x17xf32>
    %49 = vector.shape_cast %48 : vector<1x1x17xf32> to vector<1x17xf32>
    %50 = vector.broadcast %47 : f32 to vector<1x17xf32>
    %51 = arith.mulf %50, %49 : vector<1x17xf32>
    %52 = arith.addf %46, %51 : vector<1x17xf32>
    %c3_25 = arith.constant 3 : index
    %c1_26 = arith.constant 1 : index
    %53 = memref.load %arg2[%c3_25, %c1_26] : memref<4x4xf32, #tpu.memory_space<smem>>
    %54 = vector.extract_strided_slice %8 {offsets = [3, 0, 0], sizes = [1, 1, 17], strides = [1, 1, 1]} : vector<4x1x17xf32> to vector<1x1x17xf32>
    %55 = vector.shape_cast %54 : vector<1x1x17xf32> to vector<1x17xf32>
    %56 = vector.broadcast %53 : f32 to vector<1x17xf32>
    %57 = arith.mulf %56, %55 : vector<1x17xf32>
    %58 = arith.addf %52, %57 : vector<1x17xf32>
    %c0_27 = arith.constant 0 : index
    %c2_28 = arith.constant 2 : index
    %59 = memref.load %arg2[%c0_27, %c2_28] : memref<4x4xf32, #tpu.memory_space<smem>>
    %60 = vector.extract_strided_slice %8 {offsets = [0, 0, 0], sizes = [1, 1, 17], strides = [1, 1, 1]} : vector<4x1x17xf32> to vector<1x1x17xf32>
    %61 = vector.shape_cast %60 : vector<1x1x17xf32> to vector<1x17xf32>
    %62 = vector.broadcast %59 : f32 to vector<1x17xf32>
    %63 = arith.mulf %62, %61 : vector<1x17xf32>
    %cst_29 = arith.constant 0.000000e+00 : f32
    %64 = vector.broadcast %cst_29 : f32 to vector<1x17xf32>
    %65 = arith.addf %64, %63 : vector<1x17xf32>
    %c1_30 = arith.constant 1 : index
    %c2_31 = arith.constant 2 : index
    %66 = memref.load %arg2[%c1_30, %c2_31] : memref<4x4xf32, #tpu.memory_space<smem>>
    %67 = vector.extract_strided_slice %8 {offsets = [1, 0, 0], sizes = [1, 1, 17], strides = [1, 1, 1]} : vector<4x1x17xf32> to vector<1x1x17xf32>
    %68 = vector.shape_cast %67 : vector<1x1x17xf32> to vector<1x17xf32>
    %69 = vector.broadcast %66 : f32 to vector<1x17xf32>
    %70 = arith.mulf %69, %68 : vector<1x17xf32>
    %71 = arith.addf %65, %70 : vector<1x17xf32>
    %c2_32 = arith.constant 2 : index
    %c2_33 = arith.constant 2 : index
    %72 = memref.load %arg2[%c2_32, %c2_33] : memref<4x4xf32, #tpu.memory_space<smem>>
    %73 = vector.extract_strided_slice %8 {offsets = [2, 0, 0], sizes = [1, 1, 17], strides = [1, 1, 1]} : vector<4x1x17xf32> to vector<1x1x17xf32>
    %74 = vector.shape_cast %73 : vector<1x1x17xf32> to vector<1x17xf32>
    %75 = vector.broadcast %72 : f32 to vector<1x17xf32>
    %76 = arith.mulf %75, %74 : vector<1x17xf32>
    %77 = arith.addf %71, %76 : vector<1x17xf32>
    %c3_34 = arith.constant 3 : index
    %c2_35 = arith.constant 2 : index
    %78 = memref.load %arg2[%c3_34, %c2_35] : memref<4x4xf32, #tpu.memory_space<smem>>
    %79 = vector.extract_strided_slice %8 {offsets = [3, 0, 0], sizes = [1, 1, 17], strides = [1, 1, 1]} : vector<4x1x17xf32> to vector<1x1x17xf32>
    %80 = vector.shape_cast %79 : vector<1x1x17xf32> to vector<1x17xf32>
    %81 = vector.broadcast %78 : f32 to vector<1x17xf32>
    %82 = arith.mulf %81, %80 : vector<1x17xf32>
    %83 = arith.addf %77, %82 : vector<1x17xf32>
    %c0_36 = arith.constant 0 : index
    %c3_37 = arith.constant 3 : index
    %84 = memref.load %arg2[%c0_36, %c3_37] : memref<4x4xf32, #tpu.memory_space<smem>>
    %85 = vector.extract_strided_slice %8 {offsets = [0, 0, 0], sizes = [1, 1, 17], strides = [1, 1, 1]} : vector<4x1x17xf32> to vector<1x1x17xf32>
    %86 = vector.shape_cast %85 : vector<1x1x17xf32> to vector<1x17xf32>
    %87 = vector.broadcast %84 : f32 to vector<1x17xf32>
    %88 = arith.mulf %87, %86 : vector<1x17xf32>
    %cst_38 = arith.constant 0.000000e+00 : f32
    %89 = vector.broadcast %cst_38 : f32 to vector<1x17xf32>
    %90 = arith.addf %89, %88 : vector<1x17xf32>
    %c1_39 = arith.constant 1 : index
    %c3_40 = arith.constant 3 : index
    %91 = memref.load %arg2[%c1_39, %c3_40] : memref<4x4xf32, #tpu.memory_space<smem>>
    %92 = vector.extract_strided_slice %8 {offsets = [1, 0, 0], sizes = [1, 1, 17], strides = [1, 1, 1]} : vector<4x1x17xf32> to vector<1x1x17xf32>
    %93 = vector.shape_cast %92 : vector<1x1x17xf32> to vector<1x17xf32>
    %94 = vector.broadcast %91 : f32 to vector<1x17xf32>
    %95 = arith.mulf %94, %93 : vector<1x17xf32>
    %96 = arith.addf %90, %95 : vector<1x17xf32>
    %c2_41 = arith.constant 2 : index
    %c3_42 = arith.constant 3 : index
    %97 = memref.load %arg2[%c2_41, %c3_42] : memref<4x4xf32, #tpu.memory_space<smem>>
    %98 = vector.extract_strided_slice %8 {offsets = [2, 0, 0], sizes = [1, 1, 17], strides = [1, 1, 1]} : vector<4x1x17xf32> to vector<1x1x17xf32>
    %99 = vector.shape_cast %98 : vector<1x1x17xf32> to vector<1x17xf32>
    %100 = vector.broadcast %97 : f32 to vector<1x17xf32>
    %101 = arith.mulf %100, %99 : vector<1x17xf32>
    %102 = arith.addf %96, %101 : vector<1x17xf32>
    %c3_43 = arith.constant 3 : index
    %c3_44 = arith.constant 3 : index
    %103 = memref.load %arg2[%c3_43, %c3_44] : memref<4x4xf32, #tpu.memory_space<smem>>
    %104 = vector.extract_strided_slice %8 {offsets = [3, 0, 0], sizes = [1, 1, 17], strides = [1, 1, 1]} : vector<4x1x17xf32> to vector<1x1x17xf32>
    %105 = vector.shape_cast %104 : vector<1x1x17xf32> to vector<1x17xf32>
    %106 = vector.broadcast %103 : f32 to vector<1x17xf32>
    %107 = arith.mulf %106, %105 : vector<1x17xf32>
    %108 = arith.addf %102, %107 : vector<1x17xf32>
    %109 = vector.shape_cast %33 : vector<1x17xf32> to vector<1x1x17xf32>
    %110 = vector.shape_cast %58 : vector<1x17xf32> to vector<1x1x17xf32>
    %111 = vector.shape_cast %83 : vector<1x17xf32> to vector<1x1x17xf32>
    %112 = vector.shape_cast %108 : vector<1x17xf32> to vector<1x1x17xf32>
    %113 = tpu.concatenate %109, %110, %111, %112 in 0 : vector<1x1x17xf32>, vector<1x1x17xf32>, vector<1x1x17xf32>, vector<1x1x17xf32> -> vector<4x1x17xf32>
    %cst_45 = arith.constant dense<0xFF800000> : vector<4x1xf32>
    %114 = vector.multi_reduction <maximumf>, %113, %cst_45 [2] : vector<4x1x17xf32> to vector<4x1xf32>
    %115 = vector.shape_cast %114 : vector<4x1xf32> to vector<4x1x1xf32>
    %116 = vector.broadcast %115 : vector<4x1x1xf32> to vector<4x1x17xf32>
    %117 = arith.subf %113, %116 : vector<4x1x17xf32>
    %118 = math.exp %117 : vector<4x1x17xf32>
    %cst_46 = arith.constant dense<0.000000e+00> : vector<4x1xf32>
    %119 = vector.multi_reduction <add>, %118, %cst_46 [2] : vector<4x1x17xf32> to vector<4x1xf32>
    %120 = vector.shape_cast %119 : vector<4x1xf32> to vector<4x1x1xf32>
    %121 = tpu.reciprocal %120 {approx = true} : vector<4x1x1xf32> -> vector<4x1x1xf32>
    %122 = vector.broadcast %121 : vector<4x1x1xf32> to vector<4x1x17xf32>
    %123 = arith.mulf %118, %122 : vector<4x1x17xf32>
    %c0_47 = arith.constant 0 : index
    %c0_48 = arith.constant 0 : index
    %124 = memref.load %arg3[%c0_47, %c0_48] : memref<4x4xf32, #tpu.memory_space<smem>>
    %125 = vector.extract_strided_slice %123 {offsets = [0, 0, 0], sizes = [1, 1, 17], strides = [1, 1, 1]} : vector<4x1x17xf32> to vector<1x1x17xf32>
    %126 = vector.shape_cast %125 : vector<1x1x17xf32> to vector<1x17xf32>
    %127 = vector.broadcast %124 : f32 to vector<1x17xf32>
    %128 = arith.mulf %127, %126 : vector<1x17xf32>
    %cst_49 = arith.constant 0.000000e+00 : f32
    %129 = vector.broadcast %cst_49 : f32 to vector<1x17xf32>
    %130 = arith.addf %129, %128 : vector<1x17xf32>
    %c1_50 = arith.constant 1 : index
    %c0_51 = arith.constant 0 : index
    %131 = memref.load %arg3[%c1_50, %c0_51] : memref<4x4xf32, #tpu.memory_space<smem>>
    %132 = vector.extract_strided_slice %123 {offsets = [1, 0, 0], sizes = [1, 1, 17], strides = [1, 1, 1]} : vector<4x1x17xf32> to vector<1x1x17xf32>
    %133 = vector.shape_cast %132 : vector<1x1x17xf32> to vector<1x17xf32>
    %134 = vector.broadcast %131 : f32 to vector<1x17xf32>
    %135 = arith.mulf %134, %133 : vector<1x17xf32>
    %136 = arith.addf %130, %135 : vector<1x17xf32>
    %c2_52 = arith.constant 2 : index
    %c0_53 = arith.constant 0 : index
    %137 = memref.load %arg3[%c2_52, %c0_53] : memref<4x4xf32, #tpu.memory_space<smem>>
    %138 = vector.extract_strided_slice %123 {offsets = [2, 0, 0], sizes = [1, 1, 17], strides = [1, 1, 1]} : vector<4x1x17xf32> to vector<1x1x17xf32>
    %139 = vector.shape_cast %138 : vector<1x1x17xf32> to vector<1x17xf32>
    %140 = vector.broadcast %137 : f32 to vector<1x17xf32>
    %141 = arith.mulf %140, %139 : vector<1x17xf32>
    %142 = arith.addf %136, %141 : vector<1x17xf32>
    %c3_54 = arith.constant 3 : index
    %c0_55 = arith.constant 0 : index
    %143 = memref.load %arg3[%c3_54, %c0_55] : memref<4x4xf32, #tpu.memory_space<smem>>
    %144 = vector.extract_strided_slice %123 {offsets = [3, 0, 0], sizes = [1, 1, 17], strides = [1, 1, 1]} : vector<4x1x17xf32> to vector<1x1x17xf32>
    %145 = vector.shape_cast %144 : vector<1x1x17xf32> to vector<1x17xf32>
    %146 = vector.broadcast %143 : f32 to vector<1x17xf32>
    %147 = arith.mulf %146, %145 : vector<1x17xf32>
    %148 = arith.addf %142, %147 : vector<1x17xf32>
    %c0_56 = arith.constant 0 : index
    %c1_57 = arith.constant 1 : index
    %149 = memref.load %arg3[%c0_56, %c1_57] : memref<4x4xf32, #tpu.memory_space<smem>>
    %150 = vector.extract_strided_slice %123 {offsets = [0, 0, 0], sizes = [1, 1, 17], strides = [1, 1, 1]} : vector<4x1x17xf32> to vector<1x1x17xf32>
    %151 = vector.shape_cast %150 : vector<1x1x17xf32> to vector<1x17xf32>
    %152 = vector.broadcast %149 : f32 to vector<1x17xf32>
    %153 = arith.mulf %152, %151 : vector<1x17xf32>
    %cst_58 = arith.constant 0.000000e+00 : f32
    %154 = vector.broadcast %cst_58 : f32 to vector<1x17xf32>
    %155 = arith.addf %154, %153 : vector<1x17xf32>
    %c1_59 = arith.constant 1 : index
    %c1_60 = arith.constant 1 : index
    %156 = memref.load %arg3[%c1_59, %c1_60] : memref<4x4xf32, #tpu.memory_space<smem>>
    %157 = vector.extract_strided_slice %123 {offsets = [1, 0, 0], sizes = [1, 1, 17], strides = [1, 1, 1]} : vector<4x1x17xf32> to vector<1x1x17xf32>
    %158 = vector.shape_cast %157 : vector<1x1x17xf32> to vector<1x17xf32>
    %159 = vector.broadcast %156 : f32 to vector<1x17xf32>
    %160 = arith.mulf %159, %158 : vector<1x17xf32>
    %161 = arith.addf %155, %160 : vector<1x17xf32>
    %c2_61 = arith.constant 2 : index
    %c1_62 = arith.constant 1 : index
    %162 = memref.load %arg3[%c2_61, %c1_62] : memref<4x4xf32, #tpu.memory_space<smem>>
    %163 = vector.extract_strided_slice %123 {offsets = [2, 0, 0], sizes = [1, 1, 17], strides = [1, 1, 1]} : vector<4x1x17xf32> to vector<1x1x17xf32>
    %164 = vector.shape_cast %163 : vector<1x1x17xf32> to vector<1x17xf32>
    %165 = vector.broadcast %162 : f32 to vector<1x17xf32>
    %166 = arith.mulf %165, %164 : vector<1x17xf32>
    %167 = arith.addf %161, %166 : vector<1x17xf32>
    %c3_63 = arith.constant 3 : index
    %c1_64 = arith.constant 1 : index
    %168 = memref.load %arg3[%c3_63, %c1_64] : memref<4x4xf32, #tpu.memory_space<smem>>
    %169 = vector.extract_strided_slice %123 {offsets = [3, 0, 0], sizes = [1, 1, 17], strides = [1, 1, 1]} : vector<4x1x17xf32> to vector<1x1x17xf32>
    %170 = vector.shape_cast %169 : vector<1x1x17xf32> to vector<1x17xf32>
    %171 = vector.broadcast %168 : f32 to vector<1x17xf32>
    %172 = arith.mulf %171, %170 : vector<1x17xf32>
    %173 = arith.addf %167, %172 : vector<1x17xf32>
    %c0_65 = arith.constant 0 : index
    %c2_66 = arith.constant 2 : index
    %174 = memref.load %arg3[%c0_65, %c2_66] : memref<4x4xf32, #tpu.memory_space<smem>>
    %175 = vector.extract_strided_slice %123 {offsets = [0, 0, 0], sizes = [1, 1, 17], strides = [1, 1, 1]} : vector<4x1x17xf32> to vector<1x1x17xf32>
    %176 = vector.shape_cast %175 : vector<1x1x17xf32> to vector<1x17xf32>
    %177 = vector.broadcast %174 : f32 to vector<1x17xf32>
    %178 = arith.mulf %177, %176 : vector<1x17xf32>
    %cst_67 = arith.constant 0.000000e+00 : f32
    %179 = vector.broadcast %cst_67 : f32 to vector<1x17xf32>
    %180 = arith.addf %179, %178 : vector<1x17xf32>
    %c1_68 = arith.constant 1 : index
    %c2_69 = arith.constant 2 : index
    %181 = memref.load %arg3[%c1_68, %c2_69] : memref<4x4xf32, #tpu.memory_space<smem>>
    %182 = vector.extract_strided_slice %123 {offsets = [1, 0, 0], sizes = [1, 1, 17], strides = [1, 1, 1]} : vector<4x1x17xf32> to vector<1x1x17xf32>
    %183 = vector.shape_cast %182 : vector<1x1x17xf32> to vector<1x17xf32>
    %184 = vector.broadcast %181 : f32 to vector<1x17xf32>
    %185 = arith.mulf %184, %183 : vector<1x17xf32>
    %186 = arith.addf %180, %185 : vector<1x17xf32>
    %c2_70 = arith.constant 2 : index
    %c2_71 = arith.constant 2 : index
    %187 = memref.load %arg3[%c2_70, %c2_71] : memref<4x4xf32, #tpu.memory_space<smem>>
    %188 = vector.extract_strided_slice %123 {offsets = [2, 0, 0], sizes = [1, 1, 17], strides = [1, 1, 1]} : vector<4x1x17xf32> to vector<1x1x17xf32>
    %189 = vector.shape_cast %188 : vector<1x1x17xf32> to vector<1x17xf32>
    %190 = vector.broadcast %187 : f32 to vector<1x17xf32>
    %191 = arith.mulf %190, %189 : vector<1x17xf32>
    %192 = arith.addf %186, %191 : vector<1x17xf32>
    %c3_72 = arith.constant 3 : index
    %c2_73 = arith.constant 2 : index
    %193 = memref.load %arg3[%c3_72, %c2_73] : memref<4x4xf32, #tpu.memory_space<smem>>
    %194 = vector.extract_strided_slice %123 {offsets = [3, 0, 0], sizes = [1, 1, 17], strides = [1, 1, 1]} : vector<4x1x17xf32> to vector<1x1x17xf32>
    %195 = vector.shape_cast %194 : vector<1x1x17xf32> to vector<1x17xf32>
    %196 = vector.broadcast %193 : f32 to vector<1x17xf32>
    %197 = arith.mulf %196, %195 : vector<1x17xf32>
    %198 = arith.addf %192, %197 : vector<1x17xf32>
    %c0_74 = arith.constant 0 : index
    %c3_75 = arith.constant 3 : index
    %199 = memref.load %arg3[%c0_74, %c3_75] : memref<4x4xf32, #tpu.memory_space<smem>>
    %200 = vector.extract_strided_slice %123 {offsets = [0, 0, 0], sizes = [1, 1, 17], strides = [1, 1, 1]} : vector<4x1x17xf32> to vector<1x1x17xf32>
    %201 = vector.shape_cast %200 : vector<1x1x17xf32> to vector<1x17xf32>
    %202 = vector.broadcast %199 : f32 to vector<1x17xf32>
    %203 = arith.mulf %202, %201 : vector<1x17xf32>
    %cst_76 = arith.constant 0.000000e+00 : f32
    %204 = vector.broadcast %cst_76 : f32 to vector<1x17xf32>
    %205 = arith.addf %204, %203 : vector<1x17xf32>
    %c1_77 = arith.constant 1 : index
    %c3_78 = arith.constant 3 : index
    %206 = memref.load %arg3[%c1_77, %c3_78] : memref<4x4xf32, #tpu.memory_space<smem>>
    %207 = vector.extract_strided_slice %123 {offsets = [1, 0, 0], sizes = [1, 1, 17], strides = [1, 1, 1]} : vector<4x1x17xf32> to vector<1x1x17xf32>
    %208 = vector.shape_cast %207 : vector<1x1x17xf32> to vector<1x17xf32>
    %209 = vector.broadcast %206 : f32 to vector<1x17xf32>
    %210 = arith.mulf %209, %208 : vector<1x17xf32>
    %211 = arith.addf %205, %210 : vector<1x17xf32>
    %c2_79 = arith.constant 2 : index
    %c3_80 = arith.constant 3 : index
    %212 = memref.load %arg3[%c2_79, %c3_80] : memref<4x4xf32, #tpu.memory_space<smem>>
    %213 = vector.extract_strided_slice %123 {offsets = [2, 0, 0], sizes = [1, 1, 17], strides = [1, 1, 1]} : vector<4x1x17xf32> to vector<1x1x17xf32>
    %214 = vector.shape_cast %213 : vector<1x1x17xf32> to vector<1x17xf32>
    %215 = vector.broadcast %212 : f32 to vector<1x17xf32>
    %216 = arith.mulf %215, %214 : vector<1x17xf32>
    %217 = arith.addf %211, %216 : vector<1x17xf32>
    %c3_81 = arith.constant 3 : index
    %c3_82 = arith.constant 3 : index
    %218 = memref.load %arg3[%c3_81, %c3_82] : memref<4x4xf32, #tpu.memory_space<smem>>
    %219 = vector.extract_strided_slice %123 {offsets = [3, 0, 0], sizes = [1, 1, 17], strides = [1, 1, 1]} : vector<4x1x17xf32> to vector<1x1x17xf32>
    %220 = vector.shape_cast %219 : vector<1x1x17xf32> to vector<1x17xf32>
    %221 = vector.broadcast %218 : f32 to vector<1x17xf32>
    %222 = arith.mulf %221, %220 : vector<1x17xf32>
    %223 = arith.addf %217, %222 : vector<1x17xf32>
    %224 = vector.shape_cast %148 : vector<1x17xf32> to vector<1x1x17xf32>
    %225 = vector.shape_cast %173 : vector<1x17xf32> to vector<1x1x17xf32>
    %226 = vector.shape_cast %198 : vector<1x17xf32> to vector<1x1x17xf32>
    %227 = vector.shape_cast %223 : vector<1x17xf32> to vector<1x1x17xf32>
    %228 = tpu.concatenate %224, %225, %226, %227 in 0 : vector<1x1x17xf32>, vector<1x1x17xf32>, vector<1x1x17xf32>, vector<1x1x17xf32> -> vector<4x1x17xf32>
    %229 = arith.truncf %228 : vector<4x1x17xf32> to vector<4x1x17xbf16>
    %cst_83 = arith.constant dense<0.000000e+00> : vector<4x1x8xf32>
    %230 = tpu.matmul %229, %5, %cst_83 {dimension_numbers = #tpu.dot_dimension_numbers<[2], [1], [1], [2], [0, 0, 0, 1, 1, 2], [0], [0]>} : vector<4x1x17xbf16>, vector<4x17x8xbf16>, vector<4x1x8xf32> -> vector<4x1x8xf32>
    %231 = arith.truncf %230 : vector<4x1x8xf32> to vector<4x1x8xbf16>
    %c0_84 = arith.constant 0 : index
    %c0_85 = arith.constant 0 : index
    %c0_86 = arith.constant 0 : index
    %c0_87 = arith.constant 0 : index
    %232 = vector.load %arg7[%c0_84, %c0_85, %c0_86, %c0_87] : memref<1x4x1x8xbf16, #tpu.memory_space<vmem>>, vector<1x4x1x8xbf16>
    %233 = vector.shape_cast %232 : vector<1x4x1x8xbf16> to vector<4x1x8xbf16>
    %234 = vector.shape_cast %231 : vector<4x1x8xbf16> to vector<1x4x1x8xbf16>
    tpu.vector_store %arg7[%c0_84, %c0_85, %c0_86, %c0_87], %234 {strides = array<i32>} : memref<1x4x1x8xbf16, #tpu.memory_space<vmem>>, vector<1x4x1x8xbf16>,
    return
  }
  func.func @transform_0(%arg0: i32, %arg1: i32) -> (i32, i32) {
    %c0_i32 = arith.constant 0 : i32
    %c0_i32_0 = arith.constant 0 : i32
    %c0_i32_1 = arith.constant 0 : i32
    return %c0_i32, %c0_i32_0 : i32, i32
  }
  func.func @transform_1(%arg0: i32, %arg1: i32) -> (i32, i32) {
    %c0_i32 = arith.constant 0 : i32
    %c0_i32_0 = arith.constant 0 : i32
    %c0_i32_1 = arith.constant 0 : i32
    return %c0_i32, %c0_i32_0 : i32, i32
  }
  func.func @transform_2(%arg0: i32, %arg1: i32) -> (i32, i32, i32, i32) {
    %c0_i32 = arith.constant 0 : i32
    %c0_i32_0 = arith.constant 0 : i32
    %c0_i32_1 = arith.constant 0 : i32
    return %arg0, %c0_i32, %arg1, %c0_i32_0 : i32, i32, i32, i32
  }
  func.func @transform_3(%arg0: i32, %arg1: i32) -> (i32, i32, i32, i32) {
    %c0_i32 = arith.constant 0 : i32
    %c0_i32_0 = arith.constant 0 : i32
    %c0_i32_1 = arith.constant 0 : i32
    %c0_i32_2 = arith.constant 0 : i32
    return %arg0, %c0_i32, %c0_i32_0, %c0_i32_1 : i32, i32, i32, i32
  }
  func.func @transform_4(%arg0: i32, %arg1: i32) -> (i32, i32, i32, i32) {
    %c0_i32 = arith.constant 0 : i32
    %c0_i32_0 = arith.constant 0 : i32
    %c0_i32_1 = arith.constant 0 : i32
    %c0_i32_2 = arith.constant 0 : i32
    return %arg0, %c0_i32, %c0_i32_0, %c0_i32_1 : i32, i32, i32, i32
  }
  func.func @transform_5(%arg0: i32, %arg1: i32) -> (i32, i32, i32, i32) {
    %c0_i32 = arith.constant 0 : i32
    %c0_i32_0 = arith.constant 0 : i32
    %c0_i32_1 = arith.constant 0 : i32
    return %arg0, %c0_i32, %arg1, %c0_i32_0 : i32, i32, i32, i32
  }
}

module attributes {stable_mosaic.version = 11 : i64} {
  func.func @_ln_matmul_kernel(%arg0: i32, %arg1: i32, %arg2: memref<8x128xf32, #tpu.memory_space<vmem>>, %arg3: memref<1x128xf32, #tpu.memory_space<vmem>>, %arg4: memref<1x128xf32, #tpu.memory_space<vmem>>, %arg5: memref<128x128xbf16, #tpu.memory_space<vmem>>, %arg6: memref<1x128xf32, #tpu.memory_space<vmem>>, %arg7: memref<8x128xbf16, #tpu.memory_space<vmem>>, %arg8: memref<8x128xbf16, #tpu.memory_space<vmem>>) attributes {dimension_semantics = [#tpu.dimension_semantics<parallel>, #tpu.dimension_semantics<arbitrary>], iteration_bounds = array<i64: 1, 1>, scalar_prefetch = 0 : i64, scratch_operands = 1 : i64, tpu.core_type = #tpu.core_type<tc>, window_params = [{transform_indices = @transform_0, window_bounds = array<i64: 8, 128>}, {pipeline_mode = #tpu.pipeline_mode<synchronous>, transform_indices = @transform_1, window_bounds = array<i64: 1, 128>}, {pipeline_mode = #tpu.pipeline_mode<synchronous>, transform_indices = @transform_2, window_bounds = array<i64: 1, 128>}, {transform_indices = @transform_3, window_bounds = array<i64: 128, 128>}, {transform_indices = @transform_4, window_bounds = array<i64: 1, 128>}, {transform_indices = @transform_5, window_bounds = array<i64: 8, 128>}]} {
    %c0_i32 = arith.constant 0 : i32
    %0 = arith.cmpi eq, %arg1, %c0_i32 : i32
    %1 = arith.extui %0 : i1 to i32
    %c0_i32_0 = arith.constant 0 : i32
    %2 = arith.cmpi ne, %1, %c0_i32_0 : i32
    scf.if %2 {
      %c0_11 = arith.constant 0 : index
      %c0_12 = arith.constant 0 : index
      %19 = vector.load %arg2[%c0_11, %c0_12] : memref<8x128xf32, #tpu.memory_space<vmem>>, vector<8x128xf32>
      %c0_13 = arith.constant 0 : index
      %c0_14 = arith.constant 0 : index
      %20 = vector.load %arg3[%c0_13, %c0_14] : memref<1x128xf32, #tpu.memory_space<vmem>>, vector<1x128xf32>
      %c0_15 = arith.constant 0 : index
      %c0_16 = arith.constant 0 : index
      %21 = vector.load %arg4[%c0_15, %c0_16] : memref<1x128xf32, #tpu.memory_space<vmem>>, vector<1x128xf32>
      %cst_17 = arith.constant dense<0.000000e+00> : vector<8xf32>
      %22 = vector.multi_reduction <add>, %19, %cst_17 [1] : vector<8x128xf32> to vector<8xf32>
      %23 = vector.shape_cast %22 : vector<8xf32> to vector<8x1xf32>
      %cst_18 = arith.constant 3.125000e-02 : f32
      %24 = vector.broadcast %cst_18 : f32 to vector<8x1xf32>
      %25 = arith.mulf %23, %24 : vector<8x1xf32>
      %26 = tpu.iota {dimensions = array<i32: 1>} : vector<8x128xi32>
      %c32_i32 = arith.constant 32 : i32
      %27 = vector.broadcast %c32_i32 : i32 to vector<8x128xi32>
      %28 = arith.cmpi slt, %26, %27 : vector<8x128xi32>
      %29 = vector.broadcast %25 : vector<8x1xf32> to vector<8x128xf32>
      %30 = arith.subf %19, %29 : vector<8x128xf32>
      %cst_19 = arith.constant 0.000000e+00 : f32
      %31 = vector.broadcast %cst_19 : f32 to vector<8x128xf32>
      %32 = arith.select %28, %30, %31 : vector<8x128xi1>, vector<8x128xf32>
      %33 = arith.mulf %32, %32 : vector<8x128xf32>
      %cst_20 = arith.constant dense<0.000000e+00> : vector<8xf32>
      %34 = vector.multi_reduction <add>, %33, %cst_20 [1] : vector<8x128xf32> to vector<8xf32>
      %35 = vector.shape_cast %34 : vector<8xf32> to vector<8x1xf32>
      %cst_21 = arith.constant 3.125000e-02 : f32
      %36 = vector.broadcast %cst_21 : f32 to vector<8x1xf32>
      %37 = arith.mulf %35, %36 : vector<8x1xf32>
      %cst_22 = arith.constant 9.99999974E-6 : f32
      %38 = vector.broadcast %cst_22 : f32 to vector<8x1xf32>
      %39 = arith.addf %37, %38 : vector<8x1xf32>
      %40 = math.rsqrt %39 : vector<8x1xf32>
      %41 = vector.broadcast %40 : vector<8x1xf32> to vector<8x128xf32>
      %42 = arith.mulf %32, %41 : vector<8x128xf32>
      %43 = vector.broadcast %20 : vector<1x128xf32> to vector<8x128xf32>
      %44 = arith.mulf %42, %43 : vector<8x128xf32>
      %45 = vector.broadcast %21 : vector<1x128xf32> to vector<8x128xf32>
      %46 = arith.addf %44, %45 : vector<8x128xf32>
      %47 = arith.truncf %46 : vector<8x128xf32> to vector<8x128xbf16>
      %c0_23 = arith.constant 0 : index
      %c0_24 = arith.constant 0 : index
      %48 = vector.load %arg8[%c0_23, %c0_24] : memref<8x128xbf16, #tpu.memory_space<vmem>>, vector<8x128xbf16>
      tpu.vector_store %arg8[%c0_23, %c0_24], %47 {strides = array<i32>} : memref<8x128xbf16, #tpu.memory_space<vmem>>, vector<8x128xbf16>,
    } else {
    }
    %c0 = arith.constant 0 : index
    %c0_1 = arith.constant 0 : index
    %3 = vector.load %arg8[%c0, %c0_1] : memref<8x128xbf16, #tpu.memory_space<vmem>>, vector<8x128xbf16>
    %c0_2 = arith.constant 0 : index
    %c0_3 = arith.constant 0 : index
    %4 = vector.load %arg5[%c0_2, %c0_3] : memref<128x128xbf16, #tpu.memory_space<vmem>>, vector<128x128xbf16>
    %cst = arith.constant dense<0.000000e+00> : vector<8x128xf32>
    %5 = tpu.matmul %3, %4, %cst {dimension_numbers = #tpu.dot_dimension_numbers<[1], [0], [0], [1], [0, 0, 1, 1], [], []>} : vector<8x128xbf16>, vector<128x128xbf16>, vector<8x128xf32> -> vector<8x128xf32>
    %c0_4 = arith.constant 0 : index
    %c0_5 = arith.constant 0 : index
    %6 = vector.load %arg6[%c0_4, %c0_5] : memref<1x128xf32, #tpu.memory_space<vmem>>, vector<1x128xf32>
    %7 = vector.broadcast %6 : vector<1x128xf32> to vector<8x128xf32>
    %8 = arith.addf %5, %7 : vector<8x128xf32>
    %cst_6 = arith.constant 5.000000e-01 : f32
    %9 = vector.broadcast %cst_6 : f32 to vector<8x128xf32>
    %10 = arith.mulf %9, %8 : vector<8x128xf32>
    %cst_7 = arith.constant 0.707106769 : f32
    %11 = vector.broadcast %cst_7 : f32 to vector<8x128xf32>
    %12 = arith.mulf %8, %11 : vector<8x128xf32>
    %13 = math.erf %12 : vector<8x128xf32>
    %cst_8 = arith.constant 1.000000e+00 : f32
    %14 = vector.broadcast %cst_8 : f32 to vector<8x128xf32>
    %15 = arith.addf %14, %13 : vector<8x128xf32>
    %16 = arith.mulf %10, %15 : vector<8x128xf32>
    %17 = arith.truncf %16 : vector<8x128xf32> to vector<8x128xbf16>
    %c0_9 = arith.constant 0 : index
    %c0_10 = arith.constant 0 : index
    %18 = vector.load %arg7[%c0_9, %c0_10] : memref<8x128xbf16, #tpu.memory_space<vmem>>, vector<8x128xbf16>
    tpu.vector_store %arg7[%c0_9, %c0_10], %17 {strides = array<i32>} : memref<8x128xbf16, #tpu.memory_space<vmem>>, vector<8x128xbf16>,
    return
  }
  func.func @transform_0(%arg0: i32, %arg1: i32) -> (i32, i32) {
    %c0_i32 = arith.constant 0 : i32
    %c0_i32_0 = arith.constant 0 : i32
    return %arg0, %c0_i32 : i32, i32
  }
  func.func @transform_1(%arg0: i32, %arg1: i32) -> (i32, i32) {
    %c0_i32 = arith.constant 0 : i32
    %c0_i32_0 = arith.constant 0 : i32
    %c0_i32_1 = arith.constant 0 : i32
    return %c0_i32, %c0_i32_0 : i32, i32
  }
  func.func @transform_2(%arg0: i32, %arg1: i32) -> (i32, i32) {
    %c0_i32 = arith.constant 0 : i32
    %c0_i32_0 = arith.constant 0 : i32
    %c0_i32_1 = arith.constant 0 : i32
    return %c0_i32, %c0_i32_0 : i32, i32
  }
  func.func @transform_3(%arg0: i32, %arg1: i32) -> (i32, i32) {
    %c0_i32 = arith.constant 0 : i32
    %c0_i32_0 = arith.constant 0 : i32
    return %c0_i32, %arg1 : i32, i32
  }
  func.func @transform_4(%arg0: i32, %arg1: i32) -> (i32, i32) {
    %c0_i32 = arith.constant 0 : i32
    %c0_i32_0 = arith.constant 0 : i32
    return %c0_i32, %arg1 : i32, i32
  }
  func.func @transform_5(%arg0: i32, %arg1: i32) -> (i32, i32) {
    %c0_i32 = arith.constant 0 : i32
    return %arg0, %arg1 : i32, i32
  }
}

module attributes {stable_mosaic.version = 11 : i64} {
  func.func @_matmul_kernel(%arg0: i32, %arg1: i32, %arg2: i32, %arg3: memref<8x32xbf16, #tpu.memory_space<vmem>>, %arg4: memref<32x128xbf16, #tpu.memory_space<vmem>>, %arg5: memref<1x128xf32, #tpu.memory_space<vmem>>, %arg6: memref<1x128xf32, #tpu.memory_space<vmem>>, %arg7: memref<8x128xf32, #tpu.memory_space<vmem>>, %arg8: memref<8x128xf32, #tpu.memory_space<vmem>>, %arg9: memref<8x128xf32, #tpu.memory_space<vmem>>) attributes {dimension_semantics = [#tpu.dimension_semantics<parallel>, #tpu.dimension_semantics<parallel>, #tpu.dimension_semantics<arbitrary>], iteration_bounds = array<i64: 1, 1, 1>, scalar_prefetch = 0 : i64, scratch_operands = 1 : i64, tpu.core_type = #tpu.core_type<tc>, window_params = [{transform_indices = @transform_0, window_bounds = array<i64: 8, 32>}, {transform_indices = @transform_1, window_bounds = array<i64: 32, 128>}, {transform_indices = @transform_2, window_bounds = array<i64: 1, 128>}, {transform_indices = @transform_3, window_bounds = array<i64: 1, 128>}, {transform_indices = @transform_4, window_bounds = array<i64: 8, 128>}, {transform_indices = @transform_5, window_bounds = array<i64: 8, 128>}]} {
    %c0_i32 = arith.constant 0 : i32
    %0 = arith.cmpi eq, %arg2, %c0_i32 : i32
    %1 = arith.extui %0 : i1 to i32
    %c0_i32_0 = arith.constant 0 : i32
    %2 = arith.cmpi ne, %1, %c0_i32_0 : i32
    scf.if %2 {
      %cst_10 = arith.constant 0.000000e+00 : f32
      %12 = vector.broadcast %cst_10 : f32 to vector<8x128xf32>
      %c0_11 = arith.constant 0 : index
      %c0_12 = arith.constant 0 : index
      %13 = vector.load %arg9[%c0_11, %c0_12] : memref<8x128xf32, #tpu.memory_space<vmem>>, vector<8x128xf32>
      tpu.vector_store %arg9[%c0_11, %c0_12], %12 {strides = array<i32>} : memref<8x128xf32, #tpu.memory_space<vmem>>, vector<8x128xf32>,
    } else {
    }
    %c0 = arith.constant 0 : index
    %c0_1 = arith.constant 0 : index
    %3 = vector.load %arg9[%c0, %c0_1] : memref<8x128xf32, #tpu.memory_space<vmem>>, vector<8x128xf32>
    %c0_2 = arith.constant 0 : index
    %c0_3 = arith.constant 0 : index
    %4 = vector.load %arg3[%c0_2, %c0_3] : memref<8x32xbf16, #tpu.memory_space<vmem>>, vector<8x32xbf16>
    %c0_4 = arith.constant 0 : index
    %c0_5 = arith.constant 0 : index
    %5 = vector.load %arg4[%c0_4, %c0_5] : memref<32x128xbf16, #tpu.memory_space<vmem>>, vector<32x128xbf16>
    %cst = arith.constant dense<0.000000e+00> : vector<8x128xf32>
    %6 = tpu.matmul %4, %5, %cst {dimension_numbers = #tpu.dot_dimension_numbers<[1], [0], [0], [1], [0, 0, 1, 1], [], []>} : vector<8x32xbf16>, vector<32x128xbf16>, vector<8x128xf32> -> vector<8x128xf32>
    %7 = arith.addf %3, %6 : vector<8x128xf32>
    %c0_6 = arith.constant 0 : index
    %c0_7 = arith.constant 0 : index
    %8 = vector.load %arg9[%c0_6, %c0_7] : memref<8x128xf32, #tpu.memory_space<vmem>>, vector<8x128xf32>
    tpu.vector_store %arg9[%c0_6, %c0_7], %7 {strides = array<i32>} : memref<8x128xf32, #tpu.memory_space<vmem>>, vector<8x128xf32>,
    %c0_i32_8 = arith.constant 0 : i32
    %9 = arith.cmpi eq, %arg2, %c0_i32_8 : i32
    %10 = arith.extui %9 : i1 to i32
    %c0_i32_9 = arith.constant 0 : i32
    %11 = arith.cmpi ne, %10, %c0_i32_9 : i32
    scf.if %11 {
      %c0_10 = arith.constant 0 : index
      %c0_11 = arith.constant 0 : index
      %12 = vector.load %arg9[%c0_10, %c0_11] : memref<8x128xf32, #tpu.memory_space<vmem>>, vector<8x128xf32>
      %c0_12 = arith.constant 0 : index
      %c0_13 = arith.constant 0 : index
      %13 = vector.load %arg5[%c0_12, %c0_13] : memref<1x128xf32, #tpu.memory_space<vmem>>, vector<1x128xf32>
      %14 = vector.broadcast %13 : vector<1x128xf32> to vector<8x128xf32>
      %15 = arith.addf %12, %14 : vector<8x128xf32>
      %c0_14 = arith.constant 0 : index
      %c0_15 = arith.constant 0 : index
      %16 = vector.load %arg7[%c0_14, %c0_15] : memref<8x128xf32, #tpu.memory_space<vmem>>, vector<8x128xf32>
      %c0_16 = arith.constant 0 : index
      %c0_17 = arith.constant 0 : index
      %17 = vector.load %arg6[%c0_16, %c0_17] : memref<1x128xf32, #tpu.memory_space<vmem>>, vector<1x128xf32>
      %18 = vector.broadcast %17 : vector<1x128xf32> to vector<8x128xf32>
      %19 = arith.mulf %15, %18 : vector<8x128xf32>
      %20 = arith.addf %16, %19 : vector<8x128xf32>
      %c0_18 = arith.constant 0 : index
      %c0_19 = arith.constant 0 : index
      %21 = vector.load %arg8[%c0_18, %c0_19] : memref<8x128xf32, #tpu.memory_space<vmem>>, vector<8x128xf32>
      tpu.vector_store %arg8[%c0_18, %c0_19], %20 {strides = array<i32>} : memref<8x128xf32, #tpu.memory_space<vmem>>, vector<8x128xf32>,
    } else {
    }
    return
  }
  func.func @transform_0(%arg0: i32, %arg1: i32, %arg2: i32) -> (i32, i32) {
    %c0_i32 = arith.constant 0 : i32
    return %arg0, %arg2 : i32, i32
  }
  func.func @transform_1(%arg0: i32, %arg1: i32, %arg2: i32) -> (i32, i32) {
    %c0_i32 = arith.constant 0 : i32
    return %arg2, %arg1 : i32, i32
  }
  func.func @transform_2(%arg0: i32, %arg1: i32, %arg2: i32) -> (i32, i32) {
    %c0_i32 = arith.constant 0 : i32
    %c0_i32_0 = arith.constant 0 : i32
    return %c0_i32, %arg1 : i32, i32
  }
  func.func @transform_3(%arg0: i32, %arg1: i32, %arg2: i32) -> (i32, i32) {
    %c0_i32 = arith.constant 0 : i32
    %c0_i32_0 = arith.constant 0 : i32
    return %c0_i32, %arg1 : i32, i32
  }
  func.func @transform_4(%arg0: i32, %arg1: i32, %arg2: i32) -> (i32, i32) {
    %c0_i32 = arith.constant 0 : i32
    return %arg0, %arg1 : i32, i32
  }
  func.func @transform_5(%arg0: i32, %arg1: i32, %arg2: i32) -> (i32, i32) {
    %c0_i32 = arith.constant 0 : i32
    return %arg0, %arg1 : i32, i32
  }
}

module attributes {stable_mosaic.version = 11 : i64} {
  func.func @_matmul_kernel(%arg0: i32, %arg1: i32, %arg2: i32, %arg3: memref<8x128xbf16, #tpu.memory_space<vmem>>, %arg4: memref<128x128xbf16, #tpu.memory_space<vmem>>, %arg5: memref<1x128xf32, #tpu.memory_space<vmem>>, %arg6: memref<1x128xf32, #tpu.memory_space<vmem>>, %arg7: memref<8x128xf32, #tpu.memory_space<vmem>>, %arg8: memref<8x128xf32, #tpu.memory_space<vmem>>, %arg9: memref<8x128xf32, #tpu.memory_space<vmem>>) attributes {dimension_semantics = [#tpu.dimension_semantics<parallel>, #tpu.dimension_semantics<parallel>, #tpu.dimension_semantics<arbitrary>], iteration_bounds = array<i64: 1, 1, 1>, scalar_prefetch = 0 : i64, scratch_operands = 1 : i64, tpu.core_type = #tpu.core_type<tc>, window_params = [{transform_indices = @transform_0, window_bounds = array<i64: 8, 128>}, {transform_indices = @transform_1, window_bounds = array<i64: 128, 128>}, {transform_indices = @transform_2, window_bounds = array<i64: 1, 128>}, {transform_indices = @transform_3, window_bounds = array<i64: 1, 128>}, {transform_indices = @transform_4, window_bounds = array<i64: 8, 128>}, {transform_indices = @transform_5, window_bounds = array<i64: 8, 128>}]} {
    %c0_i32 = arith.constant 0 : i32
    %0 = arith.cmpi eq, %arg2, %c0_i32 : i32
    %1 = arith.extui %0 : i1 to i32
    %c0_i32_0 = arith.constant 0 : i32
    %2 = arith.cmpi ne, %1, %c0_i32_0 : i32
    scf.if %2 {
      %cst_10 = arith.constant 0.000000e+00 : f32
      %12 = vector.broadcast %cst_10 : f32 to vector<8x128xf32>
      %c0_11 = arith.constant 0 : index
      %c0_12 = arith.constant 0 : index
      %13 = vector.load %arg9[%c0_11, %c0_12] : memref<8x128xf32, #tpu.memory_space<vmem>>, vector<8x128xf32>
      tpu.vector_store %arg9[%c0_11, %c0_12], %12 {strides = array<i32>} : memref<8x128xf32, #tpu.memory_space<vmem>>, vector<8x128xf32>,
    } else {
    }
    %c0 = arith.constant 0 : index
    %c0_1 = arith.constant 0 : index
    %3 = vector.load %arg9[%c0, %c0_1] : memref<8x128xf32, #tpu.memory_space<vmem>>, vector<8x128xf32>
    %c0_2 = arith.constant 0 : index
    %c0_3 = arith.constant 0 : index
    %4 = vector.load %arg3[%c0_2, %c0_3] : memref<8x128xbf16, #tpu.memory_space<vmem>>, vector<8x128xbf16>
    %c0_4 = arith.constant 0 : index
    %c0_5 = arith.constant 0 : index
    %5 = vector.load %arg4[%c0_4, %c0_5] : memref<128x128xbf16, #tpu.memory_space<vmem>>, vector<128x128xbf16>
    %cst = arith.constant dense<0.000000e+00> : vector<8x128xf32>
    %6 = tpu.matmul %4, %5, %cst {dimension_numbers = #tpu.dot_dimension_numbers<[1], [0], [0], [1], [0, 0, 1, 1], [], []>} : vector<8x128xbf16>, vector<128x128xbf16>, vector<8x128xf32> -> vector<8x128xf32>
    %7 = arith.addf %3, %6 : vector<8x128xf32>
    %c0_6 = arith.constant 0 : index
    %c0_7 = arith.constant 0 : index
    %8 = vector.load %arg9[%c0_6, %c0_7] : memref<8x128xf32, #tpu.memory_space<vmem>>, vector<8x128xf32>
    tpu.vector_store %arg9[%c0_6, %c0_7], %7 {strides = array<i32>} : memref<8x128xf32, #tpu.memory_space<vmem>>, vector<8x128xf32>,
    %c0_i32_8 = arith.constant 0 : i32
    %9 = arith.cmpi eq, %arg2, %c0_i32_8 : i32
    %10 = arith.extui %9 : i1 to i32
    %c0_i32_9 = arith.constant 0 : i32
    %11 = arith.cmpi ne, %10, %c0_i32_9 : i32
    scf.if %11 {
      %c0_10 = arith.constant 0 : index
      %c0_11 = arith.constant 0 : index
      %12 = vector.load %arg9[%c0_10, %c0_11] : memref<8x128xf32, #tpu.memory_space<vmem>>, vector<8x128xf32>
      %c0_12 = arith.constant 0 : index
      %c0_13 = arith.constant 0 : index
      %13 = vector.load %arg5[%c0_12, %c0_13] : memref<1x128xf32, #tpu.memory_space<vmem>>, vector<1x128xf32>
      %14 = vector.broadcast %13 : vector<1x128xf32> to vector<8x128xf32>
      %15 = arith.addf %12, %14 : vector<8x128xf32>
      %c0_14 = arith.constant 0 : index
      %c0_15 = arith.constant 0 : index
      %16 = vector.load %arg7[%c0_14, %c0_15] : memref<8x128xf32, #tpu.memory_space<vmem>>, vector<8x128xf32>
      %c0_16 = arith.constant 0 : index
      %c0_17 = arith.constant 0 : index
      %17 = vector.load %arg6[%c0_16, %c0_17] : memref<1x128xf32, #tpu.memory_space<vmem>>, vector<1x128xf32>
      %18 = vector.broadcast %17 : vector<1x128xf32> to vector<8x128xf32>
      %19 = arith.mulf %15, %18 : vector<8x128xf32>
      %20 = arith.addf %16, %19 : vector<8x128xf32>
      %c0_18 = arith.constant 0 : index
      %c0_19 = arith.constant 0 : index
      %21 = vector.load %arg8[%c0_18, %c0_19] : memref<8x128xf32, #tpu.memory_space<vmem>>, vector<8x128xf32>
      tpu.vector_store %arg8[%c0_18, %c0_19], %20 {strides = array<i32>} : memref<8x128xf32, #tpu.memory_space<vmem>>, vector<8x128xf32>,
    } else {
    }
    return
  }
  func.func @transform_0(%arg0: i32, %arg1: i32, %arg2: i32) -> (i32, i32) {
    %c0_i32 = arith.constant 0 : i32
    return %arg0, %arg2 : i32, i32
  }
  func.func @transform_1(%arg0: i32, %arg1: i32, %arg2: i32) -> (i32, i32) {
    %c0_i32 = arith.constant 0 : i32
    return %arg2, %arg1 : i32, i32
  }
  func.func @transform_2(%arg0: i32, %arg1: i32, %arg2: i32) -> (i32, i32) {
    %c0_i32 = arith.constant 0 : i32
    %c0_i32_0 = arith.constant 0 : i32
    return %c0_i32, %arg1 : i32, i32
  }
  func.func @transform_3(%arg0: i32, %arg1: i32, %arg2: i32) -> (i32, i32) {
    %c0_i32 = arith.constant 0 : i32
    %c0_i32_0 = arith.constant 0 : i32
    return %c0_i32, %arg1 : i32, i32
  }
  func.func @transform_4(%arg0: i32, %arg1: i32, %arg2: i32) -> (i32, i32) {
    %c0_i32 = arith.constant 0 : i32
    return %arg0, %arg1 : i32, i32
  }
  func.func @transform_5(%arg0: i32, %arg1: i32, %arg2: i32) -> (i32, i32) {
    %c0_i32 = arith.constant 0 : i32
    return %arg0, %arg1 : i32, i32
  }
}

module attributes {stable_mosaic.version = 11 : i64} {
  func.func @_ln_matmul_kernel(%arg0: i32, %arg1: i32, %arg2: memref<8x128xf32, #tpu.memory_space<vmem>>, %arg3: memref<1x128xf32, #tpu.memory_space<vmem>>, %arg4: memref<1x128xf32, #tpu.memory_space<vmem>>, %arg5: memref<128x128xbf16, #tpu.memory_space<vmem>>, %arg6: memref<1x128xf32, #tpu.memory_space<vmem>>, %arg7: memref<8x128xf32, #tpu.memory_space<vmem>>, %arg8: memref<8x128xbf16, #tpu.memory_space<vmem>>) attributes {dimension_semantics = [#tpu.dimension_semantics<parallel>, #tpu.dimension_semantics<arbitrary>], iteration_bounds = array<i64: 1, 1>, scalar_prefetch = 0 : i64, scratch_operands = 1 : i64, tpu.core_type = #tpu.core_type<tc>, window_params = [{transform_indices = @transform_0, window_bounds = array<i64: 8, 128>}, {pipeline_mode = #tpu.pipeline_mode<synchronous>, transform_indices = @transform_1, window_bounds = array<i64: 1, 128>}, {pipeline_mode = #tpu.pipeline_mode<synchronous>, transform_indices = @transform_2, window_bounds = array<i64: 1, 128>}, {transform_indices = @transform_3, window_bounds = array<i64: 128, 128>}, {transform_indices = @transform_4, window_bounds = array<i64: 1, 128>}, {transform_indices = @transform_5, window_bounds = array<i64: 8, 128>}]} {
    %c0_i32 = arith.constant 0 : i32
    %0 = arith.cmpi eq, %arg1, %c0_i32 : i32
    %1 = arith.extui %0 : i1 to i32
    %c0_i32_0 = arith.constant 0 : i32
    %2 = arith.cmpi ne, %1, %c0_i32_0 : i32
    scf.if %2 {
      %c0_8 = arith.constant 0 : index
      %c0_9 = arith.constant 0 : index
      %10 = vector.load %arg2[%c0_8, %c0_9] : memref<8x128xf32, #tpu.memory_space<vmem>>, vector<8x128xf32>
      %c0_10 = arith.constant 0 : index
      %c0_11 = arith.constant 0 : index
      %11 = vector.load %arg3[%c0_10, %c0_11] : memref<1x128xf32, #tpu.memory_space<vmem>>, vector<1x128xf32>
      %c0_12 = arith.constant 0 : index
      %c0_13 = arith.constant 0 : index
      %12 = vector.load %arg4[%c0_12, %c0_13] : memref<1x128xf32, #tpu.memory_space<vmem>>, vector<1x128xf32>
      %cst_14 = arith.constant dense<0.000000e+00> : vector<8xf32>
      %13 = vector.multi_reduction <add>, %10, %cst_14 [1] : vector<8x128xf32> to vector<8xf32>
      %14 = vector.shape_cast %13 : vector<8xf32> to vector<8x1xf32>
      %cst_15 = arith.constant 3.125000e-02 : f32
      %15 = vector.broadcast %cst_15 : f32 to vector<8x1xf32>
      %16 = arith.mulf %14, %15 : vector<8x1xf32>
      %17 = tpu.iota {dimensions = array<i32: 1>} : vector<8x128xi32>
      %c32_i32 = arith.constant 32 : i32
      %18 = vector.broadcast %c32_i32 : i32 to vector<8x128xi32>
      %19 = arith.cmpi slt, %17, %18 : vector<8x128xi32>
      %20 = vector.broadcast %16 : vector<8x1xf32> to vector<8x128xf32>
      %21 = arith.subf %10, %20 : vector<8x128xf32>
      %cst_16 = arith.constant 0.000000e+00 : f32
      %22 = vector.broadcast %cst_16 : f32 to vector<8x128xf32>
      %23 = arith.select %19, %21, %22 : vector<8x128xi1>, vector<8x128xf32>
      %24 = arith.mulf %23, %23 : vector<8x128xf32>
      %cst_17 = arith.constant dense<0.000000e+00> : vector<8xf32>
      %25 = vector.multi_reduction <add>, %24, %cst_17 [1] : vector<8x128xf32> to vector<8xf32>
      %26 = vector.shape_cast %25 : vector<8xf32> to vector<8x1xf32>
      %cst_18 = arith.constant 3.125000e-02 : f32
      %27 = vector.broadcast %cst_18 : f32 to vector<8x1xf32>
      %28 = arith.mulf %26, %27 : vector<8x1xf32>
      %cst_19 = arith.constant 9.99999974E-6 : f32
      %29 = vector.broadcast %cst_19 : f32 to vector<8x1xf32>
      %30 = arith.addf %28, %29 : vector<8x1xf32>
      %31 = math.rsqrt %30 : vector<8x1xf32>
      %32 = vector.broadcast %31 : vector<8x1xf32> to vector<8x128xf32>
      %33 = arith.mulf %23, %32 : vector<8x128xf32>
      %34 = vector.broadcast %11 : vector<1x128xf32> to vector<8x128xf32>
      %35 = arith.mulf %33, %34 : vector<8x128xf32>
      %36 = vector.broadcast %12 : vector<1x128xf32> to vector<8x128xf32>
      %37 = arith.addf %35, %36 : vector<8x128xf32>
      %38 = arith.truncf %37 : vector<8x128xf32> to vector<8x128xbf16>
      %c0_20 = arith.constant 0 : index
      %c0_21 = arith.constant 0 : index
      %39 = vector.load %arg8[%c0_20, %c0_21] : memref<8x128xbf16, #tpu.memory_space<vmem>>, vector<8x128xbf16>
      tpu.vector_store %arg8[%c0_20, %c0_21], %38 {strides = array<i32>} : memref<8x128xbf16, #tpu.memory_space<vmem>>, vector<8x128xbf16>,
    } else {
    }
    %c0 = arith.constant 0 : index
    %c0_1 = arith.constant 0 : index
    %3 = vector.load %arg8[%c0, %c0_1] : memref<8x128xbf16, #tpu.memory_space<vmem>>, vector<8x128xbf16>
    %c0_2 = arith.constant 0 : index
    %c0_3 = arith.constant 0 : index
    %4 = vector.load %arg5[%c0_2, %c0_3] : memref<128x128xbf16, #tpu.memory_space<vmem>>, vector<128x128xbf16>
    %cst = arith.constant dense<0.000000e+00> : vector<8x128xf32>
    %5 = tpu.matmul %3, %4, %cst {dimension_numbers = #tpu.dot_dimension_numbers<[1], [0], [0], [1], [0, 0, 1, 1], [], []>} : vector<8x128xbf16>, vector<128x128xbf16>, vector<8x128xf32> -> vector<8x128xf32>
    %c0_4 = arith.constant 0 : index
    %c0_5 = arith.constant 0 : index
    %6 = vector.load %arg6[%c0_4, %c0_5] : memref<1x128xf32, #tpu.memory_space<vmem>>, vector<1x128xf32>
    %7 = vector.broadcast %6 : vector<1x128xf32> to vector<8x128xf32>
    %8 = arith.addf %5, %7 : vector<8x128xf32>
    %c0_6 = arith.constant 0 : index
    %c0_7 = arith.constant 0 : index
    %9 = vector.load %arg7[%c0_6, %c0_7] : memref<8x128xf32, #tpu.memory_space<vmem>>, vector<8x128xf32>
    tpu.vector_store %arg7[%c0_6, %c0_7], %8 {strides = array<i32>} : memref<8x128xf32, #tpu.memory_space<vmem>>, vector<8x128xf32>,
    return
  }
  func.func @transform_0(%arg0: i32, %arg1: i32) -> (i32, i32) {
    %c0_i32 = arith.constant 0 : i32
    %c0_i32_0 = arith.constant 0 : i32
    return %arg0, %c0_i32 : i32, i32
  }
  func.func @transform_1(%arg0: i32, %arg1: i32) -> (i32, i32) {
    %c0_i32 = arith.constant 0 : i32
    %c0_i32_0 = arith.constant 0 : i32
    %c0_i32_1 = arith.constant 0 : i32
    return %c0_i32, %c0_i32_0 : i32, i32
  }
  func.func @transform_2(%arg0: i32, %arg1: i32) -> (i32, i32) {
    %c0_i32 = arith.constant 0 : i32
    %c0_i32_0 = arith.constant 0 : i32
    %c0_i32_1 = arith.constant 0 : i32
    return %c0_i32, %c0_i32_0 : i32, i32
  }
  func.func @transform_3(%arg0: i32, %arg1: i32) -> (i32, i32) {
    %c0_i32 = arith.constant 0 : i32
    %c0_i32_0 = arith.constant 0 : i32
    return %c0_i32, %arg1 : i32, i32
  }
  func.func @transform_4(%arg0: i32, %arg1: i32) -> (i32, i32) {
    %c0_i32 = arith.constant 0 : i32
    %c0_i32_0 = arith.constant 0 : i32
    return %c0_i32, %arg1 : i32, i32
  }
  func.func @transform_5(%arg0: i32, %arg1: i32) -> (i32, i32) {
    %c0_i32 = arith.constant 0 : i32
    return %arg0, %arg1 : i32, i32
  }
}

</mosaic_0001>

<bundles_post_ra>
// kernel: _lambda_.19
= control target key start
LH: loop header
LB: loop body
LE: loop exit
PB: predicated region body
PF: predicated region fallthrough
CT: control target
= control target key end

     0   :  { %s298_s1 = inlined_call_operand.vmem [shape: bf16[128,128], index: 1, kind: input, shape index: {}]   ;;  %s299_s0 = inlined_call_operand.vmem [shape: f32[32,128], index: 0, kind: input, shape index: {}]   ;;  %s300_s2 = inlined_call_operand.vmem [shape: f32[1,128], index: 2, kind: input, shape index: {}]   ;;  %s301_s3 = inlined_call_operand.vmem [shape: f32[32,128], index: 3, kind: output, shape index: {}]  }
   0x1   :  { %v219_v0 = vld [vmem:[%s298_s1] sm:$0xff]   ;;  %v220_v1 = vld [vmem:[%s298_s1 + $0x8] sm:$0xff]   ;;  %v221_v2 = vld [vmem:[%s298_s1 + $0x10] sm:$0xff]  }
   0x2   :  { %199 = vmatprep.subr.bf16.mxu0 %v219_v0  ;;  %v222_v3 = vld [vmem:[%s298_s1 + $0x18] sm:$0xff]   ;;  %v27_v4 = vld [vmem:[%s299_s0] sm:$0xff]  ;;  %v28_v5 = vld [vmem:[%s299_s0 + $0x8] sm:$0xff] }
   0x3   :  { %200 = vmatpush3.bf16.msra.mxu0 %v219_v0  ;;  %v31_v6 = vpack.c.bf16 %v28_v5, %v27_v4  ;;  %v223_v7 = vld [vmem:[%s298_s1 + $0x20] sm:$0xff]   ;;  %v224_v8 = vld [vmem:[%s298_s1 + $0x28] sm:$0xff]   ;;  %v225_v9 = vld [vmem:[%s298_s1 + $0x30] sm:$0xff]  }
   0x4   :  { %201 = vmatprep.subr.bf16.mxu0 %v220_v1  ;;  %v226_v10 = vld [vmem:[%s298_s1 + $0x38] sm:$0xff]   ;;  %v29_v11 = vld [vmem:[%s299_s0 + $0x10] sm:$0xff]  ;;  %v188_v14 = vld [vmem:[%s300_s2] ss:$0 sm:$0xff] }
   0x5   :  { %215 = vmatprep.mubr.bf16.mxu0 %v31_v6  ;;  %v30_v12 = vld [vmem:[%s299_s0 + $0x18] sm:$0xff] }
   0x6   :  { %v32_v13 = vpack.c.bf16 %v30_v12, %v29_v11 }
   0x7   :  { %202 = vmatpush3.bf16.msra.mxu0 %v220_v1 }
   0x8   :  { %203 = vmatprep.subr.bf16.mxu0 %v221_v2 }
   0xb   :  { %204 = vmatpush3.bf16.msra.mxu0 %v221_v2 }
   0xc   :  { %205 = vmatprep.subr.bf16.mxu0 %v222_v3 }
   0xf   :  { %206 = vmatpush3.bf16.msra.mxu0 %v222_v3 }
  0x10   :  { %207 = vmatprep.subr.bf16.mxu0 %v223_v7 }
  0x13   :  { %208 = vmatpush3.bf16.msra.mxu0 %v223_v7 }
  0x14   :  { %209 = vmatprep.subr.bf16.mxu0 %v224_v8 }
  0x17   :  { %210 = vmatpush3.bf16.msra.mxu0 %v224_v8 }
  0x18   :  { %211 = vmatprep.subr.bf16.mxu0 %v225_v9 }
  0x1b   :  { %212 = vmatpush3.bf16.msra.mxu0 %v225_v9 }
  0x1c   :  { %213 = vmatprep.subr.bf16.mxu0 %v226_v10 }
  0x1f   :  { %214 = vmatpush3.bf16.msra.mxu0 %v226_v10 }
  0x22   :  { %216 = vmatmul.mubr.bf16.vlgmr.msra.gmra.mrb[0].mxu0 %v32_v13 }
  0xf5   :  { %v217_v15 = vpop.f32.mrb[0].mxu0 }
  0xf6   :  { %v170_v16 = vadd.f32 %v217_v15, %v188_v14  ;;  %v131_v17 = vpop.f32.mrb[1].mxu0 }
  0xf7   :  { %v168_v18 = vadd.f32 %v188_v14, %v131_v17  ;;  %v218_v19 = vpop.f32.mrb[2].mxu0 }
  0xf8   :  { %174 = vst [vmem:[%s301_s3 + $0x10] sm:$0xff] %v170_v16  ;;  %v171_v20 = vadd.f32 %v218_v19, %v188_v14  ;;  %v134_v21 = vpop.f32.mrb[3].mxu0 }
  0xf9   :  { %172 = vst [vmem:[%s301_s3] sm:$0xff] %v168_v18  ;;  %v169_v22 = vadd.f32 %v188_v14, %v134_v21 }
  0xfa   :  { %175 = vst [vmem:[%s301_s3 + $0x18] sm:$0xff] %v171_v20 }
  0xfb   :  { %173 = vst [vmem:[%s301_s3 + $0x8] sm:$0xff] %v169_v22 }

// kernel: _lambda_.20
= control target key start
LH: loop header
LB: loop body
LE: loop exit
PB: predicated region body
PF: predicated region fallthrough
CT: control target
= control target key end

     0   :  { %v43_v5 = vlaneseq  ;;  %vm244_vm1 = vcmask 781312   ;;  %s405_s0 = inlined_call_operand.vmem [shape: f32[32,128], index: 0, kind: input, shape index: {}]   ;;  %s406_s3 = inlined_call_operand.vmem [shape: bf16[128,96], index: 3, kind: input, shape index: {}]   ;;  %s407_s1 = inlined_call_operand.vmem [shape: f32[1,128], index: 1, kind: input, shape index: {}]   ;;  %s408_s2 = inlined_call_operand.vmem [shape: f32[1,128], index: 2, kind: input, shape index: {}]   ;;  %s409_s4 = inlined_call_operand.vmem [shape: f32[1,96], index: 4, kind: input, shape index: {}]   ;;  %s410_s5 = inlined_call_operand.vmem [shape: bf16[32,96], index: 5, kind: output, shape index: {}]  }
   0x1   :  { %v25_v0 = vld [vmem:[%s405_s0] sm:$0xff]  ;;  %v27_v1 = vld [vmem:[%s405_s0 + $0x10] sm:$0xff]  ;;  %v26_v2 = vld [vmem:[%s405_s0 + $0x8] sm:$0xff] }
   0x2   :  { %31 = vadd.xlane.f32.xlu0 %v25_v0  ;;  %35 = vadd.xlane.f32.xlu1 %v27_v1  ;;  %v28_v3 = vld [vmem:[%s405_s0 + $0x18] sm:$0xff]  ;;  %v302_v4 = vld [vmem:[%s406_s3] sm:$0xff]   ;;  %v44_v6 = vand.u32 127, %v43_v5  ;;  %v303_v27 = vld [vmem:[%s406_s3 + $0x8] sm:$0xff]  }
   0x3   :  { %282 = vmatprep.subr.bf16.mxu0 %v302_v4  ;;  %v304_v28 = vld [vmem:[%s406_s3 + $0x10] sm:$0xff]   ;;  %v305_v29 = vld [vmem:[%s406_s3 + $0x18] sm:$0xff]   ;;  %v306_v30 = vld [vmem:[%s406_s3 + $0x20] sm:$0xff]  }
   0x4   :  { %283 = vmatpush3.bf16.msra.mxu0 %v302_v4  ;;  %vm45_vm0 = vcmp.lt.s32.totalorder %v44_v6, 32  ;;  %v307_v31 = vld [vmem:[%s406_s3 + $0x28] sm:$0xff]   ;;  %v308_v32 = vld [vmem:[%s406_s3 + $0x30] sm:$0xff]   ;;  %v309_v33 = vld [vmem:[%s406_s3 + $0x38] sm:$0xff]  }
   0x5   :  { %284 = vmatprep.subr.bf16.mxu0 %v303_v27  ;;  %v253_v48 = vld [vmem:[%s407_s1] ss:$0 sm:$0xff] }
   0x6   :  { %33 = vadd.xlane.f32.xlu0 %v26_v2  ;;  %37 = vadd.xlane.f32.xlu1 %v28_v3  ;;  %v254_v53 = vld [vmem:[%s408_s2] ss:$0 sm:$0xff] }
   0x8   :  { %285 = vmatpush3.bf16.msra.mxu0 %v303_v27 }
   0x9   :  { %286 = vmatprep.subr.bf16.mxu0 %v304_v28 }
   0xc   :  { %287 = vmatpush3.bf16.msra.mxu0 %v304_v28 }
   0xd   :  { %288 = vmatprep.subr.bf16.mxu0 %v305_v29 }
  0x10   :  { %289 = vmatpush3.bf16.msra.mxu0 %v305_v29 }
  0x11   :  { %290 = vmatprep.subr.bf16.mxu0 %v306_v30 }
  0x14   :  { %291 = vmatpush3.bf16.msra.mxu0 %v306_v30 }
  0x15   :  { %292 = vmatprep.subr.bf16.mxu0 %v307_v31 }
  0x18   :  { %293 = vmatpush3.bf16.msra.mxu0 %v307_v31 }
  0x19   :  { %294 = vmatprep.subr.bf16.mxu0 %v308_v32 }
  0x1c   :  { %295 = vmatpush3.bf16.msra.mxu0 %v308_v32 }
  0x1d   :  { %296 = vmatprep.subr.bf16.mxu0 %v309_v33 }
  0x20   :  { %297 = vmatpush3.bf16.msra.mxu0 %v309_v33 }
  0x8f   :  { %v32_v7 = vpop.xlane.xlu0 %31  ;;  %v36_v8 = vpop.xlane.xlu1 %35 }
  0x90   :  { %v39_v9 = vmul.f32 0.03125, %v32_v7  ;;  %v41_v10 = vmul.f32 0.03125, %v36_v8 }
  0x92   :  { %v46_v11 = vsub.f32 %v25_v0, %v39_v9  ;;  %v48_v12 = vsub.f32 %v27_v1, %v41_v10 }
  0x93   :  { %v34_v13 = vpop.xlane.xlu0 %33  ;;  %v38_v14 = vpop.xlane.xlu1 %37 }
  0x94   :  { %v40_v15 = vmul.f32 0.03125, %v34_v13  ;;  %v42_v16 = vmul.f32 0.03125, %v38_v14  ;;  %v50_v17 = vsel %vm45_vm0, %v46_v11, 0.0  ;;  %v52_v18 = vsel %vm45_vm0, %v48_v12, 0.0 }
  0x95   :  { %v54_v19 = vmul.f32 %v50_v17, %v50_v17  ;;  %v56_v22 = vmul.f32 %v52_v18, %v52_v18 }
  0x96   :  { %v47_v20 = vsub.f32 %v26_v2, %v40_v15  ;;  %v49_v21 = vsub.f32 %v28_v3, %v42_v16  ;;  %v255_v2 = vld [vmem:[%s409_s4] ss:$0 sm:$0xff] }
  0x97   :  { %58 = vadd.xlane.f32.xlu0 %v54_v19 }
  0x98   :  { %v51_v23 = vsel %vm45_vm0, %v47_v20, 0.0  ;;  %v53_v24 = vsel %vm45_vm0, %v49_v21, 0.0 }
  0x99   :  { %v55_v25 = vmul.f32 %v51_v23, %v51_v23  ;;  %v57_v26 = vmul.f32 %v53_v24, %v53_v24 }
  0x9b   :  { %62 = vadd.xlane.f32.xlu0 %v56_v22  ;;  %60 = vadd.xlane.f32.xlu1 %v55_v25 }
  0x9f   :  { %64 = vadd.xlane.f32.xlu1 %v57_v26 }
 0x124   :  { %v59_v34 = vpop.xlane.xlu0 %58 }
 0x125   :  { %v66_v35 = vmul.f32 0.03125, %v59_v34 }
 0x127   :  { %v70_v36 = vadd.f32 1e-05, %v66_v35 }
 0x128   :  { %v61_v37 = vpop.xlane.xlu1 %60  ;;  %v63_v38 = vpop.xlane.xlu0 %62 }
 0x129   :  { %310 = vrsqrt.f32 %v70_v36  ;;  %v67_v39 = vmul.f32 0.03125, %v61_v37  ;;  %v68_v40 = vmul.f32 0.03125, %v63_v38 }
 0x12b   :  { %v71_v41 = vadd.f32 1e-05, %v67_v39  ;;  %v72_v42 = vadd.f32 1e-05, %v68_v40 }
 0x12c   :  { %v65_v43 = vpop.xlane.xlu1 %64 }
 0x12d   :  { %312 = vrsqrt.f32 %v71_v41  ;;  %v69_v44 = vmul.f32 0.03125, %v65_v43 }
 0x12e   :  { %314 = vrsqrt.f32 %v72_v42 }
 0x12f   :  { %v73_v45 = vadd.f32 1e-05, %v69_v44 }
 0x131   :  { %316 = vrsqrt.f32 %v73_v45 }
 0x133   :  { %v311_v46 = vpop.eup %310 }
 0x134   :  { %v78_v47 = vmul.f32 %v311_v46, %v50_v17 }
 0x136   :  { %v88_v52 = vmul.f32 %v253_v48, %v78_v47 }
 0x137   :  { %v313_v49 = vpop.eup %312 }
 0x138   :  { %v315_v50 = vpop.eup %314  ;;  %v79_v51 = vmul.f32 %v313_v49, %v51_v23  ;;  %v98_v57 = vadd.f32 %v254_v53, %v88_v52 }
 0x139   :  { %v80_v54 = vmul.f32 %v315_v50, %v52_v18 }
 0x13a   :  { %v89_v55 = vmul.f32 %v253_v48, %v79_v51 }
 0x13b   :  { %v317_v56 = vpop.eup %316  ;;  %v90_v60 = vmul.f32 %v253_v48, %v80_v54 }
 0x13c   :  { %v99_v58 = vadd.f32 %v254_v53, %v89_v55  ;;  %v81_v59 = vmul.f32 %v317_v56, %v53_v24 }
 0x13d   :  { %v100_v63 = vadd.f32 %v254_v53, %v90_v60 }
 0x13e   :  { %v102_v61 = vpack.c.bf16 %v99_v58, %v98_v57  ;;  %v91_v62 = vmul.f32 %v253_v48, %v81_v59 }
 0x140   :  { %298 = vmatprep.mubr.bf16.mxu0 %v102_v61  ;;  %v101_v0 = vadd.f32 %v254_v53, %v91_v62 }
 0x142   :  { %v103_v1 = vpack.c.bf16 %v101_v0, %v100_v63 }
 0x144   :  { %299 = vmatmul.mubr.bf16.vlgmr.msra.gmra.mrb[0].mxu0 %v103_v1 }
 0x217   :  { %v300_v3 = vpop.f32.mrb[0].mxu0 }
 0x218   :  { %v222_v4 = vadd.f32 %v300_v3, %v255_v2  ;;  %v213_v5 = vpop.f32.mrb[1].mxu0 }
 0x219   :  { %v214_v6 = vadd.f32 %v255_v2, %v213_v5  ;;  %v301_v7 = vpop.f32.mrb[2].mxu0 }
 0x21a   :  { %v270_v8 = vpack.c.bf16 %v222_v4, %v222_v4  ;;  %v225_v9 = vadd.f32 %v301_v7, %v255_v2  ;;  %v216_v10 = vpop.f32.mrb[3].mxu0 }
 0x21b   :  { %v268_v11 = vpack.c.bf16 %v214_v6, %v214_v6  ;;  %v217_v12 = vadd.f32 %v255_v2, %v216_v10 }
 0x21c   :  { %247 = vst.msk [vmem:[%s410_s5 + $0x8] sm:$0xf] %vm244_vm1, %v270_v8  ;;  %v271_v13 = vpack.c.bf16 %v225_v9, %v225_v9 }
 0x21d   :  { %245 = vst.msk [vmem:[%s410_s5] sm:$0xf] %vm244_vm1, %v268_v11  ;;  %v269_v14 = vpack.c.bf16 %v217_v12, %v217_v12 }
 0x21e   :  { %248 = vst.msk [vmem:[%s410_s5 + $0xc] sm:$0xf] %vm244_vm1, %v271_v13 }
 0x21f   :  { %246 = vst.msk [vmem:[%s410_s5 + $0x4] sm:$0xf] %vm244_vm1, %v269_v14 }

// kernel: _lambda_.21
= control target key start
LH: loop header
LB: loop body
LE: loop exit
PB: predicated region body
PF: predicated region fallthrough
CT: control target
= control target key end

     0   :  { %10 = vsyncpa [#allocation3], 0  ;;  %s1896_s0 = inlined_call_operand.vmem [shape: f32[4,4], index: 0, kind: input, shape index: {}]   ;;  %s1897_s1 = inlined_call_operand.vmem [shape: f32[4,4], index: 1, kind: input, shape index: {}]   ;;  %s1898_s2 = inlined_call_operand.vmem [shape: bf16[2,4,16,8], index: 2, kind: input, shape index: {}]   ;;  %s1899_s3 = inlined_call_operand.vmem [shape: bf16[2,4,16,8], index: 3, kind: input, shape index: {}]   ;;  %s1900_s4 = inlined_call_operand.vmem [shape: bf16[2,4,16,8], index: 4, kind: input, shape index: {}]   ;;  %s1901_s5 = inlined_call_operand.vmem [shape: bf16[2,4,16,8], index: 5, kind: output, shape index: {}]  }
   0x1   :  { %11 = vsyncpa [#allocation5], 0  ;;  %s1592_s18 = smov 0   ;;  %s1594_s19 = smov 0  }
   0x2   :  { %s1596_s20 = smov 0  }
   0x3 LB: > { %s1252_s21 = sadd.s32 4294967295, %s1556_s20   ;;  %s29_s22 = sadd.s32 1, %s1552_s19  ;;  %s1556_s20 = sphi %s1596_s20, %s17_s20   ;;  %s1552_s19 = sphi %s1594_s19, %s1911_s19   ;;  %s1548_s18 = sphi %s1592_s18, %s1910_s18  }
   0x4   : > { %p31_p0 = scmp.ge.s32.totalorder %s29_s22, 2  ;;  %p1254_p1 = scmp.ge.s32.totalorder %s1556_s20, 1 }
   0x5   : > { %p184_p2 = scmp.lt.s32.totalorder %s1556_s20, 3  ;;  %p1617_p4 = scmp.eq.s32.totalorder %s1252_s21, 0 }
   0x6   : > { %s1913_s22 = smov (%p31_p0, %s29_s22), 0  ;;  %s197_s27 = sshll.u32 %s1896_s0, 4  ;;  %s198_s27 = int_to_ptr.vmem [resolvable:$true] %s197_s27 }
   0x7   : > { %p1613_p3 = pnand %p1254_p1, %p184_p2  ;;  %s208_s30 = sshll.u32 %s1897_s1, 4  ;;  %s209_s30 = int_to_ptr.vmem [resolvable:$true] %s208_s30 }
   0x8   : > { %s1906_s24 = scalar_select %p1617_p4, 1, 0 }
   0x9   : > { %s1905_s23 = scalar_select %p1613_p3, 1, 0 }
   0xa   : > { %p1413_p5 = pneg %p1613_p3  ;;  %s1496_s7 = scalar_lea.vmem %s198_s27, 64 }
   0xb   : > { %p1497_p7 = scmp.ne.s32.totalorder %s198_s27, %s1496_s7  ;;  %p1504_p11 = scmp.lt.s32.totalorder %s198_s27, %s198_s27 }
   0xc   : > { %p1631_p6 = pnand %p1617_p4, %p1413_p5  ;;  %p1505_p12 = scmp.lt.s32.totalorder %s1496_s7, %s1496_s7 }
   0xe   : > { %p1498_p8 = pneg %p1631_p6  ;;  %p1506_p13 = por %p1505_p12, %p1504_p11 }
  0x10   : > { %p1499_p9 = pnand %p1498_p8, %p1497_p7 }
  0x12   : > { %p1500_p10 = pneg %p1499_p9 }
  0x14   : > { %p1507_p0 = pnand %p1506_p13, %p1500_p10 }
  0x16   : > { %1510 = shalt.err (!%p1507_p0)
}
  0x17   : > { %s1558_s8 = smov [#allocation2]   ;;  %s1511_s9 = scalar_lea.vmem %s209_s30, 64 }
  0x18   : > { %1416 = dma.vmem_to_smem (!%p1631_p6), %s198_s27, 64, %s1558_s8, [#allocation3]  }
  0x19   : > { %p1512_p1 = scmp.ne.s32.totalorder %s209_s30, %s1511_s9  ;;  %p1519_p4 = scmp.lt.s32.totalorder %s209_s30, %s209_s30 }
  0x1a   : > { %p1520_p3 = scmp.lt.s32.totalorder %s1511_s9, %s1511_s9 }
  0x1b   : > { %p1514_p2 = pnand %p1512_p1, %p1498_p8 }
  0x1c   : > { %p1521_p7 = por %p1520_p3, %p1519_p4 }
  0x1d   : > { %p1515_p5 = pneg %p1514_p2 }
  0x1f   : > { %p1522_p9 = pnand %p1521_p7, %p1515_p5 }
  0x21   : > { %1525 = shalt.err (!%p1522_p9)
}
  0x22   : > { %s1559_s10 = smov [#allocation4]   ;;  %p1908_p10 = scmp.ne.s32.totalorder %s1905_s23, 0 }
  0x23   : > { %1419 = dma.vmem_to_smem (!%p1631_p6), %s209_s30, 64, %s1559_s10, [#allocation5]  }
  0x24   : > { %250 = sbr.rel (%p1908_p10) target bundleno = 855 (0x357), region = 40  ;;  %p1909_p11 = scmp.ne.s32.totalorder (!%p1908_p10), %s1906_s24, 0 }
  0x2b   : > { %1539 = dma.done.wait (%p1909_p11), [#allocation3], 64  }
  0x2c   : > { %1541 = vsyncadd (%p1909_p11), [#allocation3], 4294967232 }
  0x2d   : > { %1543 = dma.done.wait (%p1909_p11), [#allocation5], 64  }
  0x2e   : > { %1545 = vsyncadd (%p1909_p11), [#allocation5], 4294967232 }
  0x2f   : > { %260 = sfence }
  0x30   : > { %p302_p3 = scmp.lt.s32.totalorder %s1548_s18, 1  ;;  %v1560_v0 = vmov 0.0   ;;  %vm1561_vm0 = vmmov 0   ;;  %vm366_vm1 = vcmask 64512   ;;  %s1691_s21 = sld [smem:[#allocation2 + $0x81]]  ;;  %vm689_vm2 = vcmask 130048  }
  0x31   : > { %1357 = vmatprep.subr.bf16.mxu0 %v1560_v0  ;;  %1363 = vmatprep.subr.bf16.mxu1 %v1560_v0  ;;  %s1693_s23 = sld [smem:[#allocation2]]  ;;  %s1697_s25 = sld [smem:[#allocation2 + $0x2]]  ;;  %vm1110_vm3 = vcmask 60416  }
  0x32   : > { %s1915_s18 = smov (!%p302_p3, %s1548_s18), 1  ;;  %1359 = vmatprep.mubr.msk.bf16.mxu0 %vm1561_vm0, %v1560_v0  ;;  %1365 = vmatprep.mubr.msk.bf16.mxu1 %vm1561_vm0, %v1560_v0  ;;  %s1695_s24 = sld [smem:[#allocation2 + $0x80]] }
  0x33   : > { %s1659_s11 = sshll.u32 %s1915_s18, 5  ;;  %s1689_s18 = sld [smem:[#allocation2 + $0x1]] }
  0x34   : > { %s315_s14 = scalar_lea.vmem %s1899_s3, %s1659_s11  ;;  %s309_s17 = scalar_lea.vmem %s1898_s2, %s1659_s11 }
  0x35   : > { %v1452_v1 = vld [vmem:[%s315_s14] sm:$0xff]   ;;  %v1453_v2 = vld [vmem:[%s315_s14 + $0x8] sm:$0xff]   ;;  %v1456_v5 = vld [vmem:[%s315_s14 + $0x10] sm:$0xff]   ;;  %s1699_s26 = sld [smem:[#allocation2 + $0x82]]  ;;  %s1701_s27 = sld [smem:[#allocation2 + $0x3]] }
  0x36   : > { %v371_v3 = vsel %vm366_vm1, %v1452_v1, 0  ;;  %v428_v4 = vsel %vm366_vm1, %v1453_v2, 0  ;;  %v1457_v6 = vld [vmem:[%s315_s14 + $0x18] sm:$0xff]   ;;  %v1454_v7 = vld [vmem:[%s309_s17] sm:$0xff]   ;;  %v1455_v8 = vld [vmem:[%s309_s17 + $0x8] sm:$0xff]   ;;  %v485_v9 = vsel %vm366_vm1, %v1456_v5, 0  ;;  %v624_v14 = vstv %s1691_s21  ;;  %s1793_s15 = scalar_lea.vmem %s1900_s4, %s1659_s11  ;;  %s1869_s13 = scalar_lea.vmem %s1901_s5, %s1659_s11 }
  0x37   : > { %1358 = vmatpush3.bf16.xpose.msra.mxu0 %v371_v3  ;;  %1364 = vmatpush3.bf16.xpose.msra.mxu1 %v428_v4  ;;  %v542_v10 = vsel %vm366_vm1, %v1457_v6, 0  ;;  %v1458_v11 = vld [vmem:[%s309_s17 + $0x10] sm:$0xff]   ;;  %v1459_v12 = vld [vmem:[%s309_s17 + $0x18] sm:$0xff]   ;;  %s1703_s28 = sld [smem:[#allocation2 + $0x101]]  ;;  %s1705_s29 = sld [smem:[#allocation2 + $0x83]]  ;;  %v594_v15 = vstv %s1693_s23  ;;  %v642_v18 = vstv %s1697_s25 }
  0x38   : > { %1369 = vmatprep.subr.bf16.mxu0 %v1560_v0  ;;  %1375 = vmatprep.subr.bf16.mxu1 %v1560_v0  ;;  %s1707_s30 = sld [smem:[#allocation2 + $0x100]]  ;;  %s1709_s6 = sld [smem:[#allocation2 + $0x102]]  ;;  %v600_v17 = vstv %s1695_s24 }
  0x39   : > { %s1711_s7 = sld [smem:[#allocation2 + $0x181]]  ;;  %s1713_s8 = sld [smem:[#allocation2 + $0x180]]  ;;  %v618_v13 = vstv %s1689_s18 }
  0x3a   : > { %s1721_s9 = sld [smem:[#allocation2 + $0x182]]  ;;  %s1724_s10 = sld [smem:[#allocation2 + $0x103]] }
  0x3b   : > { %v648_v19 = vstv %s1699_s26  ;;  %v666_v20 = vstv %s1701_s27  ;;  %s1732_s12 = sld [smem:[#allocation2 + $0x183]]  ;;  %s1799_s16 = sld [smem:[#allocation4]] }
  0x3c   : > { %s1801_s17 = sld [smem:[#allocation4 + $0x1]]  ;;  %s1803_s18 = sld [smem:[#allocation4 + $0x2]] }
  0x3d   : > { %v630_v24 = vstv %s1703_s28  ;;  %v672_v26 = vstv %s1705_s29  ;;  %s1805_s21 = sld [smem:[#allocation4 + $0x3]]  ;;  %s1807_s23 = sld [smem:[#allocation4 + $0x80]] }
  0x3e   : > { %1360 = vmatmul.mubr.msk.bf16.vlgmr.msra.gmra.mrb[0].mxu0 %vm366_vm1, %v1454_v7  ;;  %1366 = vmatmul.mubr.msk.bf16.vlgmr.msra.gmra.mrb[0].mxu1 %vm366_vm1, %v1455_v8  ;;  %v606_v25 = vstv %s1707_s30  ;;  %v654_v32 = vstv %s1709_s6  ;;  %s1809_s24 = sld [smem:[#allocation4 + $0x81]]  ;;  %s1811_s25 = sld [smem:[#allocation4 + $0x82]] }
  0x3f   : > { %1370 = vmatpush3.bf16.xpose.msra.mxu0 %v485_v9  ;;  %1376 = vmatpush3.bf16.xpose.msra.mxu1 %v542_v10  ;;  %v636_v30 = vstv %s1711_s7  ;;  %v612_v31 = vstv %s1713_s8  ;;  %s1813_s26 = sld [smem:[#allocation4 + $0x83]]  ;;  %s1815_s27 = sld [smem:[#allocation4 + $0x100]] }
  0x40   : > { %1371 = vmatprep.mubr.msk.bf16.mxu0 %vm1561_vm0, %v1560_v0  ;;  %1377 = vmatprep.mubr.msk.bf16.mxu1 %vm1561_vm0, %v1560_v0  ;;  %v660_v57 = vstv %s1721_s9  ;;  %v678_v59 = vstv %s1724_s10  ;;  %s1817_s28 = sld [smem:[#allocation4 + $0x101]]  ;;  %s1819_s29 = sld [smem:[#allocation4 + $0x102]] }
  0x41   : > { %1381 = vmatprep.subr.bf16.mxu0 %v1560_v0  ;;  %1387 = vmatprep.subr.bf16.mxu1 %v1560_v0  ;;  %v684_v7 = vstv %s1732_s12  ;;  %s1821_s30 = sld [smem:[#allocation4 + $0x103]]  ;;  %s1823_s6 = sld [smem:[#allocation4 + $0x180]] }
  0x42   : > { %s1825_s7 = sld [smem:[#allocation4 + $0x181]]  ;;  %s1827_s8 = sld [smem:[#allocation4 + $0x182]] }
  0x43   : > { %s1829_s9 = sld [smem:[#allocation4 + $0x183]] }
  0x46   : > { %1372 = vmatmul.mubr.msk.bf16.vlgmr.msra.gmra.mrb[4].mxu0 %vm366_vm1, %v1458_v11  ;;  %1378 = vmatmul.mubr.msk.bf16.vlgmr.msra.gmra.mrb[4].mxu1 %vm366_vm1, %v1459_v12 }
  0x47   : > { %1383 = vmatprep.mubr.msk.bf16.mxu0 %vm1561_vm0, %v1560_v0  ;;  %1389 = vmatprep.mubr.msk.bf16.mxu1 %vm1561_vm0, %v1560_v0 }
 0x111   : > { %v407_v16 = vpop.f32.mrb[0].mxu0  ;;  %v464_v22 = vpop.f32.mrb[0].mxu1 }
 0x112   : > { %v585_v21 = vmul.f32 0.35355338, %v407_v16  ;;  %v1361_v23 = vpop.f32.mrb[1].mxu0  ;;  %v587_v27 = vmul.f32 0.35355338, %v464_v22  ;;  %v1367_v28 = vpop.f32.mrb[1].mxu1 }
 0x113   : > { %v410_v29 = vpop.f32.mrb[2].mxu0  ;;  %v467_v34 = vpop.f32.mrb[2].mxu1 }
 0x114   : > { %v586_v33 = vmul.f32 0.35355338, %v410_v29  ;;  %v1362_v35 = vpop.f32.mrb[3].mxu0  ;;  %v619_v36 = vmul.f32 %v618_v13, %v585_v21  ;;  %v595_v37 = vmul.f32 %v594_v15, %v585_v21  ;;  %v643_v38 = vmul.f32 %v642_v18, %v585_v21  ;;  %v1368_v40 = vpop.f32.mrb[3].mxu1 }
 0x115   : > { %v588_v39 = vmul.f32 0.35355338, %v467_v34  ;;  %v625_v41 = vmul.f32 %v624_v14, %v587_v27  ;;  %v601_v42 = vmul.f32 %v600_v17, %v587_v27  ;;  %v649_v43 = vmul.f32 %v648_v19, %v587_v27 }
 0x116   : > { %v620_v44 = vmul.f32 %v618_v13, %v586_v33  ;;  %v644_v45 = vmul.f32 %v642_v18, %v586_v33  ;;  %v596_v46 = vmul.f32 %v594_v15, %v586_v33  ;;  %v668_v47 = vmul.f32 %v666_v20, %v586_v33 }
 0x117   : > { %v627_v48 = vadd.f32 %v625_v41, %v619_v36  ;;  %v603_v49 = vadd.f32 %v601_v42, %v595_v37  ;;  %v651_v50 = vadd.f32 %v649_v43, %v643_v38  ;;  %v626_v51 = vmul.f32 %v624_v14, %v588_v39 }
 0x118   : > { %v650_v52 = vmul.f32 %v648_v19, %v588_v39  ;;  %v602_v53 = vmul.f32 %v600_v17, %v588_v39  ;;  %v674_v54 = vmul.f32 %v672_v26, %v588_v39  ;;  %v667_v55 = vmul.f32 %v666_v20, %v585_v21 }
 0x119   : > { %v521_v56 = vpop.f32.mrb[4].mxu0  ;;  %v628_v58 = vadd.f32 %v626_v51, %v620_v44  ;;  %v673_v60 = vmul.f32 %v672_v26, %v587_v27  ;;  %v578_v62 = vpop.f32.mrb[4].mxu1 }
 0x11a   : > { %v589_v61 = vmul.f32 0.35355338, %v521_v56  ;;  %v1373_v63 = vpop.f32.mrb[5].mxu0  ;;  %v652_v1 = vadd.f32 %v650_v52, %v644_v45  ;;  %v604_v2 = vadd.f32 %v602_v53, %v596_v46  ;;  %v676_v3 = vadd.f32 %v674_v54, %v668_v47  ;;  %v1379_v5 = vpop.f32.mrb[5].mxu1 }
 0x11b   : > { %v591_v4 = vmul.f32 0.35355338, %v578_v62  ;;  %v524_v6 = vpop.f32.mrb[6].mxu0  ;;  %v675_v8 = vadd.f32 %v673_v60, %v667_v55  ;;  %v581_v10 = vpop.f32.mrb[6].mxu1 }
 0x11c   : > { %v590_v9 = vmul.f32 0.35355338, %v524_v6  ;;  %v1374_v11 = vpop.f32.mrb[7].mxu0  ;;  %v631_v12 = vmul.f32 %v630_v24, %v589_v61  ;;  %v607_v13 = vmul.f32 %v606_v25, %v589_v61  ;;  %v655_v14 = vmul.f32 %v654_v32, %v589_v61  ;;  %v1380_v16 = vpop.f32.mrb[7].mxu1 }
 0x11d   : > { %v592_v15 = vmul.f32 0.35355338, %v581_v10  ;;  %v637_v17 = vmul.f32 %v636_v30, %v591_v4  ;;  %v613_v18 = vmul.f32 %v612_v31, %v591_v4  ;;  %v661_v19 = vmul.f32 %v660_v57, %v591_v4 }
 0x11e   : > { %v633_v20 = vadd.f32 %v631_v12, %v627_v48  ;;  %v609_v21 = vadd.f32 %v607_v13, %v603_v49  ;;  %v657_v22 = vadd.f32 %v655_v14, %v651_v50  ;;  %v632_v23 = vmul.f32 %v630_v24, %v590_v9 }
 0x11f   : > { %v638_v26 = vmul.f32 %v636_v30, %v592_v15  ;;  %v656_v27 = vmul.f32 %v654_v32, %v590_v9  ;;  %v662_v28 = vmul.f32 %v660_v57, %v592_v15  ;;  %v608_v29 = vmul.f32 %v606_v25, %v590_v9 }
 0x120   : > { %v639_v33 = vadd.f32 %v637_v17, %v633_v20  ;;  %v615_v34 = vadd.f32 %v613_v18, %v609_v21  ;;  %v663_v35 = vadd.f32 %v661_v19, %v657_v22  ;;  %v634_v36 = vadd.f32 %v632_v23, %v628_v58 }
 0x121   : > { %v658_v37 = vadd.f32 %v656_v27, %v652_v1  ;;  %v610_v38 = vadd.f32 %v608_v29, %v604_v2  ;;  %v614_v39 = vmul.f32 %v612_v31, %v592_v15  ;;  %v680_v40 = vmul.f32 %v678_v59, %v590_v9 }
 0x122   : > { %v696_v41 = vsel %vm689_vm2, %v639_v33, -inf  ;;  %v690_v42 = vsel %vm689_vm2, %v615_v34, -inf  ;;  %v640_v43 = vadd.f32 %v638_v26, %v634_v36  ;;  %v686_v25 = vmul.f32 %v684_v7, %v592_v15  ;;  %v1460_v36 = vld [vmem:[%s1793_s15] sm:$0xff]  }
 0x123   : > { %697 = vmax.xlane.f32.xlu1 %v696_v41  ;;  %691 = vmax.xlane.f32.xlu0 %v690_v42  ;;  %v664_v24 = vadd.f32 %v662_v28, %v658_v37  ;;  %v616_v30 = vadd.f32 %v614_v39, %v610_v38  ;;  %v682_v32 = vadd.f32 %v680_v40, %v676_v3  ;;  %v702_v46 = vsel %vm689_vm2, %v663_v35, -inf  ;;  %v1461_v37 = vld [vmem:[%s1793_s15 + $0x8] sm:$0xff]  }
 0x124   : > { %v679_v44 = vmul.f32 %v678_v59, %v589_v61  ;;  %v685_v45 = vmul.f32 %v684_v7, %v591_v4  ;;  %v699_v47 = vsel %vm689_vm2, %v640_v43, -inf  ;;  %1382 = vmatpush3.bf16.msra.mxu0 %v1460_v36  ;;  %1388 = vmatpush3.bf16.msra.mxu1 %v1461_v37 }
 0x125   : > { %v688_v48 = vadd.f32 %v686_v25, %v682_v32  ;;  %v705_v50 = vsel %vm689_vm2, %v664_v24, -inf  ;;  %v693_v51 = vsel %vm689_vm2, %v616_v30, -inf  ;;  %1393 = vmatprep.subr.bf16.mxu0 %v1560_v0  ;;  %1399 = vmatprep.subr.bf16.mxu1 %v1560_v0 }
 0x126   : > { %v681_v31 = vadd.f32 %v679_v44, %v675_v8 }
 0x127   : > { %703 = vmax.xlane.f32.xlu0 %v702_v46  ;;  %700 = vmax.xlane.f32.xlu1 %v699_v47  ;;  %v711_v52 = vsel %vm689_vm2, %v688_v48, -inf  ;;  %v803_v46 = vstv %s1801_s17 }
 0x128   : > { %v687_v49 = vadd.f32 %v685_v45, %v681_v31  ;;  %v779_v45 = vstv %s1799_s16  ;;  %v851_v31 = vstv %s1805_s21 }
 0x12a   : > { %v708_v53 = vsel %vm689_vm2, %v687_v49, -inf }
 0x12b   : > { %706 = vmax.xlane.f32.xlu1 %v705_v50  ;;  %694 = vmax.xlane.f32.xlu0 %v693_v51  ;;  %v785_v50 = vstv %s1807_s23 }
 0x12f   : > { %712 = vmax.xlane.f32.xlu1 %v711_v52  ;;  %709 = vmax.xlane.f32.xlu0 %v708_v53  ;;  %v809_v52 = vstv %s1809_s24  ;;  %v833_v53 = vstv %s1811_s25 }
 0x1b0   : > { %v698_v54 = vpop.xlane.xlu1 %697  ;;  %v692_v55 = vpop.xlane.xlu0 %691 }
 0x1b1   : > { %v716_v56 = vsub.f32 %v639_v33, %v698_v54  ;;  %v714_v57 = vsub.f32 %v615_v34, %v692_v55  ;;  %v857_v54 = vstv %s1813_s26 }
 0x1b3   : > { %v722_v58 = vmul.f32 1.442695, %v714_v57  ;;  %v726_v59 = vmul.f32 1.442695, %v716_v56  ;;  %v791_v57 = vstv %s1815_s27 }
 0x1b4   : > { %v704_v60 = vpop.xlane.xlu0 %703  ;;  %v701_v61 = vpop.xlane.xlu1 %700 }
 0x1b5   : > { %v718_v62 = vsub.f32 %v663_v35, %v704_v60  ;;  %1464 = vpow2.f32 %v722_v58  ;;  %v717_v1 = vsub.f32 %v640_v43, %v701_v61  ;;  %v815_v58 = vstv %s1817_s28 }
 0x1b6   : > { %1466 = vpow2.f32 %v726_v59  ;;  %v839_v59 = vstv %s1819_s29 }
 0x1b7   : > { %v730_v63 = vmul.f32 1.442695, %v718_v62  ;;  %v728_v6 = vmul.f32 1.442695, %v717_v1  ;;  %v863_v1 = vstv %s1821_s30 }
 0x1b8   : > { %v707_v2 = vpop.xlane.xlu1 %706  ;;  %v695_v3 = vpop.xlane.xlu0 %694 }
 0x1b9   : > { %v715_v4 = vsub.f32 %v616_v30, %v695_v3  ;;  %1468 = vpow2.f32 %v730_v63  ;;  %v719_v7 = vsub.f32 %v664_v24, %v707_v2  ;;  %v797_v63 = vstv %s1823_s6 }
 0x1ba   : > { %v821_v3 = vstv %s1825_s7 }
 0x1bb   : > { %v724_v5 = vmul.f32 1.442695, %v715_v4  ;;  %v732_v13 = vmul.f32 1.442695, %v719_v7  ;;  %v845_v4 = vstv %s1827_s8 }
 0x1bc   : > { %v710_v8 = vpop.xlane.xlu0 %709  ;;  %v713_v9 = vpop.xlane.xlu1 %712 }
 0x1bd   : > { %v720_v10 = vsub.f32 %v687_v49, %v710_v8  ;;  %1470 = vpow2.f32 %v724_v5  ;;  %v721_v14 = vsub.f32 %v688_v48, %v713_v9  ;;  %v827_v48 = vstv %s1803_s18 }
 0x1be   : > { %1472 = vpow2.f32 %v728_v6  ;;  %v869_v5 = vstv %s1829_s9 }
 0x1bf   : > { %v734_v11 = vmul.f32 1.442695, %v720_v10  ;;  %v1757_v12 = vpop.eup %1464  ;;  %v736_v17 = vmul.f32 1.442695, %v721_v14 }
 0x1c0   : > { %v738_v15 = vsel %vm689_vm2, %v1757_v12, 0.0  ;;  %v1761_v16 = vpop.eup %1466 }
 0x1c1   : > { %1474 = vpow2.f32 %v734_v11  ;;  %739 = vadd.xlane.f32.xlu0 %v738_v15  ;;  %v744_v18 = vsel %vm689_vm2, %v1761_v16, 0.0 }
 0x1c2   : > { %1476 = vpow2.f32 %v732_v13 }
 0x1c3   : > { %v1765_v19 = vpop.eup %1468  ;;  %1478 = vpow2.f32 %v736_v17 }
 0x1c4   : > { %v750_v21 = vsel %vm689_vm2, %v1765_v19, 0.0 }
 0x1c5   : > { %745 = vadd.xlane.f32.xlu0 %v744_v18 }
 0x1c7   : > { %v1767_v20 = vpop.eup %1470 }
 0x1c8   : > { %v741_v22 = vsel %vm689_vm2, %v1767_v20, 0.0  ;;  %v1773_v23 = vpop.eup %1472 }
 0x1c9   : > { %751 = vadd.xlane.f32.xlu0 %v750_v21  ;;  %742 = vadd.xlane.f32.xlu1 %v741_v22  ;;  %v747_v27 = vsel %vm689_vm2, %v1773_v23, 0.0 }
 0x1cb   : > { %v1775_v26 = vpop.eup %1474 }
 0x1cc   : > { %v756_v28 = vsel %vm689_vm2, %v1775_v26, 0.0  ;;  %v1781_v29 = vpop.eup %1476 }
 0x1cd   : > { %748 = vadd.xlane.f32.xlu1 %v747_v27  ;;  %757 = vadd.xlane.f32.xlu0 %v756_v28  ;;  %v753_v33 = vsel %vm689_vm2, %v1781_v29, 0.0  ;;  %v1785_v34 = vpop.eup %1478 }
 0x1ce   : > { %v759_v35 = vsel %vm689_vm2, %v1785_v34, 0.0 }
 0x1d1   : > { %754 = vadd.xlane.f32.xlu1 %v753_v33 }
 0x1d5   : > { %760 = vadd.xlane.f32.xlu1 %v759_v35 }
 0x24e   : > { %v740_v38 = vpop.xlane.xlu0 %739 }
 0x24f   : > { %1480 = vrcp.f32 %v740_v38 }
 0x252   : > { %v746_v39 = vpop.xlane.xlu0 %745 }
 0x253   : > { %1482 = vrcp.f32 %v746_v39 }
 0x256   : > { %v743_v40 = vpop.xlane.xlu1 %742  ;;  %v752_v41 = vpop.xlane.xlu0 %751 }
 0x257   : > { %1484 = vrcp.f32 %v743_v40 }
 0x258   : > { %1486 = vrcp.f32 %v752_v41 }
 0x259   : > { %v1481_v30 = vpop.eup %1480 }
 0x25a   : > { %v749_v42 = vpop.xlane.xlu1 %748  ;;  %v758_v43 = vpop.xlane.xlu0 %757  ;;  %v770_v49 = vmul.f32 %v1481_v30, %v1757_v12 }
 0x25b   : > { %1488 = vrcp.f32 %v749_v42 }
 0x25c   : > { %1490 = vrcp.f32 %v758_v43  ;;  %v780_v2 = vmul.f32 %v779_v45, %v770_v49  ;;  %v804_v7 = vmul.f32 %v803_v46, %v770_v49  ;;  %v828_v11 = vmul.f32 %v827_v48, %v770_v49 }
 0x25d   : > { %v1483_v32 = vpop.eup %1482  ;;  %v852_v15 = vmul.f32 %v851_v31, %v770_v49 }
 0x25e   : > { %v755_v24 = vpop.xlane.xlu1 %754  ;;  %v772_v55 = vmul.f32 %v1483_v32, %v1761_v16 }
 0x25f   : > { %1492 = vrcp.f32 %v755_v24 }
 0x260   : > { %v786_v8 = vmul.f32 %v785_v50, %v772_v55  ;;  %v810_v9 = vmul.f32 %v809_v52, %v772_v55  ;;  %v858_v27 = vmul.f32 %v857_v54, %v772_v55 }
 0x261   : > { %v1485_v44 = vpop.eup %1484 }
 0x262   : > { %v761_v25 = vpop.xlane.xlu1 %760  ;;  %v1487_v47 = vpop.eup %1486  ;;  %v771_v61 = vmul.f32 %v1485_v44, %v1767_v20  ;;  %v788_v28 = vadd.f32 %v786_v8, %v780_v2  ;;  %v812_v35 = vadd.f32 %v810_v9, %v804_v7 }
 0x263   : > { %1494 = vrcp.f32 %v761_v25  ;;  %v774_v62 = vmul.f32 %v1487_v47, %v1765_v19  ;;  %v834_v19 = vmul.f32 %v833_v53, %v772_v55 }
 0x264   : > { %v781_v16 = vmul.f32 %v779_v45, %v771_v61  ;;  %v805_v20 = vmul.f32 %v803_v46, %v771_v61  ;;  %v829_v32 = vmul.f32 %v827_v48, %v771_v61  ;;  %v853_v25 = vmul.f32 %v851_v31, %v771_v61 }
 0x265   : > { %v1489_v51 = vpop.eup %1488  ;;  %v792_v17 = vmul.f32 %v791_v57, %v774_v62  ;;  %v816_v18 = vmul.f32 %v815_v58, %v774_v62  ;;  %v864_v55 = vmul.f32 %v863_v1, %v774_v62  ;;  %v860_v48 = vadd.f32 %v858_v27, %v852_v15 }
 0x266   : > { %v773_v56 = vmul.f32 %v1489_v51, %v1773_v23  ;;  %v1491_v60 = vpop.eup %1490  ;;  %v1463_v51 = vld [vmem:[%s1793_s15 + $0x18] sm:$0xff]  }
 0x267   : > { %v776_v13 = vmul.f32 %v1491_v60, %v1775_v26  ;;  %v794_v40 = vadd.f32 %v792_v17, %v788_v28  ;;  %v818_v41 = vadd.f32 %v816_v18, %v812_v35 }
 0x268   : > { %v787_v10 = vmul.f32 %v785_v50, %v773_v56  ;;  %v811_v12 = vmul.f32 %v809_v52, %v773_v56  ;;  %v835_v39 = vmul.f32 %v833_v53, %v773_v56  ;;  %v1462_v50 = vld [vmem:[%s1793_s15 + $0x10] sm:$0xff]   ;;  %v840_v53 = vmul.f32 %v839_v59, %v774_v62 }
 0x269   : > { %v1493_v6 = vpop.eup %1492  ;;  %v798_v37 = vmul.f32 %v797_v63, %v776_v13  ;;  %v822_v26 = vmul.f32 %v821_v3, %v776_v13  ;;  %v846_v2 = vmul.f32 %v845_v4, %v776_v13 }
 0x26a   : > { %v775_v14 = vmul.f32 %v1493_v6, %v1781_v29  ;;  %v789_v33 = vadd.f32 %v787_v10, %v781_v16  ;;  %v813_v38 = vadd.f32 %v811_v12, %v805_v20  ;;  %v859_v29 = vmul.f32 %v857_v54, %v773_v56 }
 0x26b   : > { %v800_v46 = vadd.f32 %v798_v37, %v794_v40  ;;  %v837_v52 = vadd.f32 %v835_v39, %v829_v32 }
 0x26c   : > { %v793_v21 = vmul.f32 %v791_v57, %v775_v14  ;;  %v817_v22 = vmul.f32 %v815_v58, %v775_v14  ;;  %v841_v44 = vmul.f32 %v839_v59, %v775_v14  ;;  %v865_v45 = vmul.f32 %v863_v1, %v775_v14 }
 0x26d   : > { %v1495_v23 = vpop.eup %1494  ;;  %v861_v54 = vadd.f32 %v859_v29, %v853_v25  ;;  %v866_v1 = vadd.f32 %v864_v55, %v860_v48 }
 0x26e   : > { %v777_v36 = vmul.f32 %v1495_v23, %v1785_v34  ;;  %v795_v42 = vadd.f32 %v793_v21, %v789_v33  ;;  %v819_v24 = vadd.f32 %v817_v22, %v813_v38  ;;  %v824_v34 = vadd.f32 %v822_v26, %v818_v41 }
 0x26f   : > { %v843_v31 = vadd.f32 %v841_v44, %v837_v52  ;;  %v867_v61 = vadd.f32 %v865_v45, %v861_v54 }
 0x270   : > { %v799_v43 = vmul.f32 %v797_v63, %v777_v36  ;;  %v823_v30 = vmul.f32 %v821_v3, %v777_v36  ;;  %v847_v58 = vmul.f32 %v845_v4, %v777_v36  ;;  %v871_v60 = vmul.f32 %v869_v5, %v777_v36 }
 0x271   : > { %v836_v63 = vadd.f32 %v834_v19, %v828_v11  ;;  %v870_v3 = vmul.f32 %v869_v5, %v776_v13 }
 0x272   : > { %v801_v47 = vadd.f32 %v799_v43, %v795_v42  ;;  %v825_v49 = vadd.f32 %v823_v30, %v819_v24  ;;  %v849_v62 = vadd.f32 %v847_v58, %v843_v31  ;;  %v873_v4 = vadd.f32 %v871_v60, %v867_v61 }
 0x273   : > { %v842_v59 = vadd.f32 %v840_v53, %v836_v63  ;;  %v872_v7 = vadd.f32 %v870_v3, %v866_v1 }
 0x274   : > { %v874_v56 = vpack.c.bf16 %v801_v47, %v800_v46  ;;  %v875_v57 = vpack.c.bf16 %v825_v49, %v824_v34 }
 0x275   : > { %v848_v6 = vadd.f32 %v846_v2, %v842_v59  ;;  %v877_v9 = vpack.c.bf16 %v873_v4, %v872_v7 }
 0x276   : > { %1384 = vmatmul.mubr.msk.bf16.vlgmr.msra.gmra.mrb[8].mxu0 %vm689_vm2, %v874_v56  ;;  %1390 = vmatmul.mubr.msk.bf16.vlgmr.msra.gmra.mrb[8].mxu1 %vm689_vm2, %v875_v57 }
 0x277   : > { %1394 = vmatpush3.bf16.msra.mxu0 %v1462_v50  ;;  %1400 = vmatpush3.bf16.msra.mxu1 %v1463_v51  ;;  %v876_v8 = vpack.c.bf16 %v849_v62, %v848_v6 }
 0x278   : > { %1395 = vmatprep.mubr.msk.bf16.mxu0 %vm1561_vm0, %v1560_v0  ;;  %1401 = vmatprep.mubr.msk.bf16.mxu1 %vm1561_vm0, %v1560_v0 }
 0x27e   : > { %1396 = vmatmul.mubr.msk.bf16.vlgmr.msra.gmra.mrb[12].mxu0 %vm689_vm2, %v876_v8  ;;  %1402 = vmatmul.mubr.msk.bf16.vlgmr.msra.gmra.mrb[12].mxu1 %vm689_vm2, %v877_v9 }
 0x349   : > { %v921_v0 = vpop.f32.mrb[8].mxu0  ;;  %v971_v5 = vpop.f32.mrb[8].mxu1 }
 0x34a   : > { %v1333_v10 = vpack.c.bf16 %v921_v0, %v921_v0  ;;  %v1335_v11 = vpack.c.bf16 %v971_v5, %v971_v5  ;;  %v1385_v12 = vpop.f32.mrb[9].mxu0  ;;  %v1391_v13 = vpop.f32.mrb[9].mxu1 }
 0x34b   : > { %v924_v14 = vpop.f32.mrb[10].mxu0  ;;  %v974_v15 = vpop.f32.mrb[10].mxu1 }
 0x34c   : > { %1111 = vst.msk [vmem:[%s1869_s13] sm:$0xf] %vm1110_vm3, %v1333_v10  ;;  %1113 = vst.msk [vmem:[%s1869_s13 + $0x8] sm:$0xf] %vm1110_vm3, %v1335_v11  ;;  %v1334_v16 = vpack.c.bf16 %v924_v14, %v924_v14  ;;  %v1336_v17 = vpack.c.bf16 %v974_v15, %v974_v15  ;;  %v1386_v18 = vpop.f32.mrb[11].mxu0  ;;  %v1392_v19 = vpop.f32.mrb[11].mxu1 }
 0x34e   : > { %1112 = vst.msk [vmem:[%s1869_s13 + $0x4] sm:$0xf] %vm1110_vm3, %v1334_v16  ;;  %1114 = vst.msk [vmem:[%s1869_s13 + $0xc] sm:$0xf] %vm1110_vm3, %v1336_v17 }
 0x351   : > { %v1021_v20 = vpop.f32.mrb[12].mxu0  ;;  %v1071_v21 = vpop.f32.mrb[12].mxu1 }
 0x352   : > { %v1337_v22 = vpack.c.bf16 %v1021_v20, %v1021_v20  ;;  %v1339_v23 = vpack.c.bf16 %v1071_v21, %v1071_v21  ;;  %v1397_v27 = vpop.f32.mrb[13].mxu0  ;;  %v1403_v28 = vpop.f32.mrb[13].mxu1 }
 0x353   : > { %v1024_v33 = vpop.f32.mrb[14].mxu0  ;;  %v1074_v35 = vpop.f32.mrb[14].mxu1 }
 0x354   : > { %1115 = vst.msk [vmem:[%s1869_s13 + $0x10] sm:$0xf] %vm1110_vm3, %v1337_v22  ;;  %1117 = vst.msk [vmem:[%s1869_s13 + $0x18] sm:$0xf] %vm1110_vm3, %v1339_v23  ;;  %v1338_v36 = vpack.c.bf16 %v1024_v33, %v1024_v33  ;;  %v1340_v37 = vpack.c.bf16 %v1074_v35, %v1074_v35  ;;  %v1398_v38 = vpop.f32.mrb[15].mxu0  ;;  %v1404_v26 = vpop.f32.mrb[15].mxu1 }
 0x356   : > { %1116 = vst.msk [vmem:[%s1869_s13 + $0x14] sm:$0xf] %vm1110_vm3, %v1338_v36  ;;  %1118 = vst.msk [vmem:[%s1869_s13 + $0x1c] sm:$0xf] %vm1110_vm3, %v1340_v37 }
 0x357 PF: > { %s17_s20 = sadd.s32 1, %s1556_s20   ;;  %s1910_s18 = smov %s1552_s19 }
 0x358   : > { %p14_p4 = scmp.ge.s32.totalorder %s17_s20, 4   ;;  %s1911_s19 = smov %s1913_s22 }
 0x35a   :  { %16 = sbr.rel (!%p14_p4) target bundleno = 3 (0x3), region = 85 }
 0x361   :  { %1149 = vsyncpa [#allocation3], 1 }
 0x362   :  { %1151 = vsyncpa [#allocation3 + $0x1], 1 }
 0x363   :  { %1152 = vsyncpa [#allocation5], 1 }

// kernel: _lambda_.23
= control target key start
LH: loop header
LB: loop body
LE: loop exit
PB: predicated region body
PF: predicated region fallthrough
CT: control target
= control target key end

     0   :  { %v43_v5 = vlaneseq  ;;  %s437_s0 = inlined_call_operand.vmem [shape: f32[32,128], index: 0, kind: input, shape index: {}]   ;;  %s438_s3 = inlined_call_operand.vmem [shape: bf16[128,128], index: 3, kind: input, shape index: {}]   ;;  %s439_s1 = inlined_call_operand.vmem [shape: f32[1,128], index: 1, kind: input, shape index: {}]   ;;  %s440_s2 = inlined_call_operand.vmem [shape: f32[1,128], index: 2, kind: input, shape index: {}]   ;;  %s441_s4 = inlined_call_operand.vmem [shape: f32[1,128], index: 4, kind: input, shape index: {}]   ;;  %s442_s5 = inlined_call_operand.vmem [shape: bf16[32,128], index: 5, kind: output, shape index: {}]  }
   0x1   :  { %v25_v0 = vld [vmem:[%s437_s0] sm:$0xff]  ;;  %v27_v1 = vld [vmem:[%s437_s0 + $0x10] sm:$0xff]  ;;  %v26_v2 = vld [vmem:[%s437_s0 + $0x8] sm:$0xff] }
   0x2   :  { %31 = vadd.xlane.f32.xlu0 %v25_v0  ;;  %35 = vadd.xlane.f32.xlu1 %v27_v1  ;;  %v28_v3 = vld [vmem:[%s437_s0 + $0x18] sm:$0xff]  ;;  %v332_v4 = vld [vmem:[%s438_s3] sm:$0xff]   ;;  %v44_v6 = vand.u32 127, %v43_v5  ;;  %v333_v27 = vld [vmem:[%s438_s3 + $0x8] sm:$0xff]  }
   0x3   :  { %312 = vmatprep.subr.bf16.mxu0 %v332_v4  ;;  %v334_v28 = vld [vmem:[%s438_s3 + $0x10] sm:$0xff]   ;;  %v335_v29 = vld [vmem:[%s438_s3 + $0x18] sm:$0xff]   ;;  %v336_v30 = vld [vmem:[%s438_s3 + $0x20] sm:$0xff]  }
   0x4   :  { %313 = vmatpush3.bf16.msra.mxu0 %v332_v4  ;;  %vm45_vm0 = vcmp.lt.s32.totalorder %v44_v6, 32  ;;  %v337_v31 = vld [vmem:[%s438_s3 + $0x28] sm:$0xff]   ;;  %v338_v32 = vld [vmem:[%s438_s3 + $0x30] sm:$0xff]   ;;  %v339_v33 = vld [vmem:[%s438_s3 + $0x38] sm:$0xff]  }
   0x5   :  { %314 = vmatprep.subr.bf16.mxu0 %v333_v27  ;;  %v272_v48 = vld [vmem:[%s439_s1] ss:$0 sm:$0xff] }
   0x6   :  { %33 = vadd.xlane.f32.xlu0 %v26_v2  ;;  %37 = vadd.xlane.f32.xlu1 %v28_v3  ;;  %v273_v53 = vld [vmem:[%s440_s2] ss:$0 sm:$0xff] }
   0x8   :  { %315 = vmatpush3.bf16.msra.mxu0 %v333_v27 }
   0x9   :  { %316 = vmatprep.subr.bf16.mxu0 %v334_v28 }
   0xc   :  { %317 = vmatpush3.bf16.msra.mxu0 %v334_v28 }
   0xd   :  { %318 = vmatprep.subr.bf16.mxu0 %v335_v29 }
  0x10   :  { %319 = vmatpush3.bf16.msra.mxu0 %v335_v29 }
  0x11   :  { %320 = vmatprep.subr.bf16.mxu0 %v336_v30 }
  0x14   :  { %321 = vmatpush3.bf16.msra.mxu0 %v336_v30 }
  0x15   :  { %322 = vmatprep.subr.bf16.mxu0 %v337_v31 }
  0x18   :  { %323 = vmatpush3.bf16.msra.mxu0 %v337_v31 }
  0x19   :  { %324 = vmatprep.subr.bf16.mxu0 %v338_v32 }
  0x1c   :  { %325 = vmatpush3.bf16.msra.mxu0 %v338_v32 }
  0x1d   :  { %326 = vmatprep.subr.bf16.mxu0 %v339_v33 }
  0x20   :  { %327 = vmatpush3.bf16.msra.mxu0 %v339_v33 }
  0x8f   :  { %v32_v7 = vpop.xlane.xlu0 %31  ;;  %v36_v8 = vpop.xlane.xlu1 %35 }
  0x90   :  { %v39_v9 = vmul.f32 0.03125, %v32_v7  ;;  %v41_v10 = vmul.f32 0.03125, %v36_v8 }
  0x92   :  { %v46_v11 = vsub.f32 %v25_v0, %v39_v9  ;;  %v48_v12 = vsub.f32 %v27_v1, %v41_v10 }
  0x93   :  { %v34_v13 = vpop.xlane.xlu0 %33  ;;  %v38_v14 = vpop.xlane.xlu1 %37 }
  0x94   :  { %v40_v15 = vmul.f32 0.03125, %v34_v13  ;;  %v42_v16 = vmul.f32 0.03125, %v38_v14  ;;  %v50_v17 = vsel %vm45_vm0, %v46_v11, 0.0  ;;  %v52_v18 = vsel %vm45_vm0, %v48_v12, 0.0 }
  0x95   :  { %v54_v19 = vmul.f32 %v50_v17, %v50_v17  ;;  %v56_v22 = vmul.f32 %v52_v18, %v52_v18 }
  0x96   :  { %v47_v20 = vsub.f32 %v26_v2, %v40_v15  ;;  %v49_v21 = vsub.f32 %v28_v3, %v42_v16  ;;  %v274_v2 = vld [vmem:[%s441_s4] ss:$0 sm:$0xff] }
  0x97   :  { %58 = vadd.xlane.f32.xlu0 %v54_v19 }
  0x98   :  { %v51_v23 = vsel %vm45_vm0, %v47_v20, 0.0  ;;  %v53_v24 = vsel %vm45_vm0, %v49_v21, 0.0 }
  0x99   :  { %v55_v25 = vmul.f32 %v51_v23, %v51_v23  ;;  %v57_v26 = vmul.f32 %v53_v24, %v53_v24 }
  0x9b   :  { %62 = vadd.xlane.f32.xlu0 %v56_v22  ;;  %60 = vadd.xlane.f32.xlu1 %v55_v25 }
  0x9f   :  { %64 = vadd.xlane.f32.xlu1 %v57_v26 }
 0x124   :  { %v59_v34 = vpop.xlane.xlu0 %58 }
 0x125   :  { %v66_v35 = vmul.f32 0.03125, %v59_v34 }
 0x127   :  { %v70_v36 = vadd.f32 1e-05, %v66_v35 }
 0x128   :  { %v61_v37 = vpop.xlane.xlu1 %60  ;;  %v63_v38 = vpop.xlane.xlu0 %62 }
 0x129   :  { %340 = vrsqrt.f32 %v70_v36  ;;  %v67_v39 = vmul.f32 0.03125, %v61_v37  ;;  %v68_v40 = vmul.f32 0.03125, %v63_v38 }
 0x12b   :  { %v71_v41 = vadd.f32 1e-05, %v67_v39  ;;  %v72_v42 = vadd.f32 1e-05, %v68_v40 }
 0x12c   :  { %v65_v43 = vpop.xlane.xlu1 %64 }
 0x12d   :  { %342 = vrsqrt.f32 %v71_v41  ;;  %v69_v44 = vmul.f32 0.03125, %v65_v43 }
 0x12e   :  { %344 = vrsqrt.f32 %v72_v42 }
 0x12f   :  { %v73_v45 = vadd.f32 1e-05, %v69_v44 }
 0x131   :  { %346 = vrsqrt.f32 %v73_v45 }
 0x133   :  { %v341_v46 = vpop.eup %340 }
 0x134   :  { %v78_v47 = vmul.f32 %v341_v46, %v50_v17 }
 0x136   :  { %v88_v52 = vmul.f32 %v272_v48, %v78_v47 }
 0x137   :  { %v343_v49 = vpop.eup %342 }
 0x138   :  { %v345_v50 = vpop.eup %344  ;;  %v79_v51 = vmul.f32 %v343_v49, %v51_v23  ;;  %v98_v57 = vadd.f32 %v273_v53, %v88_v52 }
 0x139   :  { %v80_v54 = vmul.f32 %v345_v50, %v52_v18 }
 0x13a   :  { %v89_v55 = vmul.f32 %v272_v48, %v79_v51 }
 0x13b   :  { %v347_v56 = vpop.eup %346  ;;  %v90_v60 = vmul.f32 %v272_v48, %v80_v54 }
 0x13c   :  { %v99_v58 = vadd.f32 %v273_v53, %v89_v55  ;;  %v81_v59 = vmul.f32 %v347_v56, %v53_v24 }
 0x13d   :  { %v100_v63 = vadd.f32 %v273_v53, %v90_v60 }
 0x13e   :  { %v102_v61 = vpack.c.bf16 %v99_v58, %v98_v57  ;;  %v91_v62 = vmul.f32 %v272_v48, %v81_v59 }
 0x140   :  { %328 = vmatprep.mubr.bf16.mxu0 %v102_v61  ;;  %v101_v0 = vadd.f32 %v273_v53, %v91_v62 }
 0x142   :  { %v103_v1 = vpack.c.bf16 %v101_v0, %v100_v63 }
 0x144   :  { %329 = vmatmul.mubr.bf16.vlgmr.msra.gmra.mrb[0].mxu0 %v103_v1 }
 0x217   :  { %v330_v3 = vpop.f32.mrb[0].mxu0 }
 0x218   :  { %v222_v4 = vadd.f32 %v330_v3, %v274_v2  ;;  %v213_v5 = vpop.f32.mrb[1].mxu0 }
 0x219   :  { %v214_v6 = vadd.f32 %v274_v2, %v213_v5  ;;  %v331_v7 = vpop.f32.mrb[2].mxu0 }
 0x21a   :  { %v234_v8 = vmul.f32 0.70710677, %v222_v4  ;;  %v225_v9 = vadd.f32 %v331_v7, %v274_v2  ;;  %v216_v10 = vpop.f32.mrb[3].mxu0  ;;  %v230_v21 = vmul.f32 0.5, %v222_v4 }
 0x21b   :  { %v232_v11 = vmul.f32 0.70710677, %v214_v6  ;;  %v217_v12 = vadd.f32 %v274_v2, %v216_v10  ;;  %v228_v24 = vmul.f32 0.5, %v214_v6 }
 0x21c   :  { %348 = verf.f32 %v234_v8  ;;  %v235_v13 = vmul.f32 0.70710677, %v225_v9  ;;  %v231_v22 = vmul.f32 0.5, %v225_v9 }
 0x21d   :  { %350 = verf.f32 %v232_v11  ;;  %v233_v14 = vmul.f32 0.70710677, %v217_v12  ;;  %v229_v25 = vmul.f32 0.5, %v217_v12 }
 0x21e   :  { %352 = verf.f32 %v235_v13 }
 0x21f   :  { %354 = verf.f32 %v233_v14 }
 0x226   :  { %v349_v15 = vpop.eup %348 }
 0x227   :  { %v351_v16 = vpop.eup %350  ;;  %v242_v17 = vadd.f32 1.0, %v349_v15 }
 0x228   :  { %v353_v18 = vpop.eup %352  ;;  %v240_v19 = vadd.f32 1.0, %v351_v16 }
 0x229   :  { %v355_v20 = vpop.eup %354  ;;  %v243_v23 = vadd.f32 1.0, %v353_v18  ;;  %v246_v27 = vmul.f32 %v242_v17, %v230_v21 }
 0x22a   :  { %v241_v26 = vadd.f32 1.0, %v355_v20  ;;  %v244_v29 = vmul.f32 %v240_v19, %v228_v24 }
 0x22b   :  { %v247_v28 = vmul.f32 %v243_v23, %v231_v22 }
 0x22c   :  { %v245_v30 = vmul.f32 %v241_v26, %v229_v25 }
 0x22d   :  { %v299_v31 = vpack.c.bf16 %v247_v28, %v246_v27 }
 0x22e   :  { %v294_v32 = vpack.c.bf16 %v245_v30, %v244_v29 }
 0x22f   :  { %301 = vst [vmem:[%s442_s5 + $0x8] sm:$0xff] %v299_v31  }
 0x230   :  { %295 = vst [vmem:[%s442_s5] sm:$0xff] %v294_v32  }

// kernel: _lambda_.24
= control target key start
LH: loop header
LB: loop body
LE: loop exit
PB: predicated region body
PF: predicated region fallthrough
CT: control target
= control target key end

     0   :  { %s357_s1 = inlined_call_operand.vmem [shape: bf16[128,128], index: 1, kind: input, shape index: {}]   ;;  %s358_s0 = inlined_call_operand.vmem [shape: bf16[32,128], index: 0, kind: input, shape index: {}]   ;;  %s359_s2 = inlined_call_operand.vmem [shape: f32[1,128], index: 2, kind: input, shape index: {}]   ;;  %s360_s3 = inlined_call_operand.vmem [shape: f32[1,128], index: 3, kind: input, shape index: {}]   ;;  %s361_s4 = inlined_call_operand.vmem [shape: f32[32,128], index: 4, kind: input, shape index: {}]   ;;  %s362_s5 = inlined_call_operand.vmem [shape: f32[32,128], index: 5, kind: output, shape index: {}]  }
   0x1   :  { %v257_v0 = vld [vmem:[%s357_s1] sm:$0xff]   ;;  %v258_v1 = vld [vmem:[%s357_s1 + $0x8] sm:$0xff]   ;;  %v259_v2 = vld [vmem:[%s357_s1 + $0x10] sm:$0xff]  }
   0x2   :  { %237 = vmatprep.subr.bf16.mxu0 %v257_v0  ;;  %v260_v3 = vld [vmem:[%s357_s1 + $0x18] sm:$0xff]   ;;  %v265_v4 = vld [vmem:[%s358_s0] sm:$0xff]   ;;  %v262_v6 = vld [vmem:[%s357_s1 + $0x28] sm:$0xff]  }
   0x3   :  { %238 = vmatpush3.bf16.msra.mxu0 %v257_v0  ;;  %253 = vmatprep.mubr.bf16.mxu0 %v265_v4  ;;  %v261_v5 = vld [vmem:[%s357_s1 + $0x20] sm:$0xff]   ;;  %v263_v7 = vld [vmem:[%s357_s1 + $0x30] sm:$0xff]   ;;  %v264_v8 = vld [vmem:[%s357_s1 + $0x38] sm:$0xff]  }
   0x4   :  { %239 = vmatprep.subr.bf16.mxu0 %v258_v1  ;;  %v266_v9 = vld [vmem:[%s358_s0 + $0x8] sm:$0xff]   ;;  %v225_v10 = vld [vmem:[%s359_s2] ss:$0 sm:$0xff]  ;;  %v190_v15 = vld [vmem:[%s361_s4 + $0x10] sm:$0xff] }
   0x5   :  { %v226_v12 = vld [vmem:[%s360_s3] ss:$0 sm:$0xff]  ;;  %v191_v23 = vld [vmem:[%s361_s4 + $0x18] sm:$0xff]  ;;  %v189_v27 = vld [vmem:[%s361_s4 + $0x8] sm:$0xff] }
   0x6   :  { %v188_v19 = vld [vmem:[%s361_s4] sm:$0xff] }
   0x7   :  { %240 = vmatpush3.bf16.msra.mxu0 %v258_v1 }
   0x8   :  { %241 = vmatprep.subr.bf16.mxu0 %v259_v2 }
   0xb   :  { %242 = vmatpush3.bf16.msra.mxu0 %v259_v2 }
   0xc   :  { %243 = vmatprep.subr.bf16.mxu0 %v260_v3 }
   0xf   :  { %244 = vmatpush3.bf16.msra.mxu0 %v260_v3 }
  0x10   :  { %245 = vmatprep.subr.bf16.mxu0 %v261_v5 }
  0x13   :  { %246 = vmatpush3.bf16.msra.mxu0 %v261_v5 }
  0x14   :  { %247 = vmatprep.subr.bf16.mxu0 %v262_v6 }
  0x17   :  { %248 = vmatpush3.bf16.msra.mxu0 %v262_v6 }
  0x18   :  { %249 = vmatprep.subr.bf16.mxu0 %v263_v7 }
  0x1b   :  { %250 = vmatpush3.bf16.msra.mxu0 %v263_v7 }
  0x1c   :  { %251 = vmatprep.subr.bf16.mxu0 %v264_v8 }
  0x1f   :  { %252 = vmatpush3.bf16.msra.mxu0 %v264_v8 }
  0x22   :  { %254 = vmatmul.mubr.bf16.vlgmr.msra.gmra.mrb[0].mxu0 %v266_v9 }
  0xf5   :  { %v255_v11 = vpop.f32.mrb[0].mxu0 }
  0xf6   :  { %v186_v13 = vadd.f32 %v255_v11, %v225_v10  ;;  %v147_v14 = vpop.f32.mrb[1].mxu0 }
  0xf7   :  { %v184_v16 = vadd.f32 %v225_v10, %v147_v14  ;;  %v256_v17 = vpop.f32.mrb[2].mxu0 }
  0xf8   :  { %v201_v18 = vmul.f32 %v226_v12, %v186_v13  ;;  %v187_v20 = vadd.f32 %v256_v17, %v225_v10  ;;  %v150_v21 = vpop.f32.mrb[3].mxu0 }
  0xf9   :  { %v199_v22 = vmul.f32 %v226_v12, %v184_v16  ;;  %v185_v24 = vadd.f32 %v225_v10, %v150_v21 }
  0xfa   :  { %v205_v25 = vadd.f32 %v201_v18, %v190_v15  ;;  %v202_v26 = vmul.f32 %v226_v12, %v187_v20 }
  0xfb   :  { %v203_v28 = vadd.f32 %v199_v22, %v188_v19  ;;  %v200_v29 = vmul.f32 %v226_v12, %v185_v24 }
  0xfc   :  { %209 = vst [vmem:[%s362_s5 + $0x10] sm:$0xff] %v205_v25  ;;  %v206_v30 = vadd.f32 %v202_v26, %v191_v23 }
  0xfd   :  { %207 = vst [vmem:[%s362_s5] sm:$0xff] %v203_v28  ;;  %v204_v31 = vadd.f32 %v200_v29, %v189_v27 }
  0xfe   :  { %210 = vst [vmem:[%s362_s5 + $0x18] sm:$0xff] %v206_v30 }
  0xff   :  { %208 = vst [vmem:[%s362_s5 + $0x8] sm:$0xff] %v204_v31 }

// kernel: _lambda_.22
= control target key start
LH: loop header
LB: loop body
LE: loop exit
PB: predicated region body
PF: predicated region fallthrough
CT: control target
= control target key end

     0   :  { %vm63_vm0 = vcmask 261120   ;;  %s268_s1 = inlined_call_operand.vmem [shape: bf16[32,128], index: 1, kind: input, shape index: {}]   ;;  %s269_s0 = inlined_call_operand.vmem [shape: bf16[32,32], index: 0, kind: input, shape index: {}]   ;;  %s270_s2 = inlined_call_operand.vmem [shape: f32[1,128], index: 2, kind: input, shape index: {}]   ;;  %s271_s3 = inlined_call_operand.vmem [shape: f32[1,128], index: 3, kind: input, shape index: {}]   ;;  %s272_s4 = inlined_call_operand.vmem [shape: f32[32,128], index: 4, kind: input, shape index: {}]   ;;  %s273_s5 = inlined_call_operand.vmem [shape: f32[32,128], index: 5, kind: output, shape index: {}]  }
   0x1   :  { %v192_v0 = vld [vmem:[%s268_s1] sm:$0xff]   ;;  %v193_v1 = vld [vmem:[%s268_s1 + $0x8] sm:$0xff]   ;;  %v147_v9 = vld [vmem:[%s272_s4 + $0x10] sm:$0xff] }
   0x2   :  { %184 = vmatprep.subr.bf16.mxu0 %v192_v0  ;;  %v194_v2 = vld [vmem:[%s269_s0] sm:$0xff]   ;;  %v195_v3 = vld [vmem:[%s269_s0 + $0x8] sm:$0xff]   ;;  %v148_v17 = vld [vmem:[%s272_s4 + $0x18] sm:$0xff] }
   0x3   :  { %185 = vmatpush3.bf16.msra.mxu0 %v192_v0  ;;  %188 = vmatprep.mubr.msk.bf16.mxu0 %vm63_vm0, %v194_v2  ;;  %v178_v4 = vld [vmem:[%s270_s2] ss:$0 sm:$0xff]  ;;  %v146_v21 = vld [vmem:[%s272_s4 + $0x8] sm:$0xff] }
   0x4   :  { %186 = vmatprep.subr.bf16.mxu0 %v193_v1  ;;  %v179_v6 = vld [vmem:[%s271_s3] ss:$0 sm:$0xff] }
   0x5   :  { %v145_v13 = vld [vmem:[%s272_s4] sm:$0xff] }
   0x7   :  { %187 = vmatpush3.bf16.msra.mxu0 %v193_v1 }
   0xa   :  { %189 = vmatmul.mubr.msk.bf16.vlgmr.msra.gmra.mrb[0].mxu0 %vm63_vm0, %v195_v3 }
  0xdd   :  { %v190_v5 = vpop.f32.mrb[0].mxu0 }
  0xde   :  { %v143_v7 = vadd.f32 %v190_v5, %v178_v4  ;;  %v104_v8 = vpop.f32.mrb[1].mxu0 }
  0xdf   :  { %v141_v10 = vadd.f32 %v178_v4, %v104_v8  ;;  %v191_v11 = vpop.f32.mrb[2].mxu0 }
  0xe0   :  { %v158_v12 = vmul.f32 %v179_v6, %v143_v7  ;;  %v144_v14 = vadd.f32 %v191_v11, %v178_v4  ;;  %v107_v15 = vpop.f32.mrb[3].mxu0 }
  0xe1   :  { %v156_v16 = vmul.f32 %v179_v6, %v141_v10  ;;  %v142_v18 = vadd.f32 %v178_v4, %v107_v15 }
  0xe2   :  { %v162_v19 = vadd.f32 %v158_v12, %v147_v9  ;;  %v159_v20 = vmul.f32 %v179_v6, %v144_v14 }
  0xe3   :  { %v160_v22 = vadd.f32 %v156_v16, %v145_v13  ;;  %v157_v23 = vmul.f32 %v179_v6, %v142_v18 }
  0xe4   :  { %166 = vst [vmem:[%s273_s5 + $0x10] sm:$0xff] %v162_v19  ;;  %v163_v24 = vadd.f32 %v159_v20, %v148_v17 }
  0xe5   :  { %164 = vst [vmem:[%s273_s5] sm:$0xff] %v160_v22  ;;  %v161_v25 = vadd.f32 %v157_v23, %v146_v21 }
  0xe6   :  { %167 = vst [vmem:[%s273_s5 + $0x18] sm:$0xff] %v163_v24 }
  0xe7   :  { %165 = vst [vmem:[%s273_s5 + $0x8] sm:$0xff] %v161_v25 }

// kernel: _lambda_.30
= control target key start
LH: loop header
LB: loop body
LE: loop exit
PB: predicated region body
PF: predicated region fallthrough
CT: control target
= control target key end

     0   :  { %v20_v1 = vlaneseq  ;;  %s87_s0 = inlined_call_operand.vmem [shape: f32[8,128], index: 0, kind: input, shape index: {}]   ;;  %s88_s1 = inlined_call_operand.vmem [shape: f32[1,128], index: 1, kind: input, shape index: {}]   ;;  %s89_s2 = inlined_call_operand.vmem [shape: f32[1,128], index: 2, kind: input, shape index: {}]   ;;  %s90_s3 = inlined_call_operand.vmem [shape: f32[8,128], index: 3, kind: output, shape index: {}]  }
   0x1   :  { %v14_v0 = vld [vmem:[%s87_s0] sm:$0xff] }
   0x2   :  { %17 = vadd.xlane.f32.xlu0 %v14_v0  ;;  %v21_v2 = vand.u32 127, %v20_v1  ;;  %v51_v12 = vld [vmem:[%s88_s1] ss:$0 sm:$0xff] }
   0x3   :  { %v52_v14 = vld [vmem:[%s89_s2] ss:$0 sm:$0xff] }
   0x4   :  { %vm22_vm0 = vcmp.lt.s32.totalorder %v21_v2, 32 }
  0x8f   :  { %v18_v3 = vpop.xlane.xlu0 %17 }
  0x90   :  { %v19_v4 = vmul.f32 0.03125, %v18_v3 }
  0x92   :  { %v23_v5 = vsub.f32 %v14_v0, %v19_v4 }
  0x94   :  { %v24_v6 = vsel %vm22_vm0, %v23_v5, 0.0 }
  0x95   :  { %v25_v7 = vmul.f32 %v24_v6, %v24_v6 }
  0x97   :  { %26 = vadd.xlane.f32.xlu0 %v25_v7 }
 0x124   :  { %v27_v8 = vpop.xlane.xlu0 %26 }
 0x125   :  { %v28_v9 = vmul.f32 0.03125, %v27_v8 }
 0x127   :  { %v29_v10 = vadd.f32 1e-05, %v28_v9 }
 0x129   :  { %53 = vrsqrt.f32 %v29_v10 }
 0x133   :  { %v54_v11 = vpop.eup %53 }
 0x134   :  { %v31_v13 = vmul.f32 %v54_v11, %v24_v6 }
 0x136   :  { %v38_v15 = vmul.f32 %v51_v12, %v31_v13 }
 0x138   :  { %v45_v16 = vadd.f32 %v52_v14, %v38_v15 }
 0x13a   :  { %46 = vst [vmem:[%s90_s3] sm:$0xff] %v45_v16 }

// kernel: _lambda_.32
= control target key start
LH: loop header
LB: loop body
LE: loop exit
PB: predicated region body
PF: predicated region fallthrough
CT: control target
= control target key end

     0   :  { %vm19_vm0 = vcmask 523264   ;;  %v304_v0 = vmov 0.0   ;;  %vm305_vm1 = vmmov 0   ;;  %vm210_vm2 = vcmask 519168   ;;  %s401_s1 = inlined_call_operand.vmem [shape: bf16[128,64], index: 1, kind: input, shape index: {}]   ;;  %s402_s0 = inlined_call_operand.vmem [shape: f32[40,128], index: 0, kind: input, shape index: {}]   ;;  %s403_s2 = inlined_call_operand.vmem [shape: f32[1,64], index: 2, kind: input, shape index: {}]   ;;  %s404_s3 = inlined_call_operand.vmem [shape: bf16[40,64], index: 3, kind: output, shape index: {}]  }
   0x1   :  { %278 = vmatprep.subr.bf16.mxu1 %v304_v0  ;;  %v296_v1 = vld [vmem:[%s401_s1] sm:$0xff]   ;;  %250 = vmatprep.subr.bf16.mxu0 %v304_v0  ;;  %22 = vst.msk [vmem:[#allocation2 + $0x10] sm:$0xff] %vm19_vm0, %v304_v0  ;;  %20 = vst.msk [vmem:[#allocation2] sm:$0xff] %vm19_vm0, %v304_v0  ;;  %v297_v2 = vld [vmem:[%s401_s1 + $0x8] sm:$0xff]  }
   0x2   :  { %21 = vst.msk [vmem:[#allocation2 + $0x8] sm:$0xff] %vm19_vm0, %v304_v0  ;;  %23 = vst.msk [vmem:[#allocation2 + $0x18] sm:$0xff] %vm19_vm0, %v304_v0  ;;  %270 = vmatprep.mubr.msk.bf16.mxu1 %vm305_vm1, %v304_v0  ;;  %266 = vmatprep.mubr.msk.bf16.mxu0 %vm305_vm1, %v304_v0  ;;  %v298_v3 = vld [vmem:[%s401_s1 + $0x10] sm:$0xff]   ;;  %v299_v4 = vld [vmem:[%s401_s1 + $0x18] sm:$0xff]  }
   0x3   :  { %24 = vst.msk [vmem:[#allocation2 + $0x20] sm:$0xff] %vm19_vm0, %v304_v0  ;;  %286 = vmatpush3.bf16.msra.mxu1 %v296_v1  ;;  %251 = vmatpush3.bf16.msra.mxu0 %v296_v1  ;;  %v300_v5 = vld [vmem:[%s401_s1 + $0x20] sm:$0xff]   ;;  %v301_v6 = vld [vmem:[%s401_s1 + $0x28] sm:$0xff]   ;;  %v302_v7 = vld [vmem:[%s401_s1 + $0x30] sm:$0xff]  }
   0x4   :  { %279 = vmatprep.subr.bf16.mxu1 %v304_v0  ;;  %252 = vmatprep.subr.bf16.mxu0 %v304_v0  ;;  %v303_v8 = vld [vmem:[%s401_s1 + $0x38] sm:$0xff]   ;;  %v32_v9 = vld [vmem:[%s402_s0 + $0x10] sm:$0xff]  ;;  %v30_v11 = vld [vmem:[%s402_s0] sm:$0xff] }
   0x5   :  { %v33_v10 = vld [vmem:[%s402_s0 + $0x18] sm:$0xff]  ;;  %v31_v12 = vld [vmem:[%s402_s0 + $0x8] sm:$0xff]  ;;  %v34_v15 = vld [vmem:[%s402_s0 + $0x20] sm:$0xff] }
   0x6   :  { %v36_v13 = vpack.c.bf16 %v33_v10, %v32_v9  ;;  %v35_v14 = vpack.c.bf16 %v31_v12, %v30_v11  ;;  %v37_v16 = vpack.c.bf16 %v34_v15, %v34_v15  ;;  %v228_v34 = vld [vmem:[%s403_s2] ss:$0 sm:$0xff] }
   0x7   :  { %287 = vmatpush3.bf16.msra.mxu1 %v297_v2  ;;  %253 = vmatpush3.bf16.msra.mxu0 %v297_v2 }
   0x8   :  { %280 = vmatprep.subr.bf16.mxu1 %v304_v0  ;;  %254 = vmatprep.subr.bf16.mxu0 %v304_v0  ;;  %v27_v17 = vld [vmem:[#allocation2 + $0x10] sm:$0xff]  ;;  %v25_v18 = vld [vmem:[#allocation2] sm:$0xff] }
   0x9   :  { %v28_v20 = vld [vmem:[#allocation2 + $0x18] sm:$0xff]  ;;  %v26_v22 = vld [vmem:[#allocation2 + $0x8] sm:$0xff] }
   0xa   :  { %v29_v33 = vld [vmem:[#allocation2 + $0x20] sm:$0xff] }
   0xb   :  { %288 = vmatpush3.bf16.msra.mxu1 %v298_v3  ;;  %255 = vmatpush3.bf16.msra.mxu0 %v298_v3 }
   0xc   :  { %281 = vmatprep.subr.bf16.mxu1 %v304_v0  ;;  %256 = vmatprep.subr.bf16.mxu0 %v304_v0 }
   0xf   :  { %289 = vmatpush3.bf16.msra.mxu1 %v299_v4  ;;  %257 = vmatpush3.bf16.msra.mxu0 %v299_v4 }
  0x10   :  { %282 = vmatprep.subr.bf16.mxu1 %v304_v0  ;;  %258 = vmatprep.subr.bf16.mxu0 %v304_v0 }
  0x13   :  { %290 = vmatpush3.bf16.msra.mxu1 %v300_v5  ;;  %259 = vmatpush3.bf16.msra.mxu0 %v300_v5 }
  0x14   :  { %283 = vmatprep.subr.bf16.mxu1 %v304_v0  ;;  %260 = vmatprep.subr.bf16.mxu0 %v304_v0 }
  0x17   :  { %291 = vmatpush3.bf16.msra.mxu1 %v301_v6  ;;  %261 = vmatpush3.bf16.msra.mxu0 %v301_v6 }
  0x18   :  { %284 = vmatprep.subr.bf16.mxu1 %v304_v0  ;;  %262 = vmatprep.subr.bf16.mxu0 %v304_v0 }
  0x1b   :  { %292 = vmatpush3.bf16.msra.mxu1 %v302_v7  ;;  %263 = vmatpush3.bf16.msra.mxu0 %v302_v7 }
  0x1c   :  { %285 = vmatprep.subr.bf16.mxu1 %v304_v0  ;;  %264 = vmatprep.subr.bf16.mxu0 %v304_v0 }
  0x1f   :  { %293 = vmatpush3.bf16.msra.mxu1 %v303_v8  ;;  %265 = vmatpush3.bf16.msra.mxu0 %v303_v8 }
  0x22   :  { %271 = vmatmul.mubr.bf16.vlgmr.msra.gmra.mrb[0].mxu1 %v36_v13  ;;  %267 = vmatmul.mubr.bf16.vlgmr.msra.gmra.mrb[0].mxu0 %v35_v14 }
  0x23   :  { %274 = vmatprep.mubr.msk.bf16.mxu1 %vm305_vm1, %v304_v0 }
  0x2a   :  { %275 = vmatmul.mubr.bf16.gmra.mrb[4].mxu1 %v37_v16 }
  0xf5   :  { %v144_v19 = vpop.f32.mrb[0].mxu1  ;;  %v136_v21 = vpop.f32.mrb[0].mxu0 }
  0xf6   :  { %v160_v23 = vadd.f32 %v144_v19, %v27_v17  ;;  %v272_v24 = vpop.f32.mrb[1].mxu1  ;;  %v158_v25 = vadd.f32 %v136_v21, %v25_v18  ;;  %v268_v26 = vpop.f32.mrb[1].mxu0 }
  0xf7   :  { %v147_v27 = vpop.f32.mrb[2].mxu1  ;;  %v139_v28 = vpop.f32.mrb[2].mxu0 }
  0xf8   :  { %166 = vst.msk [vmem:[#allocation2 + $0x10] sm:$0xff] %vm19_vm0, %v160_v23  ;;  %v161_v29 = vadd.f32 %v147_v27, %v28_v20  ;;  %164 = vst.msk [vmem:[#allocation2] sm:$0xff] %vm19_vm0, %v158_v25  ;;  %v273_v30 = vpop.f32.mrb[3].mxu1  ;;  %v159_v31 = vadd.f32 %v139_v28, %v26_v22  ;;  %v269_v32 = vpop.f32.mrb[3].mxu0 }
  0xfa   :  { %167 = vst.msk [vmem:[#allocation2 + $0x18] sm:$0xff] %vm19_vm0, %v161_v29  ;;  %165 = vst.msk [vmem:[#allocation2 + $0x8] sm:$0xff] %vm19_vm0, %v159_v31 }
  0xfd   :  { %v152_v35 = vpop.f32.mrb[4].mxu1 }
  0xfe   :  { %v162_v36 = vadd.f32 %v152_v35, %v29_v33  ;;  %v276_v37 = vpop.f32.mrb[5].mxu1 }
  0xff   :  { %v174_v38 = vld [vmem:[#allocation2 + $0x10] sm:$0xff]  ;;  %v172_v39 = vld [vmem:[#allocation2] sm:$0xff]  ;;  %v155_v40 = vpop.f32.mrb[6].mxu1 }
 0x100   :  { %v186_v41 = vadd.f32 %v228_v34, %v174_v38  ;;  %v184_v42 = vadd.f32 %v228_v34, %v172_v39  ;;  %168 = vst.msk [vmem:[#allocation2 + $0x20] sm:$0xff] %vm19_vm0, %v162_v36  ;;  %v277_v43 = vpop.f32.mrb[7].mxu1 }
 0x101   :  { %v175_v44 = vld [vmem:[#allocation2 + $0x18] sm:$0xff]  ;;  %v173_v45 = vld [vmem:[#allocation2 + $0x8] sm:$0xff] }
 0x102   :  { %v236_v46 = vpack.c.bf16 %v186_v41, %v186_v41  ;;  %v187_v47 = vadd.f32 %v228_v34, %v175_v44  ;;  %v234_v48 = vpack.c.bf16 %v184_v42, %v184_v42  ;;  %v185_v49 = vadd.f32 %v228_v34, %v173_v45 }
 0x104   :  { %213 = vst.msk [vmem:[%s404_s3 + $0x8] sm:$0xf] %vm210_vm2, %v236_v46  ;;  %v237_v50 = vpack.c.bf16 %v187_v47, %v187_v47  ;;  %211 = vst.msk [vmem:[%s404_s3] sm:$0xf] %vm210_vm2, %v234_v48  ;;  %v235_v51 = vpack.c.bf16 %v185_v49, %v185_v49 }
 0x106   :  { %214 = vst.msk [vmem:[%s404_s3 + $0xc] sm:$0xf] %vm210_vm2, %v237_v50  ;;  %212 = vst.msk [vmem:[%s404_s3 + $0x4] sm:$0xf] %vm210_vm2, %v235_v51 }
 0x107   :  { %v176_v52 = vld [vmem:[#allocation2 + $0x20] sm:$0xff] }
 0x108   :  { %v188_v53 = vadd.f32 %v228_v34, %v176_v52 }
 0x10a   :  { %v238_v54 = vpack.c.bf16 %v188_v53, %v188_v53 }
 0x10c   :  { %215 = vst.msk [vmem:[%s404_s3 + $0x10] sm:$0xf] %vm210_vm2, %v238_v54 }

// kernel: _lambda_.31
= control target key start
LH: loop header
LB: loop body
LE: loop exit
PB: predicated region body
PF: predicated region fallthrough
CT: control target
= control target key end

     0   :  { %vm19_vm0 = vcmask 261120   ;;  %v198_v0 = vmov 0.0   ;;  %vm199_vm1 = vmmov 0   ;;  %vm144_vm2 = vcmask 257024   ;;  %s255_s1 = inlined_call_operand.vmem [shape: bf16[128,32], index: 1, kind: input, shape index: {}]   ;;  %s256_s0 = inlined_call_operand.vmem [shape: f32[8,128], index: 0, kind: input, shape index: {}]   ;;  %s257_s2 = inlined_call_operand.vmem [shape: f32[1,32], index: 2, kind: input, shape index: {}]   ;;  %s258_s3 = inlined_call_operand.vmem [shape: bf16[8,32], index: 3, kind: output, shape index: {}]  }
   0x1   :  { %168 = vmatprep.subr.bf16.mxu0 %v198_v0  ;;  %v190_v1 = vld [vmem:[%s255_s1] sm:$0xff]   ;;  %184 = vmatprep.mubr.msk.bf16.mxu0 %vm199_vm1, %v198_v0  ;;  %20 = vst.msk [vmem:[#allocation2] sm:$0xff] %vm19_vm0, %v198_v0  ;;  %v191_v2 = vld [vmem:[%s255_s1 + $0x8] sm:$0xff]   ;;  %v192_v3 = vld [vmem:[%s255_s1 + $0x10] sm:$0xff]  }
   0x2   :  { %169 = vmatpush3.bf16.msra.mxu0 %v190_v1  ;;  %v193_v4 = vld [vmem:[%s255_s1 + $0x18] sm:$0xff]   ;;  %v194_v5 = vld [vmem:[%s255_s1 + $0x20] sm:$0xff]   ;;  %v195_v6 = vld [vmem:[%s255_s1 + $0x28] sm:$0xff]  }
   0x3   :  { %170 = vmatprep.subr.bf16.mxu0 %v198_v0  ;;  %v196_v7 = vld [vmem:[%s255_s1 + $0x30] sm:$0xff]   ;;  %v197_v8 = vld [vmem:[%s255_s1 + $0x38] sm:$0xff]   ;;  %v22_v9 = vld [vmem:[%s256_s0] sm:$0xff] }
   0x4   :  { %v23_v10 = vpack.c.bf16 %v22_v9, %v22_v9  ;;  %v158_v17 = vld [vmem:[%s257_s2] ss:$0 sm:$0xff] }
   0x6   :  { %171 = vmatpush3.bf16.msra.mxu0 %v191_v2 }
   0x7   :  { %172 = vmatprep.subr.bf16.mxu0 %v198_v0 }
   0x8   :  { %v21_v11 = vld [vmem:[#allocation2] sm:$0xff] }
   0xa   :  { %173 = vmatpush3.bf16.msra.mxu0 %v192_v3 }
   0xb   :  { %174 = vmatprep.subr.bf16.mxu0 %v198_v0 }
   0xe   :  { %175 = vmatpush3.bf16.msra.mxu0 %v193_v4 }
   0xf   :  { %176 = vmatprep.subr.bf16.mxu0 %v198_v0 }
  0x12   :  { %177 = vmatpush3.bf16.msra.mxu0 %v194_v5 }
  0x13   :  { %178 = vmatprep.subr.bf16.mxu0 %v198_v0 }
  0x16   :  { %179 = vmatpush3.bf16.msra.mxu0 %v195_v6 }
  0x17   :  { %180 = vmatprep.subr.bf16.mxu0 %v198_v0 }
  0x1a   :  { %181 = vmatpush3.bf16.msra.mxu0 %v196_v7 }
  0x1b   :  { %182 = vmatprep.subr.bf16.mxu0 %v198_v0 }
  0x1e   :  { %183 = vmatpush3.bf16.msra.mxu0 %v197_v8 }
  0x21   :  { %185 = vmatmul.mubr.bf16.vlgmr.msra.gmra.mrb[0].mxu0 %v23_v10 }
  0xf4   :  { %v122_v12 = vpop.f32.mrb[0].mxu0 }
  0xf5   :  { %v128_v13 = vadd.f32 %v122_v12, %v21_v11  ;;  %v186_v14 = vpop.f32.mrb[1].mxu0 }
  0xf6   :  { %v125_v15 = vpop.f32.mrb[2].mxu0 }
  0xf7   :  { %130 = vst.msk [vmem:[#allocation2] sm:$0xff] %vm19_vm0, %v128_v13  ;;  %v187_v16 = vpop.f32.mrb[3].mxu0 }
  0xfe   :  { %v134_v18 = vld [vmem:[#allocation2] sm:$0xff] }
  0xff   :  { %v142_v19 = vadd.f32 %v158_v17, %v134_v18 }
 0x101   :  { %v143_v20 = vpack.c.bf16 %v142_v19, %v142_v19 }
 0x103   :  { %145 = vst.msk [vmem:[%s258_s3] sm:$0xf] %vm144_vm2, %v143_v20 }

// kernel: _lambda_.34
= control target key start
LH: loop header
LB: loop body
LE: loop exit
PB: predicated region body
PF: predicated region fallthrough
CT: control target
= control target key end

     0   :  { %v137_v0 = vmov 0.0   ;;  %vm138_vm0 = vmmov 0   ;;  %vm44_vm1 = vcmask 261120   ;;  %s190_s1 = inlined_call_operand.vmem [shape: bf16[32,128], index: 1, kind: input, shape index: {}]   ;;  %s191_s0 = inlined_call_operand.vmem [shape: bf16[8,32], index: 0, kind: input, shape index: {}]   ;;  %s192_s2 = inlined_call_operand.vmem [shape: f32[1,128], index: 2, kind: input, shape index: {}]   ;;  %s193_s3 = inlined_call_operand.vmem [shape: f32[1,128], index: 3, kind: input, shape index: {}]   ;;  %s194_s4 = inlined_call_operand.vmem [shape: f32[8,128], index: 4, kind: input, shape index: {}]   ;;  %s195_s5 = inlined_call_operand.vmem [shape: f32[8,128], index: 5, kind: output, shape index: {}]  }
   0x1   :  { %125 = vmatprep.subr.bf16.mxu0 %v137_v0  ;;  %v135_v1 = vld [vmem:[%s190_s1] sm:$0xff]   ;;  %129 = vmatprep.mubr.msk.bf16.mxu0 %vm138_vm0, %v137_v0  ;;  %v136_v2 = vld [vmem:[%s190_s1 + $0x8] sm:$0xff]  }
   0x2   :  { %126 = vmatpush3.bf16.msra.mxu0 %v135_v1  ;;  %v27_v3 = vld [vmem:[%s191_s0] sm:$0xf] }
   0x3   :  { %127 = vmatprep.subr.bf16.mxu0 %v137_v0  ;;  %v120_v4 = vld [vmem:[%s192_s2] ss:$0 sm:$0xff] }
   0x4   :  { %v121_v6 = vld [vmem:[%s193_s3] ss:$0 sm:$0xff] }
   0x5   :  { %v102_v9 = vld [vmem:[%s194_s4] sm:$0xff] }
   0x6   :  { %128 = vmatpush3.bf16.msra.mxu0 %v136_v2 }
   0x9   :  { %130 = vmatmul.mubr.msk.bf16.vlgmr.msra.gmra.mrb[0].mxu0 %vm44_vm1, %v27_v3 }
  0xdc   :  { %v82_v5 = vpop.f32.mrb[0].mxu0 }
  0xdd   :  { %v101_v7 = vadd.f32 %v120_v4, %v82_v5  ;;  %v131_v8 = vpop.f32.mrb[1].mxu0 }
  0xde   :  { %v85_v10 = vpop.f32.mrb[2].mxu0 }
  0xdf   :  { %v110_v11 = vmul.f32 %v121_v6, %v101_v7  ;;  %v132_v12 = vpop.f32.mrb[3].mxu0 }
  0xe1   :  { %v111_v13 = vadd.f32 %v110_v11, %v102_v9 }
  0xe3   :  { %112 = vst [vmem:[%s195_s5] sm:$0xff] %v111_v13 }

// kernel: _lambda_.35
= control target key start
LH: loop header
LB: loop body
LE: loop exit
PB: predicated region body
PF: predicated region fallthrough
CT: control target
= control target key end

     0   :  { %v236_v1 = vmov 0.0   ;;  %v31_v2 = vlaneseq  ;;  %vm237_vm1 = vmmov 0   ;;  %s307_s0 = inlined_call_operand.vmem [shape: f32[8,128], index: 0, kind: input, shape index: {}]   ;;  %s308_s3 = inlined_call_operand.vmem [shape: bf16[128,128], index: 3, kind: input, shape index: {}]   ;;  %s309_s1 = inlined_call_operand.vmem [shape: f32[1,128], index: 1, kind: input, shape index: {}]   ;;  %s310_s2 = inlined_call_operand.vmem [shape: f32[1,128], index: 2, kind: input, shape index: {}]   ;;  %s311_s4 = inlined_call_operand.vmem [shape: f32[1,128], index: 4, kind: input, shape index: {}]   ;;  %s312_s5 = inlined_call_operand.vmem [shape: bf16[8,128], index: 5, kind: output, shape index: {}]  }
   0x1   :  { %v25_v0 = vld [vmem:[%s307_s0] sm:$0xff]  ;;  %202 = vmatprep.subr.bf16.mxu0 %v236_v1  ;;  %v225_v10 = vld [vmem:[%s308_s3 + $0x8] sm:$0xff]   ;;  %v226_v11 = vld [vmem:[%s308_s3 + $0x10] sm:$0xff]   ;;  %218 = vmatprep.mubr.msk.bf16.mxu0 %vm237_vm1, %v236_v1 }
   0x2   :  { %28 = vadd.xlane.f32.xlu0 %v25_v0  ;;  %v32_v3 = vand.u32 127, %v31_v2  ;;  %v224_v9 = vld [vmem:[%s308_s3] sm:$0xff]   ;;  %v227_v12 = vld [vmem:[%s308_s3 + $0x18] sm:$0xff]   ;;  %v229_v14 = vld [vmem:[%s308_s3 + $0x28] sm:$0xff]  }
   0x3   :  { %203 = vmatpush3.bf16.msra.mxu0 %v224_v9  ;;  %v228_v13 = vld [vmem:[%s308_s3 + $0x20] sm:$0xff]   ;;  %v230_v15 = vld [vmem:[%s308_s3 + $0x30] sm:$0xff]   ;;  %v231_v16 = vld [vmem:[%s308_s3 + $0x38] sm:$0xff]  }
   0x4   :  { %vm33_vm0 = vcmp.lt.s32.totalorder %v32_v3, 32  ;;  %204 = vmatprep.subr.bf16.mxu0 %v236_v1  ;;  %v182_v21 = vld [vmem:[%s309_s1] ss:$0 sm:$0xff] }
   0x5   :  { %v183_v23 = vld [vmem:[%s310_s2] ss:$0 sm:$0xff] }
   0x6   :  { %v184_v28 = vld [vmem:[%s311_s4] ss:$0 sm:$0xff] }
   0x7   :  { %205 = vmatpush3.bf16.msra.mxu0 %v225_v10 }
   0x8   :  { %206 = vmatprep.subr.bf16.mxu0 %v236_v1 }
   0xb   :  { %207 = vmatpush3.bf16.msra.mxu0 %v226_v11 }
   0xc   :  { %208 = vmatprep.subr.bf16.mxu0 %v236_v1 }
   0xf   :  { %209 = vmatpush3.bf16.msra.mxu0 %v227_v12 }
  0x10   :  { %210 = vmatprep.subr.bf16.mxu0 %v236_v1 }
  0x13   :  { %211 = vmatpush3.bf16.msra.mxu0 %v228_v13 }
  0x14   :  { %212 = vmatprep.subr.bf16.mxu0 %v236_v1 }
  0x17   :  { %213 = vmatpush3.bf16.msra.mxu0 %v229_v14 }
  0x18   :  { %214 = vmatprep.subr.bf16.mxu0 %v236_v1 }
  0x1b   :  { %215 = vmatpush3.bf16.msra.mxu0 %v230_v15 }
  0x1c   :  { %216 = vmatprep.subr.bf16.mxu0 %v236_v1 }
  0x1f   :  { %217 = vmatpush3.bf16.msra.mxu0 %v231_v16 }
  0x8f   :  { %v29_v4 = vpop.xlane.xlu0 %28 }
  0x90   :  { %v30_v5 = vmul.f32 0.03125, %v29_v4 }
  0x92   :  { %v34_v6 = vsub.f32 %v25_v0, %v30_v5 }
  0x94   :  { %v35_v7 = vsel %vm33_vm0, %v34_v6, 0.0 }
  0x95   :  { %v36_v8 = vmul.f32 %v35_v7, %v35_v7 }
  0x97   :  { %37 = vadd.xlane.f32.xlu0 %v36_v8 }
 0x124   :  { %v38_v17 = vpop.xlane.xlu0 %37 }
 0x125   :  { %v39_v18 = vmul.f32 0.03125, %v38_v17 }
 0x127   :  { %v40_v19 = vadd.f32 1e-05, %v39_v18 }
 0x129   :  { %232 = vrsqrt.f32 %v40_v19 }
 0x133   :  { %v233_v20 = vpop.eup %232 }
 0x134   :  { %v42_v22 = vmul.f32 %v233_v20, %v35_v7 }
 0x136   :  { %v49_v24 = vmul.f32 %v182_v21, %v42_v22 }
 0x138   :  { %v56_v25 = vadd.f32 %v183_v23, %v49_v24 }
 0x13a   :  { %v57_v26 = vpack.c.bf16 %v56_v25, %v56_v25 }
 0x13c   :  { %58 = vst [vmem:[#allocation2] sm:$0xf] %v57_v26 }
 0x143   :  { %v59_v27 = vld [vmem:[#allocation2] sm:$0xf] }
 0x144   :  { %219 = vmatmul.mubr.bf16.vlgmr.msra.gmra.mrb[0].mxu0 %v59_v27 }
 0x217   :  { %v165_v29 = vpop.f32.mrb[0].mxu0 }
 0x218   :  { %v166_v30 = vadd.f32 %v184_v28, %v165_v29  ;;  %v220_v31 = vpop.f32.mrb[1].mxu0 }
 0x219   :  { %v168_v32 = vpop.f32.mrb[2].mxu0 }
 0x21a   :  { %v172_v33 = vmul.f32 0.70710677, %v166_v30  ;;  %v221_v34 = vpop.f32.mrb[3].mxu0  ;;  %v171_v36 = vmul.f32 0.5, %v166_v30 }
 0x21c   :  { %234 = verf.f32 %v172_v33 }
 0x226   :  { %v235_v35 = vpop.eup %234 }
 0x227   :  { %v174_v37 = vadd.f32 1.0, %v235_v35 }
 0x229   :  { %v175_v38 = vmul.f32 %v174_v37, %v171_v36 }
 0x22b   :  { %v176_v39 = vpack.c.bf16 %v175_v38, %v175_v38 }
 0x22d   :  { %177 = vst [vmem:[%s312_s5] sm:$0xf] %v176_v39 }

// kernel: _lambda_.33
= control target key start
LH: loop header
LB: loop body
LE: loop exit
PB: predicated region body
PF: predicated region fallthrough
CT: control target
= control target key end

     0   :  { %10 = vsyncpa [#allocation3], 0  ;;  %s1706_s0 = inlined_call_operand.vmem [shape: f32[4,4], index: 0, kind: input, shape index: {}]   ;;  %s1707_s1 = inlined_call_operand.vmem [shape: f32[4,4], index: 1, kind: input, shape index: {}]   ;;  %s1708_s2 = inlined_call_operand.vmem [shape: bf16[2,4,1,8], index: 2, kind: input, shape index: {}]   ;;  %s1709_s3 = inlined_call_operand.vmem [shape: bf16[2,4,17,8], index: 3, kind: input, shape index: {}]   ;;  %s1710_s4 = inlined_call_operand.vmem [shape: bf16[2,4,17,8], index: 4, kind: input, shape index: {}]   ;;  %s1711_s5 = inlined_call_operand.vmem [shape: bf16[2,4,1,8], index: 5, kind: output, shape index: {}]  }
   0x1   :  { %11 = vsyncpa [#allocation5], 0  ;;  %s1456_s18 = smov 0   ;;  %s1458_s19 = smov 0  }
   0x2   :  { %s1460_s20 = smov 0  }
   0x3 LB: > { %s1121_s21 = sadd.s32 4294967295, %s1419_s20   ;;  %s29_s22 = sadd.s32 1, %s1415_s19  ;;  %s1419_s20 = sphi %s1460_s20, %s17_s20   ;;  %s1415_s19 = sphi %s1458_s19, %s1723_s19   ;;  %s1411_s18 = sphi %s1456_s18, %s1722_s18  }
   0x4   : > { %p31_p0 = scmp.ge.s32.totalorder %s29_s22, 2  ;;  %p1123_p1 = scmp.ge.s32.totalorder %s1419_s20, 1 }
   0x5   : > { %p184_p2 = scmp.lt.s32.totalorder %s1419_s20, 3  ;;  %p1481_p4 = scmp.eq.s32.totalorder %s1121_s21, 0 }
   0x6   : > { %s1725_s22 = smov (%p31_p0, %s29_s22), 0  ;;  %s197_s27 = sshll.u32 %s1706_s0, 4  ;;  %s198_s27 = int_to_ptr.vmem [resolvable:$true] %s197_s27 }
   0x7   : > { %p1477_p3 = pnand %p1123_p1, %p184_p2  ;;  %s208_s30 = sshll.u32 %s1707_s1, 4  ;;  %s209_s30 = int_to_ptr.vmem [resolvable:$true] %s208_s30 }
   0x8   : > { %s1716_s24 = scalar_select %p1481_p4, 1, 0 }
   0x9   : > { %s1715_s23 = scalar_select %p1477_p3, 1, 0 }
   0xa   : > { %p1287_p5 = pneg %p1477_p3  ;;  %s1359_s7 = scalar_lea.vmem %s198_s27, 64 }
   0xb   : > { %p1360_p7 = scmp.ne.s32.totalorder %s198_s27, %s1359_s7  ;;  %p1367_p11 = scmp.lt.s32.totalorder %s198_s27, %s198_s27 }
   0xc   : > { %p1495_p6 = pnand %p1481_p4, %p1287_p5  ;;  %p1368_p12 = scmp.lt.s32.totalorder %s1359_s7, %s1359_s7 }
   0xe   : > { %p1361_p8 = pneg %p1495_p6  ;;  %p1369_p13 = por %p1368_p12, %p1367_p11 }
  0x10   : > { %p1362_p9 = pnand %p1361_p8, %p1360_p7 }
  0x12   : > { %p1363_p10 = pneg %p1362_p9 }
  0x14   : > { %p1370_p0 = pnand %p1369_p13, %p1363_p10 }
  0x16   : > { %1373 = shalt.err (!%p1370_p0)
}
  0x17   : > { %s1421_s8 = smov [#allocation2]   ;;  %s1374_s9 = scalar_lea.vmem %s209_s30, 64 }
  0x18   : > { %1290 = dma.vmem_to_smem (!%p1495_p6), %s198_s27, 64, %s1421_s8, [#allocation3]  }
  0x19   : > { %p1375_p1 = scmp.ne.s32.totalorder %s209_s30, %s1374_s9  ;;  %p1382_p4 = scmp.lt.s32.totalorder %s209_s30, %s209_s30 }
  0x1a   : > { %p1383_p3 = scmp.lt.s32.totalorder %s1374_s9, %s1374_s9 }
  0x1b   : > { %p1377_p2 = pnand %p1375_p1, %p1361_p8 }
  0x1c   : > { %p1384_p7 = por %p1383_p3, %p1382_p4 }
  0x1d   : > { %p1378_p5 = pneg %p1377_p2 }
  0x1f   : > { %p1385_p9 = pnand %p1384_p7, %p1378_p5 }
  0x21   : > { %1388 = shalt.err (!%p1385_p9)
}
  0x22   : > { %s1422_s10 = smov [#allocation4]   ;;  %p1718_p10 = scmp.ne.s32.totalorder %s1715_s23, 0 }
  0x23   : > { %1293 = dma.vmem_to_smem (!%p1495_p6), %s209_s30, 64, %s1422_s10, [#allocation5]  }
  0x24   : > { %247 = sbr.rel (%p1718_p10) target bundleno = 859 (0x35b), region = 40  ;;  %p1719_p11 = scmp.ne.s32.totalorder (!%p1718_p10), %s1716_s24, 0 }
  0x2b   : > { %1402 = dma.done.wait (%p1719_p11), [#allocation3], 64  }
  0x2c   : > { %1404 = vsyncadd (%p1719_p11), [#allocation3], 4294967232 }
  0x2d   : > { %1406 = dma.done.wait (%p1719_p11), [#allocation5], 64  }
  0x2e   : > { %1408 = vsyncadd (%p1719_p11), [#allocation5], 4294967232 }
  0x2f   : > { %257 = sfence }
  0x30   : > { %p294_p3 = scmp.lt.s32.totalorder %s1411_s18, 1  ;;  %v1423_v0 = vmov 0.0   ;;  %vm1424_vm0 = vmmov 0   ;;  %vm355_vm1 = vcmask 64512   ;;  %s1153_s26 = sld [smem:[#allocation2 + $0x2]]  ;;  %vm644_vm2 = vcmask 131072  }
  0x31   : > { %1214 = vmatprep.subr.bf16.mxu0 %v1423_v0  ;;  %1222 = vmatprep.subr.bf16.mxu1 %v1423_v0  ;;  %s1154_s27 = sld [smem:[#allocation2 + $0x82]]  ;;  %s580_s28 = sld [smem:[#allocation2]]  ;;  %vm770_vm3 = vcmask 1040384   ;;  %vm766_vm4 = vcmask 138240   ;;  %vm985_vm5 = vcmask 57344  }
  0x32   : > { %s1727_s18 = smov (!%p294_p3, %s1411_s18), 1  ;;  %1218 = vmatprep.mubr.msk.bf16.mxu0 %vm1424_vm0, %v1423_v0  ;;  %1226 = vmatprep.mubr.msk.bf16.mxu1 %vm1424_vm0, %v1423_v0  ;;  %s1146_s29 = sld [smem:[#allocation2 + $0x80]]  ;;  %vm986_vm6 = vsmask.f32 256 }
  0x33   : > { %s1278_s11 = smul.u32 48, %s1727_s18  ;;  %s1130_s21 = sshll.u32 %s1727_s18, 2  ;;  %vm1677_vm7 = vmand %vm985_vm5, %vm986_vm6 }
  0x34   : > { %s300_s25 = scalar_lea.vmem %s1708_s2, %s1130_s21  ;;  %s1157_s30 = sld [smem:[#allocation2 + $0x3]] }
  0x35   : > { %s1529_s14 = scalar_lea.vmem %s1709_s3, %s1278_s11  ;;  %s1542_s17 = scalar_lea.vmem %s1710_s4, %s1278_s11  ;;  %v319_v11 = vld [vmem:[%s300_s25] sm:$0x1]  ;;  %v320_v12 = vld [vmem:[%s300_s25 + $0x1] sm:$0x1]  ;;  %v321_v19 = vld [vmem:[%s300_s25 + $0x2] sm:$0x1] }
  0x36   : > { %v1327_v1 = vld [vmem:[%s1529_s14] sm:$0xff]   ;;  %v1328_v2 = vld [vmem:[%s1529_s14 + $0xc] sm:$0xff]   ;;  %v1329_v4 = vld [vmem:[%s1529_s14 + $0x8] ss:$0 sps:$4 sm:$0x11]   ;;  %s1149_s6 = sld [smem:[#allocation2 + $0x1]]  ;;  %v613_v21 = vstv %s1153_s26 }
  0x37   : > { %v360_v3 = vsel %vm355_vm1, %v1327_v1, 0  ;;  %v417_v5 = vsel %vm355_vm1, %v1328_v2, 0  ;;  %v1330_v6 = vld [vmem:[%s1529_s14 + $0x14] ss:$0 sps:$4 sm:$0x11]   ;;  %v363_v7 = vsel %vm355_vm1, %v1329_v4, 0  ;;  %v617_v23 = vstv %s1154_s27 }
  0x38   : > { %1215 = vmatpush3.bf16.xpose.msra.mxu0 %v360_v3  ;;  %1223 = vmatpush3.bf16.xpose.msra.mxu1 %v417_v5  ;;  %v420_v8 = vsel %vm355_vm1, %v1330_v6, 0  ;;  %v1331_v9 = vld [vmem:[%s1529_s14 + $0x18] sm:$0xff]   ;;  %v1332_v10 = vld [vmem:[%s1529_s14 + $0x24] sm:$0xff]   ;;  %v1333_v15 = vld [vmem:[%s1529_s14 + $0x20] ss:$0 sps:$4 sm:$0x11]   ;;  %v581_v24 = vstv %s580_s28 }
  0x39   : > { %1216 = vmatprep.subr.bf16.mxu0 %v1423_v0  ;;  %1224 = vmatprep.subr.bf16.mxu1 %v1423_v0  ;;  %v474_v13 = vsel %vm355_vm1, %v1331_v9, 0  ;;  %v531_v14 = vsel %vm355_vm1, %v1332_v10, 0  ;;  %v1334_v16 = vld [vmem:[%s1529_s14 + $0x2c] ss:$0 sps:$4 sm:$0x11]   ;;  %v477_v17 = vsel %vm355_vm1, %v1333_v15, 0  ;;  %v585_v30 = vstv %s1146_s29 }
  0x3a   : > { %v534_v18 = vsel %vm355_vm1, %v1334_v16, 0  ;;  %v322_v20 = vld [vmem:[%s300_s25 + $0x3] sm:$0x1]  ;;  %s1158_s7 = sld [smem:[#allocation2 + $0x83]]  ;;  %s1150_s8 = sld [smem:[#allocation2 + $0x81]]  ;;  %v629_v25 = vstv %s1157_s30 }
  0x3b   : > { %s1155_s9 = sld [smem:[#allocation2 + $0x102]]  ;;  %s1147_s10 = sld [smem:[#allocation2 + $0x100]] }
  0x3c   : > { %v597_v26 = vstv %s1149_s6  ;;  %s1159_s11 = sld [smem:[#allocation2 + $0x103]]  ;;  %s1151_s12 = sld [smem:[#allocation2 + $0x101]] }
  0x3d   : > { %s1156_s13 = sld [smem:[#allocation2 + $0x182]]  ;;  %s1148_s14 = sld [smem:[#allocation2 + $0x180]] }
  0x3e   : > { %s1160_s15 = sld [smem:[#allocation2 + $0x183]]  ;;  %s1152_s16 = sld [smem:[#allocation2 + $0x181]] }
  0x3f   : > { %s1604_s23 = sld [smem:[#allocation4]]  ;;  %s1606_s24 = sld [smem:[#allocation4 + $0x1]] }
  0x40   : > { %1217 = vmatpush3.bf16.xpose.msra.mxu0 %v363_v7  ;;  %1225 = vmatpush3.bf16.xpose.msra.mxu1 %v420_v8  ;;  %v633_v31 = vstv %s1158_s7  ;;  %v601_v32 = vstv %s1150_s8  ;;  %s1608_s25 = sld [smem:[#allocation4 + $0x2]]  ;;  %s1610_s26 = sld [smem:[#allocation4 + $0x80]] }
  0x41   : > { %1230 = vmatprep.subr.bf16.mxu0 %v1423_v0  ;;  %1238 = vmatprep.subr.bf16.mxu1 %v1423_v0  ;;  %v621_v51 = vstv %s1155_s9  ;;  %v589_v54 = vstv %s1147_s10  ;;  %s1612_s27 = sld [smem:[#allocation4 + $0x3]]  ;;  %s1614_s28 = sld [smem:[#allocation4 + $0x100]] }
  0x42   : > { %v637_v55 = vstv %s1159_s11  ;;  %v605_v56 = vstv %s1151_s12  ;;  %s1616_s29 = sld [smem:[#allocation4 + $0x81]]  ;;  %s1618_s30 = sld [smem:[#allocation4 + $0x82]] }
  0x43   : > { %v625_v53 = vstv %s1156_s13  ;;  %v593_v60 = vstv %s1148_s14  ;;  %s1620_s6 = sld [smem:[#allocation4 + $0x83]]  ;;  %s1622_s7 = sld [smem:[#allocation4 + $0x101]] }
  0x44   : > { %v641_v61 = vstv %s1160_s15  ;;  %v609_v62 = vstv %s1152_s16  ;;  %s1624_s8 = sld [smem:[#allocation4 + $0x102]]  ;;  %s1626_s9 = sld [smem:[#allocation4 + $0x180]] }
  0x45   : > { %s1628_s10 = sld [smem:[#allocation4 + $0x181]]  ;;  %s1630_s11 = sld [smem:[#allocation4 + $0x182]] }
  0x46   : > { %s1632_s12 = sld [smem:[#allocation4 + $0x103]]  ;;  %s1675_s15 = scalar_lea.vmem %s1711_s5, %s1130_s21 }
  0x47   : > { %1219 = vmatmul.mubr.msk.bf16.vlgmr.msra.gmra.mrb[0].mxu0 %vm355_vm1, %v319_v11  ;;  %1227 = vmatmul.mubr.msk.bf16.vlgmr.msra.gmra.mrb[0].mxu1 %vm355_vm1, %v320_v12  ;;  %s1642_s13 = sld [smem:[#allocation4 + $0x183]] }
  0x48   : > { %1231 = vmatpush3.bf16.xpose.msra.mxu0 %v474_v13  ;;  %1239 = vmatpush3.bf16.xpose.msra.mxu1 %v531_v14 }
  0x49   : > { %1232 = vmatprep.subr.bf16.mxu0 %v1423_v0  ;;  %1240 = vmatprep.subr.bf16.mxu1 %v1423_v0 }
  0x4a   : > { %1234 = vmatprep.mubr.msk.bf16.mxu0 %vm1424_vm0, %v1423_v0  ;;  %1242 = vmatprep.mubr.msk.bf16.mxu1 %vm1424_vm0, %v1423_v0 }
  0x50   : > { %1233 = vmatpush3.bf16.xpose.msra.mxu0 %v477_v17  ;;  %1241 = vmatpush3.bf16.xpose.msra.mxu1 %v534_v18 }
  0x51   : > { %1246 = vmatprep.subr.bf16.mxu0 %v1423_v0  ;;  %1254 = vmatprep.subr.bf16.mxu1 %v1423_v0 }
  0x57   : > { %1235 = vmatmul.mubr.msk.bf16.vlgmr.msra.gmra.mrb[4].mxu0 %vm355_vm1, %v321_v19  ;;  %1243 = vmatmul.mubr.msk.bf16.vlgmr.msra.gmra.mrb[4].mxu1 %vm355_vm1, %v322_v20 }
  0x58   : > { %1250 = vmatprep.mubr.msk.bf16.mxu0 %vm1424_vm0, %v1423_v0  ;;  %1258 = vmatprep.mubr.msk.bf16.mxu1 %vm1424_vm0, %v1423_v0 }
 0x11a   : > { %v399_v22 = vpop.f32.mrb[0].mxu0  ;;  %v456_v28 = vpop.f32.mrb[0].mxu1 }
 0x11b   : > { %v576_v27 = vmul.f32 0.35355338, %v399_v22  ;;  %v1220_v29 = vpop.f32.mrb[1].mxu0  ;;  %v577_v33 = vmul.f32 0.35355338, %v456_v28  ;;  %v1228_v34 = vpop.f32.mrb[1].mxu1 }
 0x11c   : > { %v402_v35 = vpop.f32.mrb[2].mxu0  ;;  %v459_v36 = vpop.f32.mrb[2].mxu1 }
 0x11d   : > { %v1221_v37 = vpop.f32.mrb[3].mxu0  ;;  %v614_v38 = vmul.f32 %v613_v21, %v576_v27  ;;  %v582_v39 = vmul.f32 %v581_v24, %v576_v27  ;;  %v630_v40 = vmul.f32 %v629_v25, %v576_v27  ;;  %v598_v41 = vmul.f32 %v597_v26, %v576_v27  ;;  %v1229_v42 = vpop.f32.mrb[3].mxu1 }
 0x11e   : > { %v618_v43 = vmul.f32 %v617_v23, %v577_v33  ;;  %v586_v44 = vmul.f32 %v585_v30, %v577_v33  ;;  %v634_v45 = vmul.f32 %v633_v31, %v577_v33  ;;  %v602_v46 = vmul.f32 %v601_v32, %v577_v33 }
 0x120   : > { %v619_v47 = vadd.f32 %v618_v43, %v614_v38  ;;  %v587_v48 = vadd.f32 %v586_v44, %v582_v39  ;;  %v635_v49 = vadd.f32 %v634_v45, %v630_v40  ;;  %v603_v50 = vadd.f32 %v602_v46, %v598_v41  ;;  %v1335_v46 = vld [vmem:[%s1542_s17] sm:$0xff]  }
 0x121   : > { %1247 = vmatpush3.bf16.msra.mxu0 %v1335_v46 }
 0x122   : > { %1248 = vmatprep.subr.bf16.mxu0 %v1423_v0 }
 0x12a   : > { %v513_v52 = vpop.f32.mrb[4].mxu0  ;;  %v570_v58 = vpop.f32.mrb[4].mxu1 }
 0x12b   : > { %v578_v57 = vmul.f32 0.35355338, %v513_v52  ;;  %v1236_v59 = vpop.f32.mrb[5].mxu0  ;;  %v579_v63 = vmul.f32 0.35355338, %v570_v58  ;;  %v1244_v1 = vpop.f32.mrb[5].mxu1 }
 0x12c   : > { %v516_v2 = vpop.f32.mrb[6].mxu0  ;;  %v573_v3 = vpop.f32.mrb[6].mxu1 }
 0x12d   : > { %v1237_v4 = vpop.f32.mrb[7].mxu0  ;;  %v622_v5 = vmul.f32 %v621_v51, %v578_v57  ;;  %v590_v6 = vmul.f32 %v589_v54, %v578_v57  ;;  %v638_v7 = vmul.f32 %v637_v55, %v578_v57  ;;  %v606_v8 = vmul.f32 %v605_v56, %v578_v57  ;;  %v1245_v9 = vpop.f32.mrb[7].mxu1 }
 0x12e   : > { %v626_v10 = vmul.f32 %v625_v53, %v579_v63  ;;  %v594_v11 = vmul.f32 %v593_v60, %v579_v63  ;;  %v642_v12 = vmul.f32 %v641_v61, %v579_v63  ;;  %v610_v13 = vmul.f32 %v609_v62, %v579_v63 }
 0x12f   : > { %v623_v14 = vadd.f32 %v622_v5, %v619_v47  ;;  %v591_v15 = vadd.f32 %v590_v6, %v587_v48  ;;  %v639_v16 = vadd.f32 %v638_v7, %v635_v49  ;;  %v607_v17 = vadd.f32 %v606_v8, %v603_v50  ;;  %v1336_v47 = vld [vmem:[%s1542_s17 + $0xc] sm:$0xff]   ;;  %v1337_v48 = vld [vmem:[%s1542_s17 + $0x8] ss:$0 sps:$4 sm:$0x11]  }
 0x130   : > { %v1338_v49 = vld [vmem:[%s1542_s17 + $0x14] ss:$0 sps:$4 sm:$0x11]   ;;  %1255 = vmatpush3.bf16.msra.mxu1 %v1336_v47  ;;  %v1425_v50 = vmov 0   ;;  %v690_v60 = vstv %s1604_s23  ;;  %v706_v61 = vstv %s1606_s24  ;;  %v722_v62 = vstv %s1608_s25 }
 0x131   : > { %v627_v18 = vadd.f32 %v626_v10, %v623_v14  ;;  %v595_v19 = vadd.f32 %v594_v11, %v591_v15  ;;  %v643_v20 = vadd.f32 %v642_v12, %v639_v16  ;;  %v611_v21 = vadd.f32 %v610_v13, %v607_v17  ;;  %1256 = vmatprep.subr.bf16.mxu1 %v1423_v0 }
 0x132   : > { %v1596_v51 = vsel %vm770_vm3, 65535, %v1425_v50  ;;  %v738_v63 = vstv %s1612_s27  ;;  %v694_v2 = vstv %s1610_s26  ;;  %v710_v3 = vstv %s1616_s29 }
 0x133   : > { %v651_v22 = vsel %vm644_vm2, %v627_v18, -inf  ;;  %v645_v23 = vsel %vm644_vm2, %v595_v19, -inf  ;;  %v654_v24 = vsel %vm644_vm2, %v643_v20, -inf  ;;  %v648_v25 = vsel %vm644_vm2, %v611_v21, -inf }
 0x134   : > { %652 = vmax.xlane.f32.xlu1 %v651_v22  ;;  %646 = vmax.xlane.f32.xlu0 %v645_v23  ;;  %v774_v52 = vand.u32 %v1337_v48, %v1596_v51  ;;  %v829_v53 = vand.u32 %v1338_v49, %v1596_v51  ;;  %v726_v4 = vstv %s1618_s30  ;;  %v742_v5 = vstv %s1620_s6 }
 0x135   : > { %v698_v8 = vstv %s1614_s28  ;;  %v714_v9 = vstv %s1622_s7  ;;  %v730_v10 = vstv %s1624_s8  ;;  %v702_v13 = vstv %s1626_s9 }
 0x136   : > { %1249 = vmatpush3.bf16.msra.mxu0 %v774_v52  ;;  %1257 = vmatpush3.bf16.msra.mxu1 %v829_v53 }
 0x137   : > { %1262 = vmatprep.subr.bf16.mxu0 %v1423_v0  ;;  %1270 = vmatprep.subr.bf16.mxu1 %v1423_v0 }
 0x138   : > { %655 = vmax.xlane.f32.xlu1 %v654_v24  ;;  %649 = vmax.xlane.f32.xlu0 %v648_v25 }
 0x1c1   : > { %v653_v26 = vpop.xlane.xlu1 %652  ;;  %v647_v27 = vpop.xlane.xlu0 %646 }
 0x1c2   : > { %v659_v28 = vsub.f32 %v627_v18, %v653_v26  ;;  %v657_v29 = vsub.f32 %v595_v19, %v647_v27 }
 0x1c4   : > { %v661_v30 = vmul.f32 1.442695, %v657_v29  ;;  %v665_v31 = vmul.f32 1.442695, %v659_v28  ;;  %v734_v29 = vstv %s1630_s11 }
 0x1c5   : > { %v656_v32 = vpop.xlane.xlu1 %655  ;;  %v650_v33 = vpop.xlane.xlu0 %649 }
 0x1c6   : > { %v660_v34 = vsub.f32 %v643_v20, %v656_v32  ;;  %v658_v35 = vsub.f32 %v611_v21, %v650_v33  ;;  %1343 = vpow2.f32 %v661_v30  ;;  %v718_v21 = vstv %s1628_s10 }
 0x1c7   : > { %1345 = vpow2.f32 %v665_v31  ;;  %v746_v31 = vstv %s1632_s12 }
 0x1c8   : > { %v663_v36 = vmul.f32 1.442695, %v658_v35  ;;  %v667_v37 = vmul.f32 1.442695, %v660_v34 }
 0x1ca   : > { %1347 = vpow2.f32 %v663_v36 }
 0x1cb   : > { %1349 = vpow2.f32 %v667_v37  ;;  %v750_v37 = vstv %s1642_s13 }
 0x1d0   : > { %v1344_v38 = vpop.eup %1343 }
 0x1d1   : > { %v669_v39 = vsel %vm644_vm2, %v1344_v38, 0.0  ;;  %v1583_v40 = vpop.eup %1345 }
 0x1d2   : > { %670 = vadd.xlane.f32.xlu0 %v669_v39  ;;  %v675_v42 = vsel %vm644_vm2, %v1583_v40, 0.0 }
 0x1d4   : > { %v1348_v41 = vpop.eup %1347 }
 0x1d5   : > { %v672_v43 = vsel %vm644_vm2, %v1348_v41, 0.0  ;;  %v1588_v44 = vpop.eup %1349 }
 0x1d6   : > { %676 = vadd.xlane.f32.xlu0 %v675_v42  ;;  %673 = vadd.xlane.f32.xlu1 %v672_v43  ;;  %v678_v45 = vsel %vm644_vm2, %v1588_v44, 0.0  ;;  %v1341_v43 = vld [vmem:[%s1542_s17 + $0x20] ss:$0 sps:$4 sm:$0x11]  }
 0x1d7   : > { %v884_v52 = vand.u32 %v1341_v43, %v1596_v51 }
 0x1da   : > { %679 = vadd.xlane.f32.xlu1 %v678_v45 }
 0x25f   : > { %v671_v54 = vpop.xlane.xlu0 %670 }
 0x260   : > { %1351 = vrcp.f32 %v671_v54 }
 0x263   : > { %v674_v55 = vpop.xlane.xlu1 %673  ;;  %v677_v56 = vpop.xlane.xlu0 %676 }
 0x264   : > { %1353 = vrcp.f32 %v674_v55 }
 0x265   : > { %1355 = vrcp.f32 %v677_v56 }
 0x267   : > { %v680_v57 = vpop.xlane.xlu1 %679 }
 0x268   : > { %1357 = vrcp.f32 %v680_v57 }
 0x26a   : > { %v1352_v58 = vpop.eup %1351 }
 0x26b   : > { %v685_v59 = vmul.f32 %v1352_v58, %v1344_v38  ;;  %v988_v58 = vld [vmem:[%s1675_s15] sm:$0x1] }
 0x26d   : > { %v691_v12 = vmul.f32 %v690_v60, %v685_v59  ;;  %v707_v14 = vmul.f32 %v706_v61, %v685_v59  ;;  %v723_v22 = vmul.f32 %v722_v62, %v685_v59  ;;  %v739_v23 = vmul.f32 %v738_v63, %v685_v59  ;;  %v991_v60 = vld [vmem:[%s1675_s15 + $0x1] sm:$0x1] }
 0x26e   : > { %v1354_v1 = vpop.eup %1353 }
 0x26f   : > { %v1356_v6 = vpop.eup %1355  ;;  %v686_v7 = vmul.f32 %v1354_v1, %v1348_v41  ;;  %v1340_v41 = vld [vmem:[%s1542_s17 + $0x24] sm:$0xff]  }
 0x270   : > { %v687_v11 = vmul.f32 %v1356_v6, %v1583_v40  ;;  %v1339_v40 = vld [vmem:[%s1542_s17 + $0x18] sm:$0xff]  }
 0x271   : > { %v695_v15 = vmul.f32 %v694_v2, %v686_v7  ;;  %v711_v16 = vmul.f32 %v710_v3, %v686_v7  ;;  %v727_v17 = vmul.f32 %v726_v4, %v686_v7  ;;  %v743_v18 = vmul.f32 %v742_v5, %v686_v7 }
 0x272   : > { %v1358_v19 = vpop.eup %1357  ;;  %v699_v20 = vmul.f32 %v698_v8, %v687_v11  ;;  %v715_v27 = vmul.f32 %v714_v9, %v687_v11  ;;  %v731_v36 = vmul.f32 %v730_v10, %v687_v11  ;;  %v747_v42 = vmul.f32 %v746_v31, %v687_v11  ;;  %v994_v9 = vld [vmem:[%s1675_s15 + $0x2] sm:$0x1]  ;;  %v997_v11 = vld [vmem:[%s1675_s15 + $0x3] sm:$0x1] }
 0x273   : > { %v688_v24 = vmul.f32 %v1358_v19, %v1588_v44  ;;  %v696_v25 = vadd.f32 %v695_v15, %v691_v12  ;;  %v712_v26 = vadd.f32 %v711_v16, %v707_v14  ;;  %v728_v28 = vadd.f32 %v727_v17, %v723_v22  ;;  %v1342_v44 = vld [vmem:[%s1542_s17 + $0x2c] ss:$0 sps:$4 sm:$0x11]  }
 0x274   : > { %v744_v30 = vadd.f32 %v743_v18, %v739_v23  ;;  %v939_v53 = vand.u32 %v1342_v44, %v1596_v51 }
 0x275   : > { %v700_v32 = vadd.f32 %v699_v20, %v696_v25  ;;  %v703_v33 = vmul.f32 %v702_v13, %v688_v24  ;;  %v716_v34 = vadd.f32 %v715_v27, %v712_v26  ;;  %v719_v35 = vmul.f32 %v718_v21, %v688_v24 }
 0x276   : > { %v732_v45 = vadd.f32 %v731_v36, %v728_v28  ;;  %v735_v46 = vmul.f32 %v734_v29, %v688_v24  ;;  %v748_v49 = vadd.f32 %v747_v42, %v744_v30  ;;  %v751_v50 = vmul.f32 %v750_v37, %v688_v24 }
 0x277   : > { %v704_v38 = vadd.f32 %v703_v33, %v700_v32  ;;  %v720_v39 = vadd.f32 %v719_v35, %v716_v34 }
 0x278   : > { %v736_v54 = vadd.f32 %v735_v46, %v732_v45  ;;  %v752_v55 = vadd.f32 %v751_v50, %v748_v49 }
 0x279   : > { %v753_v47 = vpack.c.bf16 %v704_v38, %v704_v38  ;;  %v754_v48 = vpack.c.bf16 %v720_v39, %v720_v39 }
 0x27a   : > { %v755_v56 = vpack.c.bf16 %v736_v54, %v736_v54  ;;  %v756_v57 = vpack.c.bf16 %v752_v55, %v752_v55 }
 0x27b   : > { %1251 = vmatmul.mubr.msk.bf16.vlgmr.msra.gmra.mrb[8].mxu0 %vm766_vm4, %v753_v47  ;;  %1259 = vmatmul.mubr.msk.bf16.vlgmr.msra.gmra.mrb[8].mxu1 %vm766_vm4, %v754_v48 }
 0x27c   : > { %1263 = vmatpush3.bf16.msra.mxu0 %v1339_v40  ;;  %1271 = vmatpush3.bf16.msra.mxu1 %v1340_v41 }
 0x27d   : > { %1264 = vmatprep.subr.bf16.mxu0 %v1423_v0  ;;  %1272 = vmatprep.subr.bf16.mxu1 %v1423_v0 }
 0x27e   : > { %1266 = vmatprep.mubr.msk.bf16.mxu0 %vm1424_vm0, %v1423_v0  ;;  %1274 = vmatprep.mubr.msk.bf16.mxu1 %vm1424_vm0, %v1423_v0 }
 0x280   : > { %1265 = vmatpush3.bf16.msra.mxu0 %v884_v52  ;;  %1273 = vmatpush3.bf16.msra.mxu1 %v939_v53 }
 0x283   : > { %1267 = vmatmul.mubr.msk.bf16.vlgmr.msra.gmra.mrb[12].mxu0 %vm766_vm4, %v755_v56  ;;  %1275 = vmatmul.mubr.msk.bf16.vlgmr.msra.gmra.mrb[12].mxu1 %vm766_vm4, %v756_v57 }
 0x34e   : > { %v810_v0 = vpop.f32.mrb[8].mxu0  ;;  %v865_v59 = vpop.f32.mrb[8].mxu1 }
 0x34f   : > { %v981_v61 = vpack.c.bf16 %v810_v0, %v810_v0  ;;  %v982_v62 = vpack.c.bf16 %v865_v59, %v865_v59  ;;  %v1252_v63 = vpop.f32.mrb[9].mxu0  ;;  %v1260_v1 = vpop.f32.mrb[9].mxu1 }
 0x350   : > { %v813_v2 = vpop.f32.mrb[10].mxu0  ;;  %v868_v3 = vpop.f32.mrb[10].mxu1 }
 0x351   : > { %v989_v4 = vsel %vm1677_vm7, %v981_v61, %v988_v58  ;;  %v992_v5 = vsel %vm1677_vm7, %v982_v62, %v991_v60  ;;  %v1253_v6 = vpop.f32.mrb[11].mxu0  ;;  %v1261_v7 = vpop.f32.mrb[11].mxu1 }
 0x352   : > { %990 = vst [vmem:[%s1675_s15] sm:$0x1] %v989_v4  ;;  %993 = vst [vmem:[%s1675_s15 + $0x1] sm:$0x1] %v992_v5 }
 0x356   : > { %v920_v8 = vpop.f32.mrb[12].mxu0  ;;  %v975_v10 = vpop.f32.mrb[12].mxu1 }
 0x357   : > { %v983_v12 = vpack.c.bf16 %v920_v8, %v920_v8  ;;  %v984_v13 = vpack.c.bf16 %v975_v10, %v975_v10  ;;  %v1268_v14 = vpop.f32.mrb[13].mxu0  ;;  %v1276_v15 = vpop.f32.mrb[13].mxu1 }
 0x358   : > { %v923_v16 = vpop.f32.mrb[14].mxu0  ;;  %v978_v17 = vpop.f32.mrb[14].mxu1 }
 0x359   : > { %v995_v18 = vsel %vm1677_vm7, %v983_v12, %v994_v9  ;;  %v998_v19 = vsel %vm1677_vm7, %v984_v13, %v997_v11  ;;  %v1269_v20 = vpop.f32.mrb[15].mxu0  ;;  %v1277_v21 = vpop.f32.mrb[15].mxu1 }
 0x35a   : > { %996 = vst [vmem:[%s1675_s15 + $0x2] sm:$0x1] %v995_v18  ;;  %999 = vst [vmem:[%s1675_s15 + $0x3] sm:$0x1] %v998_v19 }
 0x35b PF: > { %s17_s20 = sadd.s32 1, %s1419_s20   ;;  %s1722_s18 = smov %s1415_s19 }
 0x35c   : > { %p14_p4 = scmp.ge.s32.totalorder %s17_s20, 4   ;;  %s1723_s19 = smov %s1725_s22 }
 0x35e   :  { %16 = sbr.rel (!%p14_p4) target bundleno = 3 (0x3), region = 85 }
 0x365   :  { %1025 = vsyncpa [#allocation3], 1 }
 0x366   :  { %1027 = vsyncpa [#allocation3 + $0x1], 1 }
 0x367   :  { %1028 = vsyncpa [#allocation5], 1 }

// kernel: _lambda_.36
= control target key start
LH: loop header
LB: loop body
LE: loop exit
PB: predicated region body
PF: predicated region fallthrough
CT: control target
= control target key end

     0   :  { %v210_v0 = vmov 0.0   ;;  %vm211_vm0 = vmmov 0   ;;  %s281_s1 = inlined_call_operand.vmem [shape: bf16[128,128], index: 1, kind: input, shape index: {}]   ;;  %s282_s0 = inlined_call_operand.vmem [shape: bf16[8,128], index: 0, kind: input, shape index: {}]   ;;  %s283_s2 = inlined_call_operand.vmem [shape: f32[1,128], index: 2, kind: input, shape index: {}]   ;;  %s284_s3 = inlined_call_operand.vmem [shape: f32[1,128], index: 3, kind: input, shape index: {}]   ;;  %s285_s4 = inlined_call_operand.vmem [shape: f32[8,128], index: 4, kind: input, shape index: {}]   ;;  %s286_s5 = inlined_call_operand.vmem [shape: f32[8,128], index: 5, kind: output, shape index: {}]  }
   0x1   :  { %180 = vmatprep.subr.bf16.mxu0 %v210_v0  ;;  %v202_v1 = vld [vmem:[%s281_s1] sm:$0xff]   ;;  %196 = vmatprep.mubr.msk.bf16.mxu0 %vm211_vm0, %v210_v0  ;;  %v203_v2 = vld [vmem:[%s281_s1 + $0x8] sm:$0xff]   ;;  %v204_v3 = vld [vmem:[%s281_s1 + $0x10] sm:$0xff]  }
   0x2   :  { %181 = vmatpush3.bf16.msra.mxu0 %v202_v1  ;;  %v205_v4 = vld [vmem:[%s281_s1 + $0x18] sm:$0xff]   ;;  %v206_v5 = vld [vmem:[%s281_s1 + $0x20] sm:$0xff]   ;;  %v207_v6 = vld [vmem:[%s281_s1 + $0x28] sm:$0xff]  }
   0x3   :  { %182 = vmatprep.subr.bf16.mxu0 %v210_v0  ;;  %v208_v7 = vld [vmem:[%s281_s1 + $0x30] sm:$0xff]   ;;  %v209_v8 = vld [vmem:[%s281_s1 + $0x38] sm:$0xff]   ;;  %v27_v9 = vld [vmem:[%s282_s0] sm:$0xf] }
   0x4   :  { %v169_v10 = vld [vmem:[%s283_s2] ss:$0 sm:$0xff] }
   0x5   :  { %v170_v12 = vld [vmem:[%s284_s3] ss:$0 sm:$0xff] }
   0x6   :  { %183 = vmatpush3.bf16.msra.mxu0 %v203_v2  ;;  %v146_v15 = vld [vmem:[%s285_s4] sm:$0xff] }
   0x7   :  { %184 = vmatprep.subr.bf16.mxu0 %v210_v0 }
   0xa   :  { %185 = vmatpush3.bf16.msra.mxu0 %v204_v3 }
   0xb   :  { %186 = vmatprep.subr.bf16.mxu0 %v210_v0 }
   0xe   :  { %187 = vmatpush3.bf16.msra.mxu0 %v205_v4 }
   0xf   :  { %188 = vmatprep.subr.bf16.mxu0 %v210_v0 }
  0x12   :  { %189 = vmatpush3.bf16.msra.mxu0 %v206_v5 }
  0x13   :  { %190 = vmatprep.subr.bf16.mxu0 %v210_v0 }
  0x16   :  { %191 = vmatpush3.bf16.msra.mxu0 %v207_v6 }
  0x17   :  { %192 = vmatprep.subr.bf16.mxu0 %v210_v0 }
  0x1a   :  { %193 = vmatpush3.bf16.msra.mxu0 %v208_v7 }
  0x1b   :  { %194 = vmatprep.subr.bf16.mxu0 %v210_v0 }
  0x1e   :  { %195 = vmatpush3.bf16.msra.mxu0 %v209_v8 }
  0x21   :  { %197 = vmatmul.mubr.bf16.vlgmr.msra.gmra.mrb[0].mxu0 %v27_v9 }
  0xf4   :  { %v126_v11 = vpop.f32.mrb[0].mxu0 }
  0xf5   :  { %v145_v13 = vadd.f32 %v169_v10, %v126_v11  ;;  %v198_v14 = vpop.f32.mrb[1].mxu0 }
  0xf6   :  { %v129_v16 = vpop.f32.mrb[2].mxu0 }
  0xf7   :  { %v154_v17 = vmul.f32 %v170_v12, %v145_v13  ;;  %v199_v18 = vpop.f32.mrb[3].mxu0 }
  0xf9   :  { %v155_v19 = vadd.f32 %v154_v17, %v146_v15 }
  0xfb   :  { %156 = vst [vmem:[%s286_s5] sm:$0xff] %v155_v19 }

// kernel: _lambda_.37
= control target key start
LH: loop header
LB: loop body
LE: loop exit
PB: predicated region body
PF: predicated region fallthrough
CT: control target
= control target key end

     0   :  { %v228_v1 = vmov 0.0   ;;  %v31_v2 = vlaneseq  ;;  %vm229_vm1 = vmmov 0   ;;  %s299_s0 = inlined_call_operand.vmem [shape: f32[8,128], index: 0, kind: input, shape index: {}]   ;;  %s300_s3 = inlined_call_operand.vmem [shape: bf16[128,128], index: 3, kind: input, shape index: {}]   ;;  %s301_s1 = inlined_call_operand.vmem [shape: f32[1,128], index: 1, kind: input, shape index: {}]   ;;  %s302_s2 = inlined_call_operand.vmem [shape: f32[1,128], index: 2, kind: input, shape index: {}]   ;;  %s303_s4 = inlined_call_operand.vmem [shape: f32[1,128], index: 4, kind: input, shape index: {}]   ;;  %s304_s5 = inlined_call_operand.vmem [shape: f32[8,128], index: 5, kind: output, shape index: {}]  }
   0x1   :  { %v25_v0 = vld [vmem:[%s299_s0] sm:$0xff]  ;;  %196 = vmatprep.subr.bf16.mxu0 %v228_v1  ;;  %v219_v10 = vld [vmem:[%s300_s3 + $0x8] sm:$0xff]   ;;  %v220_v11 = vld [vmem:[%s300_s3 + $0x10] sm:$0xff]   ;;  %212 = vmatprep.mubr.msk.bf16.mxu0 %vm229_vm1, %v228_v1 }
   0x2   :  { %28 = vadd.xlane.f32.xlu0 %v25_v0  ;;  %v32_v3 = vand.u32 127, %v31_v2  ;;  %v218_v9 = vld [vmem:[%s300_s3] sm:$0xff]   ;;  %v221_v12 = vld [vmem:[%s300_s3 + $0x18] sm:$0xff]   ;;  %v223_v14 = vld [vmem:[%s300_s3 + $0x28] sm:$0xff]  }
   0x3   :  { %197 = vmatpush3.bf16.msra.mxu0 %v218_v9  ;;  %v222_v13 = vld [vmem:[%s300_s3 + $0x20] sm:$0xff]   ;;  %v224_v15 = vld [vmem:[%s300_s3 + $0x30] sm:$0xff]   ;;  %v225_v16 = vld [vmem:[%s300_s3 + $0x38] sm:$0xff]  }
   0x4   :  { %vm33_vm0 = vcmp.lt.s32.totalorder %v32_v3, 32  ;;  %198 = vmatprep.subr.bf16.mxu0 %v228_v1  ;;  %v176_v21 = vld [vmem:[%s301_s1] ss:$0 sm:$0xff] }
   0x5   :  { %v177_v23 = vld [vmem:[%s302_s2] ss:$0 sm:$0xff] }
   0x6   :  { %v178_v28 = vld [vmem:[%s303_s4] ss:$0 sm:$0xff] }
   0x7   :  { %199 = vmatpush3.bf16.msra.mxu0 %v219_v10 }
   0x8   :  { %200 = vmatprep.subr.bf16.mxu0 %v228_v1 }
   0xb   :  { %201 = vmatpush3.bf16.msra.mxu0 %v220_v11 }
   0xc   :  { %202 = vmatprep.subr.bf16.mxu0 %v228_v1 }
   0xf   :  { %203 = vmatpush3.bf16.msra.mxu0 %v221_v12 }
  0x10   :  { %204 = vmatprep.subr.bf16.mxu0 %v228_v1 }
  0x13   :  { %205 = vmatpush3.bf16.msra.mxu0 %v222_v13 }
  0x14   :  { %206 = vmatprep.subr.bf16.mxu0 %v228_v1 }
  0x17   :  { %207 = vmatpush3.bf16.msra.mxu0 %v223_v14 }
  0x18   :  { %208 = vmatprep.subr.bf16.mxu0 %v228_v1 }
  0x1b   :  { %209 = vmatpush3.bf16.msra.mxu0 %v224_v15 }
  0x1c   :  { %210 = vmatprep.subr.bf16.mxu0 %v228_v1 }
  0x1f   :  { %211 = vmatpush3.bf16.msra.mxu0 %v225_v16 }
  0x8f   :  { %v29_v4 = vpop.xlane.xlu0 %28 }
  0x90   :  { %v30_v5 = vmul.f32 0.03125, %v29_v4 }
  0x92   :  { %v34_v6 = vsub.f32 %v25_v0, %v30_v5 }
  0x94   :  { %v35_v7 = vsel %vm33_vm0, %v34_v6, 0.0 }
  0x95   :  { %v36_v8 = vmul.f32 %v35_v7, %v35_v7 }
  0x97   :  { %37 = vadd.xlane.f32.xlu0 %v36_v8 }
 0x124   :  { %v38_v17 = vpop.xlane.xlu0 %37 }
 0x125   :  { %v39_v18 = vmul.f32 0.03125, %v38_v17 }
 0x127   :  { %v40_v19 = vadd.f32 1e-05, %v39_v18 }
 0x129   :  { %226 = vrsqrt.f32 %v40_v19 }
 0x133   :  { %v227_v20 = vpop.eup %226 }
 0x134   :  { %v42_v22 = vmul.f32 %v227_v20, %v35_v7 }
 0x136   :  { %v49_v24 = vmul.f32 %v176_v21, %v42_v22 }
 0x138   :  { %v56_v25 = vadd.f32 %v177_v23, %v49_v24 }
 0x13a   :  { %v57_v26 = vpack.c.bf16 %v56_v25, %v56_v25 }
 0x13c   :  { %58 = vst [vmem:[#allocation2] sm:$0xf] %v57_v26 }
 0x143   :  { %v59_v27 = vld [vmem:[#allocation2] sm:$0xf] }
 0x144   :  { %213 = vmatmul.mubr.bf16.vlgmr.msra.gmra.mrb[0].mxu0 %v59_v27 }
 0x217   :  { %v165_v29 = vpop.f32.mrb[0].mxu0 }
 0x218   :  { %v166_v30 = vadd.f32 %v178_v28, %v165_v29  ;;  %v214_v31 = vpop.f32.mrb[1].mxu0 }
 0x219   :  { %v168_v32 = vpop.f32.mrb[2].mxu0 }
 0x21a   :  { %171 = vst [vmem:[%s304_s5] sm:$0xff] %v166_v30  ;;  %v215_v33 = vpop.f32.mrb[3].mxu0 }

</bundles_post_ra>
